<compile_context>
chip_gen: v7x
topology: tpu7x:2x2x1
jax: 0.10.0
libtpu: 0.0.40
codegen_flags: <defaults>
</compile_context>

<pallas_src>
import functools
import numpy as np
import jax
import jax.numpy as jnp
from jax.experimental import pallas as pl
from jax.experimental.pallas import tpu as pltpu

# ---------------- model dimensions (small, consistent with the forward) ------
T_SEQ = 8           # token sequence length (leading 0 token included)
N_SYMBOLS = 100     # vocab size of TextCleaner
EMB_DIM = 32        # token embedding dim
HIDDEN = 32         # text-encoder channels
BERT_DIM = 32       # PLBERT hidden dim
STYLE_DIM = 256     # s_pred dim (ref = [:128], s = [128:])
D_HID = 32          # predictor hidden
MAX_DUR = 16        # duration_proj output bins (duration per token < 16)
UPSAMPLE = 8        # decoder samples per frame
# static upper bound on total frames: T_SEQ*MAX_DUR + 5 = 133, rounded up to a
# sublane/lane friendly 144 (144*UPSAMPLE = 1152 = 9*128 samples).
MAX_FRAMES = 144


# ---------------- BlockSpec helper --------------------------------------------
def _spec(shape):
    shape = tuple(shape)
    return pl.BlockSpec(shape, lambda i, _n=len(shape): (0,) * _n)


# ---------------- matmul helpers (avoid in-kernel transposes) ------------------
def _mmT(a, b):
    """a^T @ b without materializing the transpose: contract dim 0 of both."""
    return jax.lax.dot_general(a, b, (((0,), (0,)), ((), ())),
                               preferred_element_type=jnp.float32)


def _mTvT(w, v):
    """w^T @ v^T for a row vector v: (K, N) x (1, K) -> (N, 1) column."""
    return jax.lax.dot_general(w, v, (((0,), (1,)), ((), ())),
                               preferred_element_type=jnp.float32)


# ---------------- the single fused kernel -------------------------------------
def _styletts2_kernel(tok_ref, noise_ref, emb_tbl_ref,
                      enc_w_ref, enc_b_ref, benc_w_ref, benc_b_ref,
                      dw1_ref, db1_ref, dw2_ref, db2_ref,
                      pte_w_ref, pte_b_ref,
                      wih_ref, bih_ref, whh_ref, bhh_ref,
                      dur_w_ref, dur_b_ref,
                      gbs_w_ref, gbs_bT_ref, gbr_w_ref, gbr_bT_ref,
                      f0_w_ref, f0_b_ref, n_w_ref, n_b_ref,
                      dec_w_ref, dec_bT_ref,
                      wavT_ref, nframes_ref, *, steps, scale):
    f32 = jnp.float32

    # ---- 1) token gather (one-hot matmul) + text_encoder + PLBERT + bert_encoder ----
    onehot = (jax.lax.broadcasted_iota(jnp.int32, (T_SEQ, N_SYMBOLS), 1)
              == tok_ref[...]).astype(f32)                                    # (T, V)
    emb = jnp.dot(onehot, emb_tbl_ref[...], preferred_element_type=f32)       # (T, EMB)
    enc = jnp.tanh(jnp.dot(emb, enc_w_ref[...], preferred_element_type=f32)
                   + enc_b_ref[...])                                          # (T, 2*HID)
    t_en = enc[:, 0:HIDDEN]                                                   # (T, HIDDEN)
    bert_dur = enc[:, HIDDEN:HIDDEN + BERT_DIM]                               # (T, BERT)
    d_en = (jnp.dot(bert_dur, benc_w_ref[...], preferred_element_type=f32)
            + benc_b_ref[...])                                                # (T, HIDDEN)
    emb_pool = jnp.mean(bert_dur, axis=0, keepdims=True)                      # (1, BERT)

    # ---- 2) diffusion sampler loop (weights resident, embedding term hoisted) ----
    w1x = dw1_ref[0:STYLE_DIM, :]                                             # (S, S)
    w1e = dw1_ref[STYLE_DIM:STYLE_DIM + BERT_DIM, :]                          # (B, S)
    e_term = (jnp.dot(scale * emb_pool, w1e, preferred_element_type=f32)
              + db1_ref[...])                                                 # (1, S)
    w2 = dw2_ref[...]
    b2 = db2_ref[...]
    x = noise_ref[...]                                                        # (1, S)
    for _ in range(steps):                                                    # unrolled
        h = jnp.tanh(jnp.dot(x, w1x, preferred_element_type=f32) + e_term)
        h = jnp.dot(h, w2, preferred_element_type=f32) + b2
        x = x - 0.2 * h
    ref_sty = x[:, 0:128]                                                     # acoustic style
    s_sty = x[:, 128:256]                                                     # prosody style

    # ---- 3) predictor.text_encoder + LSTM recurrence + duration head ----
    w_d = pte_w_ref[0:HIDDEN, :]
    w_s = pte_w_ref[HIDDEN:HIDDEN + 128, :]
    d_tc = jnp.tanh(jnp.dot(d_en, w_d, preferred_element_type=f32)
                    + jnp.dot(s_sty, w_s, preferred_element_type=f32)
                    + pte_b_ref[...])                                         # (T, D_HID)

    gx = jnp.dot(d_tc, wih_ref[...], preferred_element_type=f32) + bih_ref[...]   # (T, 4H)
    whh = whh_ref[...]
    bhh = bhh_ref[...]
    h_t = jnp.zeros((1, D_HID), f32)
    c_t = jnp.zeros((1, D_HID), f32)
    hs = []
    for t in range(T_SEQ):                                                    # unrolled
        gates = gx[t:t + 1, :] + jnp.dot(h_t, whh, preferred_element_type=f32) + bhh
        i_g = jax.nn.sigmoid(gates[:, 0 * D_HID:1 * D_HID])
        f_g = jax.nn.sigmoid(gates[:, 1 * D_HID:2 * D_HID])
        g_g = jnp.tanh(gates[:, 2 * D_HID:3 * D_HID])
        o_g = jax.nn.sigmoid(gates[:, 3 * D_HID:4 * D_HID])
        c_t = f_g * c_t + i_g * g_g
        h_t = o_g * jnp.tanh(c_t)
        hs.append(h_t)
    lstm_out = jnp.concatenate(hs, axis=0)                    # (T, D_HID); no per-row stores

    logits = (jnp.dot(lstm_out, dur_w_ref[...], preferred_element_type=f32)
              + dur_b_ref[...])                                               # (T, MAX_DUR)
    duration = jnp.sum(jax.nn.sigmoid(logits), axis=-1, keepdims=True)        # (T, 1)
    pred_dur = jnp.maximum(jnp.floor(duration + 0.5), 1.0)                    # round, clamp>=1
    row = jax.lax.broadcasted_iota(jnp.int32, (T_SEQ, 1), 0)
    pred_dur = pred_dur + jnp.where(row == T_SEQ - 1, 5.0, 0.0)               # last token += 5

    # ---- alignment built in-kernel (cumsum via lower-triangular matmul) ----
    r_i = jax.lax.broadcasted_iota(jnp.int32, (T_SEQ, T_SEQ), 0)
    c_i = jax.lax.broadcasted_iota(jnp.int32, (T_SEQ, T_SEQ), 1)
    tri = (c_i <= r_i).astype(f32)                                            # lower-tri incl diag
    ends = jnp.dot(tri, pred_dur, preferred_element_type=f32)                 # (T, 1)
    starts = ends - pred_dur
    fr = jax.lax.broadcasted_iota(jnp.int32, (T_SEQ, MAX_FRAMES), 1).astype(f32)
    aln = ((fr >= starts) & (fr < ends)).astype(f32)                          # (T, F)
    total = ends[T_SEQ - 1:T_SEQ, :]                                          # (1, 1) frame count
    lane_fr = jax.lax.broadcasted_iota(jnp.int32, (1, MAX_FRAMES), 1).astype(f32)
    fmaskT = (lane_fr < total).astype(f32)                                    # (1, F)

    # ---- 4) alignment-apply + F0Ntrain + decoder, frames on the LANE axis ----
    en_fcT = _mmT(d_tc, aln)                                                  # (D_HID, F)
    asr_fcT = _mmT(t_en, aln)                                                 # (HIDDEN, F)

    gbsT = _mTvT(gbs_w_ref[...], s_sty) + gbs_bT_ref[...]                     # (4*D_HID, 1)
    g_f0 = gbsT[0 * D_HID:1 * D_HID, :]
    b_f0 = gbsT[1 * D_HID:2 * D_HID, :]
    g_n = gbsT[2 * D_HID:3 * D_HID, :]
    b_n = gbsT[3 * D_HID:4 * D_HID, :]

    f0T = _mmT(f0_w_ref[...], en_fcT * (1.0 + g_f0) + b_f0) + f0_b_ref[...]   # (1, F)
    nT = _mmT(n_w_ref[...], en_fcT * (1.0 + g_n) + b_n) + n_b_ref[...]        # (1, F)

    nch = HIDDEN + 2
    gbrT = _mTvT(gbr_w_ref[...], ref_sty) + gbr_bT_ref[...]                   # (2*nch, 1)
    g_dec = gbrT[0:nch, :]
    b_dec = gbrT[nch:2 * nch, :]

    h_asrT = asr_fcT * (1.0 + g_dec[0:HIDDEN, :]) + b_dec[0:HIDDEN, :]        # (HIDDEN, F)
    h_f0T = f0T * (1.0 + g_dec[HIDDEN:HIDDEN + 1, :]) + b_dec[HIDDEN:HIDDEN + 1, :]
    h_nT = nT * (1.0 + g_dec[HIDDEN + 1:HIDDEN + 2, :]) + b_dec[HIDDEN + 1:HIDDEN + 2, :]

    wavT = (_mmT(dec_w_ref[0:HIDDEN, :], h_asrT)
            + _mmT(dec_w_ref[HIDDEN:HIDDEN + 1, :], h_f0T)
            + _mmT(dec_w_ref[HIDDEN + 1:HIDDEN + 2, :], h_nT)
            + dec_bT_ref[...])                                                # (UPSAMPLE, F)

    wavT_ref[...] = jnp.tanh(wavT) * fmaskT                                   # lane-dense store
    nframes_ref[...] = total


# ---------------- deterministic parameter construction (weights pre-packed) ----
def _init(key, shape):
    scale = 1.0 / np.sqrt(max(1, shape[0]))
    return scale * jax.random.normal(key, shape, dtype=jnp.float32)


def build_params(key):
    names_shapes = [
        ("emb_table", (N_SYMBOLS, EMB_DIM)),
        ("txt_w", (EMB_DIM, HIDDEN)), ("txt_b", (HIDDEN,)),
        ("bert_w", (EMB_DIM, BERT_DIM)), ("bert_b", (BERT_DIM,)),
        ("bert_enc_w", (BERT_DIM, HIDDEN)), ("bert_enc_b", (HIDDEN,)),
        ("diff_w1", (STYLE_DIM + BERT_DIM, STYLE_DIM)), ("diff_b1", (STYLE_DIM,)),
        ("diff_w2", (STYLE_DIM, STYLE_DIM)), ("diff_b2", (STYLE_DIM,)),
        ("pte_w", (HIDDEN + 128, D_HID)), ("pte_b", (D_HID,)),
        ("lstm_wih", (D_HID, 4 * D_HID)), ("lstm_bih", (4 * D_HID,)),
        ("lstm_whh", (D_HID, 4 * D_HID)), ("lstm_bhh", (4 * D_HID,)),
        ("dur_w", (D_HID, MAX_DUR)), ("dur_b", (MAX_DUR,)),
        ("f0_gamma_w", (128, D_HID)), ("f0_gamma_b", (D_HID,)),
        ("f0_beta_w", (128, D_HID)), ("f0_beta_b", (D_HID,)),
        ("f0_proj_w", (D_HID, 1)), ("f0_proj_b", (1,)),
        ("n_gamma_w", (128, D_HID)), ("n_gamma_b", (D_HID,)),
        ("n_beta_w", (128, D_HID)), ("n_beta_b", (D_HID,)),
        ("n_proj_w", (D_HID, 1)), ("n_proj_b", (1,)),
        ("dec_gamma_w", (128, HIDDEN + 2)), ("dec_gamma_b", (HIDDEN + 2,)),
        ("dec_beta_w", (128, HIDDEN + 2)), ("dec_beta_b", (HIDDEN + 2,)),
        ("dec_proj_w", (HIDDEN + 2, UPSAMPLE)), ("dec_proj_b", (UPSAMPLE,)),
    ]
    keys = jax.random.split(key, len(names_shapes))
    raw = {name: _init(k, shape) for (name, shape), k in zip(names_shapes, keys)}

    # All per-call weight plumbing hoisted to build time (done once):
    return {
        "emb_table": raw["emb_table"],
        "enc_w": jnp.concatenate([raw["txt_w"], raw["bert_w"]], axis=1),
        "enc_b": jnp.concatenate([raw["txt_b"], raw["bert_b"]]).reshape(1, -1),
        "benc_w": raw["bert_enc_w"], "benc_b": raw["bert_enc_b"].reshape(1, -1),
        "diff_w1": raw["diff_w1"], "diff_b1": raw["diff_b1"].reshape(1, -1),
        "diff_w2": raw["diff_w2"], "diff_b2": raw["diff_b2"].reshape(1, -1),
        "pte_w": raw["pte_w"], "pte_b": raw["pte_b"].reshape(1, -1),
        "lstm_wih": raw["lstm_wih"], "lstm_bih": raw["lstm_bih"].reshape(1, -1),
        "lstm_whh": raw["lstm_whh"], "lstm_bhh": raw["lstm_bhh"].reshape(1, -1),
        "dur_w": raw["dur_w"], "dur_b": raw["dur_b"].reshape(1, -1),
        "gbs_w": jnp.concatenate([raw["f0_gamma_w"], raw["f0_beta_w"],
                                  raw["n_gamma_w"], raw["n_beta_w"]], axis=1),
        "gbs_bT": jnp.concatenate([raw["f0_gamma_b"], raw["f0_beta_b"],
                                   raw["n_gamma_b"], raw["n_beta_b"]]).reshape(-1, 1),
        "gbr_w": jnp.concatenate([raw["dec_gamma_w"], raw["dec_beta_w"]], axis=1),
        "gbr_bT": jnp.concatenate([raw["dec_gamma_b"], raw["dec_beta_b"]]).reshape(-1, 1),
        "f0_w": raw["f0_proj_w"], "f0_b": raw["f0_proj_b"].reshape(1, 1),
        "n_w": raw["n_proj_w"], "n_b": raw["n_proj_b"].reshape(1, 1),
        "dec_w": raw["dec_proj_w"], "dec_bT": raw["dec_proj_b"].reshape(-1, 1),
    }


# ---------------- forward pass: ONE pallas_call, fully jittable ----------------
@functools.partial(jax.jit, static_argnames=("diffusion_steps", "embedding_scale"))
def styletts2_forward(params, tokens, noise, diffusion_steps=5, embedding_scale=1.0):
    tok2d = tokens.reshape(T_SEQ, 1).astype(jnp.int32)
    noise2d = noise.reshape(1, STYLE_DIM).astype(jnp.float32)

    operands = [
        tok2d, noise2d, params["emb_table"],
        params["enc_w"], params["enc_b"],
        params["benc_w"], params["benc_b"],
        params["diff_w1"], params["diff_b1"],
        params["diff_w2"], params["diff_b2"],
        params["pte_w"], params["pte_b"],
        params["lstm_wih"], params["lstm_bih"],
        params["lstm_whh"], params["lstm_bhh"],
        params["dur_w"], params["dur_b"],
        params["gbs_w"], params["gbs_bT"],
        params["gbr_w"], params["gbr_bT"],
        params["f0_w"], params["f0_b"],
        params["n_w"], params["n_b"],
        params["dec_w"], params["dec_bT"],
    ]

    wavT, nframes = pl.pallas_call(
        functools.partial(_styletts2_kernel, steps=diffusion_steps,
                          scale=float(embedding_scale)),
        grid=(1,),
        in_specs=[_spec(op.shape) for op in operands],
        out_specs=(_spec((UPSAMPLE, MAX_FRAMES)), _spec((1, 1))),
        out_shape=(jax.ShapeDtypeStruct((UPSAMPLE, MAX_FRAMES), jnp.float32),
                   jax.ShapeDtypeStruct((1, 1), jnp.float32)),
        compiler_params=pltpu.CompilerParams(dimension_semantics=("arbitrary",)),
    )(*operands)

    # TODO(synk): reference returns a variable-length waveform; here we return a
    # statically-shaped padded waveform (invalid frames zeroed) plus the valid sample count.
    wav = wavT.T.reshape(-1)                                   # tiny (8,144) relayout outside
    n_samples = (nframes[0, 0] * UPSAMPLE).astype(jnp.int32)
    return wav, n_samples


# ---------------- main --------------------------------------------------------
if __name__ == "__main__":
    key = jax.random.PRNGKey(0)
    pkey, tkey, nkey = jax.random.split(key, 3)

    params = build_params(pkey)

    # synthetic phoneme tokens; reference inserts a leading 0 token.
    toks = jax.random.randint(tkey, (T_SEQ - 1,), 1, N_SYMBOLS, dtype=jnp.int32)
    tokens = jnp.concatenate([jnp.zeros((1,), jnp.int32), toks])              # (T_SEQ,)

    # self.noise = torch.randn(1, 1, 256)
    noise = jax.random.normal(nkey, (1, 1, STYLE_DIM), dtype=jnp.float32)

    wav, n_samples = styletts2_forward(params, tokens, noise,
                                       diffusion_steps=5, embedding_scale=1.0)
    wav = jax.block_until_ready(wav)

    assert wav.ndim == 1 and wav.shape[0] == MAX_FRAMES * UPSAMPLE
    assert np.all(np.isfinite(np.asarray(wav)))
    assert int(n_samples) > 0
    print("KERNEL_OK")
</pallas_src>

<mosaic_0001>
module attributes {stable_mosaic.version = 11 : i64} {
  func.func @_styletts2_kernel(%arg0: i32, %arg1: memref<8x1xi32, #tpu.memory_space<vmem>>, %arg2: memref<1x256xf32, #tpu.memory_space<vmem>>, %arg3: memref<100x32xf32, #tpu.memory_space<vmem>>, %arg4: memref<32x64xf32, #tpu.memory_space<vmem>>, %arg5: memref<1x64xf32, #tpu.memory_space<vmem>>, %arg6: memref<32x32xf32, #tpu.memory_space<vmem>>, %arg7: memref<1x32xf32, #tpu.memory_space<vmem>>, %arg8: memref<288x256xf32, #tpu.memory_space<vmem>>, %arg9: memref<1x256xf32, #tpu.memory_space<vmem>>, %arg10: memref<256x256xf32, #tpu.memory_space<vmem>>, %arg11: memref<1x256xf32, #tpu.memory_space<vmem>>, %arg12: memref<160x32xf32, #tpu.memory_space<vmem>>, %arg13: memref<1x32xf32, #tpu.memory_space<vmem>>, %arg14: memref<32x128xf32, #tpu.memory_space<vmem>>, %arg15: memref<1x128xf32, #tpu.memory_space<vmem>>, %arg16: memref<32x128xf32, #tpu.memory_space<vmem>>, %arg17: memref<1x128xf32, #tpu.memory_space<vmem>>, %arg18: memref<32x16xf32, #tpu.memory_space<vmem>>, %arg19: memref<1x16xf32, #tpu.memory_space<vmem>>, %arg20: memref<128x128xf32, #tpu.memory_space<vmem>>, %arg21: memref<128x1xf32, #tpu.memory_space<vmem>>, %arg22: memref<128x68xf32, #tpu.memory_space<vmem>>, %arg23: memref<68x1xf32, #tpu.memory_space<vmem>>, %arg24: memref<32x1xf32, #tpu.memory_space<vmem>>, %arg25: memref<1x1xf32, #tpu.memory_space<vmem>>, %arg26: memref<32x1xf32, #tpu.memory_space<vmem>>, %arg27: memref<1x1xf32, #tpu.memory_space<vmem>>, %arg28: memref<34x8xf32, #tpu.memory_space<vmem>>, %arg29: memref<8x1xf32, #tpu.memory_space<vmem>>, %arg30: memref<8x144xf32, #tpu.memory_space<vmem>>, %arg31: memref<1x1xf32, #tpu.memory_space<vmem>>) attributes {dimension_semantics = [#tpu.dimension_semantics<arbitrary>], iteration_bounds = array<i64: 1>, scalar_prefetch = 0 : i64, scratch_operands = 0 : i64, tpu.core_type = #tpu.core_type<tc>, window_params = [{pipeline_mode = #tpu.pipeline_mode<synchronous>, transform_indices = @transform_0, window_bounds = array<i64: 8, 1>}, {pipeline_mode = #tpu.pipeline_mode<synchronous>, transform_indices = @transform_1, window_bounds = array<i64: 1, 256>}, {pipeline_mode = #tpu.pipeline_mode<synchronous>, transform_indices = @transform_2, window_bounds = array<i64: 100, 32>}, {pipeline_mode = #tpu.pipeline_mode<synchronous>, transform_indices = @transform_3, window_bounds = array<i64: 32, 64>}, {pipeline_mode = #tpu.pipeline_mode<synchronous>, transform_indices = @transform_4, window_bounds = array<i64: 1, 64>}, {pipeline_mode = #tpu.pipeline_mode<synchronous>, transform_indices = @transform_5, window_bounds = array<i64: 32, 32>}, {pipeline_mode = #tpu.pipeline_mode<synchronous>, transform_indices = @transform_6, window_bounds = array<i64: 1, 32>}, {pipeline_mode = #tpu.pipeline_mode<synchronous>, transform_indices = @transform_7, window_bounds = array<i64: 288, 256>}, {pipeline_mode = #tpu.pipeline_mode<synchronous>, transform_indices = @transform_8, window_bounds = array<i64: 1, 256>}, {pipeline_mode = #tpu.pipeline_mode<synchronous>, transform_indices = @transform_9, window_bounds = array<i64: 256, 256>}, {pipeline_mode = #tpu.pipeline_mode<synchronous>, transform_indices = @transform_10, window_bounds = array<i64: 1, 256>}, {pipeline_mode = #tpu.pipeline_mode<synchronous>, transform_indices = @transform_11, window_bounds = array<i64: 160, 32>}, {pipeline_mode = #tpu.pipeline_mode<synchronous>, transform_indices = @transform_12, window_bounds = array<i64: 1, 32>}, {pipeline_mode = #tpu.pipeline_mode<synchronous>, transform_indices = @transform_13, window_bounds = array<i64: 32, 128>}, {pipeline_mode = #tpu.pipeline_mode<synchronous>, transform_indices = @transform_14, window_bounds = array<i64: 1, 128>}, {pipeline_mode = #tpu.pipeline_mode<synchronous>, transform_indices = @transform_15, window_bounds = array<i64: 32, 128>}, {pipeline_mode = #tpu.pipeline_mode<synchronous>, transform_indices = @transform_16, window_bounds = array<i64: 1, 128>}, {pipeline_mode = #tpu.pipeline_mode<synchronous>, transform_indices = @transform_17, window_bounds = array<i64: 32, 16>}, {pipeline_mode = #tpu.pipeline_mode<synchronous>, transform_indices = @transform_18, window_bounds = array<i64: 1, 16>}, {pipeline_mode = #tpu.pipeline_mode<synchronous>, transform_indices = @transform_19, window_bounds = array<i64: 128, 128>}, {pipeline_mode = #tpu.pipeline_mode<synchronous>, transform_indices = @transform_20, window_bounds = array<i64: 128, 1>}, {pipeline_mode = #tpu.pipeline_mode<synchronous>, transform_indices = @transform_21, window_bounds = array<i64: 128, 68>}, {pipeline_mode = #tpu.pipeline_mode<synchronous>, transform_indices = @transform_22, window_bounds = array<i64: 68, 1>}, {pipeline_mode = #tpu.pipeline_mode<synchronous>, transform_indices = @transform_23, window_bounds = array<i64: 32, 1>}, {pipeline_mode = #tpu.pipeline_mode<synchronous>, transform_indices = @transform_24, window_bounds = array<i64: 1, 1>}, {pipeline_mode = #tpu.pipeline_mode<synchronous>, transform_indices = @transform_25, window_bounds = array<i64: 32, 1>}, {pipeline_mode = #tpu.pipeline_mode<synchronous>, transform_indices = @transform_26, window_bounds = array<i64: 1, 1>}, {pipeline_mode = #tpu.pipeline_mode<synchronous>, transform_indices = @transform_27, window_bounds = array<i64: 34, 8>}, {pipeline_mode = #tpu.pipeline_mode<synchronous>, transform_indices = @transform_28, window_bounds = array<i64: 8, 1>}, {pipeline_mode = #tpu.pipeline_mode<synchronous>, transform_indices = @transform_29, window_bounds = array<i64: 8, 144>}, {pipeline_mode = #tpu.pipeline_mode<synchronous>, transform_indices = @transform_30, window_bounds = array<i64: 1, 1>}]} {
    %0 = tpu.iota {dimensions = array<i32: 1>} : vector<8x100xi32>
    %c0 = arith.constant 0 : index
    %c0_0 = arith.constant 0 : index
    %1 = vector.load %arg1[%c0, %c0_0] : memref<8x1xi32, #tpu.memory_space<vmem>>, vector<8x1xi32>
    %2 = vector.broadcast %1 : vector<8x1xi32> to vector<8x100xi32>
    %3 = arith.cmpi eq, %0, %2 : vector<8x100xi32>
    %4 = arith.extui %3 : vector<8x100xi1> to vector<8x100xi32>
    %5 = arith.sitofp %4 : vector<8x100xi32> to vector<8x100xf32>
    %c0_1 = arith.constant 0 : index
    %c0_2 = arith.constant 0 : index
    %6 = vector.load %arg3[%c0_1, %c0_2] : memref<100x32xf32, #tpu.memory_space<vmem>>, vector<100x32xf32>
    %cst = arith.constant dense<0.000000e+00> : vector<8x32xf32>
    %7 = tpu.matmul %5, %6, %cst {dimension_numbers = #tpu.dot_dimension_numbers<[1], [0], [0], [1], [0, 0, 1, 1], [], []>} : vector<8x100xf32>, vector<100x32xf32>, vector<8x32xf32> -> vector<8x32xf32>
    %c0_3 = arith.constant 0 : index
    %c0_4 = arith.constant 0 : index
    %8 = vector.load %arg4[%c0_3, %c0_4] : memref<32x64xf32, #tpu.memory_space<vmem>>, vector<32x64xf32>
    %cst_5 = arith.constant dense<0.000000e+00> : vector<8x64xf32>
    %9 = tpu.matmul %7, %8, %cst_5 {dimension_numbers = #tpu.dot_dimension_numbers<[1], [0], [0], [1], [0, 0, 1, 1], [], []>} : vector<8x32xf32>, vector<32x64xf32>, vector<8x64xf32> -> vector<8x64xf32>
    %c0_6 = arith.constant 0 : index
    %c0_7 = arith.constant 0 : index
    %10 = vector.load %arg5[%c0_6, %c0_7] : memref<1x64xf32, #tpu.memory_space<vmem>>, vector<1x64xf32>
    %11 = vector.broadcast %10 : vector<1x64xf32> to vector<8x64xf32>
    %12 = arith.addf %9, %11 : vector<8x64xf32>
    %13 = math.tanh %12 : vector<8x64xf32>
    %14 = vector.extract_strided_slice %13 {offsets = [0, 0], sizes = [8, 32], strides = [1, 1]} : vector<8x64xf32> to vector<8x32xf32>
    %15 = vector.extract_strided_slice %13 {offsets = [0, 32], sizes = [8, 32], strides = [1, 1]} : vector<8x64xf32> to vector<8x32xf32>
    %c0_8 = arith.constant 0 : index
    %c0_9 = arith.constant 0 : index
    %16 = vector.load %arg6[%c0_8, %c0_9] : memref<32x32xf32, #tpu.memory_space<vmem>>, vector<32x32xf32>
    %cst_10 = arith.constant dense<0.000000e+00> : vector<8x32xf32>
    %17 = tpu.matmul %15, %16, %cst_10 {dimension_numbers = #tpu.dot_dimension_numbers<[1], [0], [0], [1], [0, 0, 1, 1], [], []>} : vector<8x32xf32>, vector<32x32xf32>, vector<8x32xf32> -> vector<8x32xf32>
    %c0_11 = arith.constant 0 : index
    %c0_12 = arith.constant 0 : index
    %18 = vector.load %arg7[%c0_11, %c0_12] : memref<1x32xf32, #tpu.memory_space<vmem>>, vector<1x32xf32>
    %19 = vector.broadcast %18 : vector<1x32xf32> to vector<8x32xf32>
    %20 = arith.addf %17, %19 : vector<8x32xf32>
    %cst_13 = arith.constant dense<0.000000e+00> : vector<32xf32>
    %21 = vector.multi_reduction <add>, %15, %cst_13 [0] : vector<8x32xf32> to vector<32xf32>
    %22 = vector.shape_cast %21 : vector<32xf32> to vector<1x32xf32>
    %cst_14 = arith.constant 8.000000e+00 : f32
    %23 = vector.broadcast %cst_14 : f32 to vector<1x32xf32>
    %24 = arith.divf %22, %23 : vector<1x32xf32>
    %c0_15 = arith.constant 0 : index
    %c0_16 = arith.constant 0 : index
    %25 = vector.load %arg8[%c0_15, %c0_16] : memref<288x256xf32, #tpu.memory_space<vmem>>, vector<256x256xf32>
    %c256 = arith.constant 256 : index
    %c0_17 = arith.constant 0 : index
    %26 = vector.load %arg8[%c256, %c0_17] : memref<288x256xf32, #tpu.memory_space<vmem>>, vector<32x256xf32>
    %cst_18 = arith.constant 1.000000e+00 : f32
    %27 = vector.broadcast %cst_18 : f32 to vector<1x32xf32>
    %28 = arith.mulf %27, %24 : vector<1x32xf32>
    %cst_19 = arith.constant dense<0.000000e+00> : vector<1x256xf32>
    %29 = tpu.matmul %28, %26, %cst_19 {dimension_numbers = #tpu.dot_dimension_numbers<[1], [0], [0], [1], [0, 0, 1, 1], [], []>} : vector<1x32xf32>, vector<32x256xf32>, vector<1x256xf32> -> vector<1x256xf32>
    %c0_20 = arith.constant 0 : index
    %c0_21 = arith.constant 0 : index
    %30 = vector.load %arg9[%c0_20, %c0_21] : memref<1x256xf32, #tpu.memory_space<vmem>>, vector<1x256xf32>
    %31 = arith.addf %29, %30 : vector<1x256xf32>
    %c0_22 = arith.constant 0 : index
    %c0_23 = arith.constant 0 : index
    %32 = vector.load %arg10[%c0_22, %c0_23] : memref<256x256xf32, #tpu.memory_space<vmem>>, vector<256x256xf32>
    %c0_24 = arith.constant 0 : index
    %c0_25 = arith.constant 0 : index
    %33 = vector.load %arg11[%c0_24, %c0_25] : memref<1x256xf32, #tpu.memory_space<vmem>>, vector<1x256xf32>
    %c0_26 = arith.constant 0 : index
    %c0_27 = arith.constant 0 : index
    %34 = vector.load %arg2[%c0_26, %c0_27] : memref<1x256xf32, #tpu.memory_space<vmem>>, vector<1x256xf32>
    %cst_28 = arith.constant dense<0.000000e+00> : vector<1x256xf32>
    %35 = tpu.matmul %34, %25, %cst_28 {dimension_numbers = #tpu.dot_dimension_numbers<[1], [0], [0], [1], [0, 0, 1, 1], [], []>} : vector<1x256xf32>, vector<256x256xf32>, vector<1x256xf32> -> vector<1x256xf32>
    %36 = arith.addf %35, %31 : vector<1x256xf32>
    %37 = math.tanh %36 : vector<1x256xf32>
    %cst_29 = arith.constant dense<0.000000e+00> : vector<1x256xf32>
    %38 = tpu.matmul %37, %32, %cst_29 {dimension_numbers = #tpu.dot_dimension_numbers<[1], [0], [0], [1], [0, 0, 1, 1], [], []>} : vector<1x256xf32>, vector<256x256xf32>, vector<1x256xf32> -> vector<1x256xf32>
    %39 = arith.addf %38, %33 : vector<1x256xf32>
    %cst_30 = arith.constant 2.000000e-01 : f32
    %40 = vector.broadcast %cst_30 : f32 to vector<1x256xf32>
    %41 = arith.mulf %40, %39 : vector<1x256xf32>
    %42 = arith.subf %34, %41 : vector<1x256xf32>
    %cst_31 = arith.constant dense<0.000000e+00> : vector<1x256xf32>
    %43 = tpu.matmul %42, %25, %cst_31 {dimension_numbers = #tpu.dot_dimension_numbers<[1], [0], [0], [1], [0, 0, 1, 1], [], []>} : vector<1x256xf32>, vector<256x256xf32>, vector<1x256xf32> -> vector<1x256xf32>
    %44 = arith.addf %43, %31 : vector<1x256xf32>
    %45 = math.tanh %44 : vector<1x256xf32>
    %cst_32 = arith.constant dense<0.000000e+00> : vector<1x256xf32>
    %46 = tpu.matmul %45, %32, %cst_32 {dimension_numbers = #tpu.dot_dimension_numbers<[1], [0], [0], [1], [0, 0, 1, 1], [], []>} : vector<1x256xf32>, vector<256x256xf32>, vector<1x256xf32> -> vector<1x256xf32>
    %47 = arith.addf %46, %33 : vector<1x256xf32>
    %cst_33 = arith.constant 2.000000e-01 : f32
    %48 = vector.broadcast %cst_33 : f32 to vector<1x256xf32>
    %49 = arith.mulf %48, %47 : vector<1x256xf32>
    %50 = arith.subf %42, %49 : vector<1x256xf32>
    %cst_34 = arith.constant dense<0.000000e+00> : vector<1x256xf32>
    %51 = tpu.matmul %50, %25, %cst_34 {dimension_numbers = #tpu.dot_dimension_numbers<[1], [0], [0], [1], [0, 0, 1, 1], [], []>} : vector<1x256xf32>, vector<256x256xf32>, vector<1x256xf32> -> vector<1x256xf32>
    %52 = arith.addf %51, %31 : vector<1x256xf32>
    %53 = math.tanh %52 : vector<1x256xf32>
    %cst_35 = arith.constant dense<0.000000e+00> : vector<1x256xf32>
    %54 = tpu.matmul %53, %32, %cst_35 {dimension_numbers = #tpu.dot_dimension_numbers<[1], [0], [0], [1], [0, 0, 1, 1], [], []>} : vector<1x256xf32>, vector<256x256xf32>, vector<1x256xf32> -> vector<1x256xf32>
    %55 = arith.addf %54, %33 : vector<1x256xf32>
    %cst_36 = arith.constant 2.000000e-01 : f32
    %56 = vector.broadcast %cst_36 : f32 to vector<1x256xf32>
    %57 = arith.mulf %56, %55 : vector<1x256xf32>
    %58 = arith.subf %50, %57 : vector<1x256xf32>
    %cst_37 = arith.constant dense<0.000000e+00> : vector<1x256xf32>
    %59 = tpu.matmul %58, %25, %cst_37 {dimension_numbers = #tpu.dot_dimension_numbers<[1], [0], [0], [1], [0, 0, 1, 1], [], []>} : vector<1x256xf32>, vector<256x256xf32>, vector<1x256xf32> -> vector<1x256xf32>
    %60 = arith.addf %59, %31 : vector<1x256xf32>
    %61 = math.tanh %60 : vector<1x256xf32>
    %cst_38 = arith.constant dense<0.000000e+00> : vector<1x256xf32>
    %62 = tpu.matmul %61, %32, %cst_38 {dimension_numbers = #tpu.dot_dimension_numbers<[1], [0], [0], [1], [0, 0, 1, 1], [], []>} : vector<1x256xf32>, vector<256x256xf32>, vector<1x256xf32> -> vector<1x256xf32>
    %63 = arith.addf %62, %33 : vector<1x256xf32>
    %cst_39 = arith.constant 2.000000e-01 : f32
    %64 = vector.broadcast %cst_39 : f32 to vector<1x256xf32>
    %65 = arith.mulf %64, %63 : vector<1x256xf32>
    %66 = arith.subf %58, %65 : vector<1x256xf32>
    %cst_40 = arith.constant dense<0.000000e+00> : vector<1x256xf32>
    %67 = tpu.matmul %66, %25, %cst_40 {dimension_numbers = #tpu.dot_dimension_numbers<[1], [0], [0], [1], [0, 0, 1, 1], [], []>} : vector<1x256xf32>, vector<256x256xf32>, vector<1x256xf32> -> vector<1x256xf32>
    %68 = arith.addf %67, %31 : vector<1x256xf32>
    %69 = math.tanh %68 : vector<1x256xf32>
    %cst_41 = arith.constant dense<0.000000e+00> : vector<1x256xf32>
    %70 = tpu.matmul %69, %32, %cst_41 {dimension_numbers = #tpu.dot_dimension_numbers<[1], [0], [0], [1], [0, 0, 1, 1], [], []>} : vector<1x256xf32>, vector<256x256xf32>, vector<1x256xf32> -> vector<1x256xf32>
    %71 = arith.addf %70, %33 : vector<1x256xf32>
    %cst_42 = arith.constant 2.000000e-01 : f32
    %72 = vector.broadcast %cst_42 : f32 to vector<1x256xf32>
    %73 = arith.mulf %72, %71 : vector<1x256xf32>
    %74 = arith.subf %66, %73 : vector<1x256xf32>
    %75 = vector.extract_strided_slice %74 {offsets = [0, 0], sizes = [1, 128], strides = [1, 1]} : vector<1x256xf32> to vector<1x128xf32>
    %76 = vector.extract_strided_slice %74 {offsets = [0, 128], sizes = [1, 128], strides = [1, 1]} : vector<1x256xf32> to vector<1x128xf32>
    %c0_43 = arith.constant 0 : index
    %c0_44 = arith.constant 0 : index
    %77 = vector.load %arg12[%c0_43, %c0_44] : memref<160x32xf32, #tpu.memory_space<vmem>>, vector<32x32xf32>
    %c32 = arith.constant 32 : index
    %c0_45 = arith.constant 0 : index
    %78 = vector.load %arg12[%c32, %c0_45] : memref<160x32xf32, #tpu.memory_space<vmem>>, vector<128x32xf32>
    %cst_46 = arith.constant dense<0.000000e+00> : vector<8x32xf32>
    %79 = tpu.matmul %20, %77, %cst_46 {dimension_numbers = #tpu.dot_dimension_numbers<[1], [0], [0], [1], [0, 0, 1, 1], [], []>} : vector<8x32xf32>, vector<32x32xf32>, vector<8x32xf32> -> vector<8x32xf32>
    %cst_47 = arith.constant dense<0.000000e+00> : vector<1x32xf32>
    %80 = tpu.matmul %76, %78, %cst_47 {dimension_numbers = #tpu.dot_dimension_numbers<[1], [0], [0], [1], [0, 0, 1, 1], [], []>} : vector<1x128xf32>, vector<128x32xf32>, vector<1x32xf32> -> vector<1x32xf32>
    %81 = vector.broadcast %80 : vector<1x32xf32> to vector<8x32xf32>
    %82 = arith.addf %79, %81 : vector<8x32xf32>
    %c0_48 = arith.constant 0 : index
    %c0_49 = arith.constant 0 : index
    %83 = vector.load %arg13[%c0_48, %c0_49] : memref<1x32xf32, #tpu.memory_space<vmem>>, vector<1x32xf32>
    %84 = vector.broadcast %83 : vector<1x32xf32> to vector<8x32xf32>
    %85 = arith.addf %82, %84 : vector<8x32xf32>
    %86 = math.tanh %85 : vector<8x32xf32>
    %c0_50 = arith.constant 0 : index
    %c0_51 = arith.constant 0 : index
    %87 = vector.load %arg14[%c0_50, %c0_51] : memref<32x128xf32, #tpu.memory_space<vmem>>, vector<32x128xf32>
    %cst_52 = arith.constant dense<0.000000e+00> : vector<8x128xf32>
    %88 = tpu.matmul %86, %87, %cst_52 {dimension_numbers = #tpu.dot_dimension_numbers<[1], [0], [0], [1], [0, 0, 1, 1], [], []>} : vector<8x32xf32>, vector<32x128xf32>, vector<8x128xf32> -> vector<8x128xf32>
    %c0_53 = arith.constant 0 : index
    %c0_54 = arith.constant 0 : index
    %89 = vector.load %arg15[%c0_53, %c0_54] : memref<1x128xf32, #tpu.memory_space<vmem>>, vector<1x128xf32>
    %90 = vector.broadcast %89 : vector<1x128xf32> to vector<8x128xf32>
    %91 = arith.addf %88, %90 : vector<8x128xf32>
    %c0_55 = arith.constant 0 : index
    %c0_56 = arith.constant 0 : index
    %92 = vector.load %arg16[%c0_55, %c0_56] : memref<32x128xf32, #tpu.memory_space<vmem>>, vector<32x128xf32>
    %c0_57 = arith.constant 0 : index
    %c0_58 = arith.constant 0 : index
    %93 = vector.load %arg17[%c0_57, %c0_58] : memref<1x128xf32, #tpu.memory_space<vmem>>, vector<1x128xf32>
    %cst_59 = arith.constant 0.000000e+00 : f32
    %94 = vector.broadcast %cst_59 : f32 to vector<1x32xf32>
    %cst_60 = arith.constant 0.000000e+00 : f32
    %95 = vector.broadcast %cst_60 : f32 to vector<1x32xf32>
    %96 = vector.extract_strided_slice %91 {offsets = [0, 0], sizes = [1, 128], strides = [1, 1]} : vector<8x128xf32> to vector<1x128xf32>
    %cst_61 = arith.constant dense<0.000000e+00> : vector<1x128xf32>
    %97 = tpu.matmul %94, %92, %cst_61 {dimension_numbers = #tpu.dot_dimension_numbers<[1], [0], [0], [1], [0, 0, 1, 1], [], []>} : vector<1x32xf32>, vector<32x128xf32>, vector<1x128xf32> -> vector<1x128xf32>
    %98 = arith.addf %96, %97 : vector<1x128xf32>
    %99 = arith.addf %98, %93 : vector<1x128xf32>
    %100 = vector.extract_strided_slice %99 {offsets = [0, 0], sizes = [1, 32], strides = [1, 1]} : vector<1x128xf32> to vector<1x32xf32>
    %101 = arith.negf %100 : vector<1x32xf32>
    %102 = math.exp %101 : vector<1x32xf32>
    %cst_62 = arith.constant 1.000000e+00 : f32
    %103 = vector.broadcast %cst_62 : f32 to vector<1x32xf32>
    %104 = arith.addf %103, %102 : vector<1x32xf32>
    %105 = arith.divf %103, %104 : vector<1x32xf32>
    %106 = vector.extract_strided_slice %99 {offsets = [0, 32], sizes = [1, 32], strides = [1, 1]} : vector<1x128xf32> to vector<1x32xf32>
    %107 = arith.negf %106 : vector<1x32xf32>
    %108 = math.exp %107 : vector<1x32xf32>
    %cst_63 = arith.constant 1.000000e+00 : f32
    %109 = vector.broadcast %cst_63 : f32 to vector<1x32xf32>
    %110 = arith.addf %109, %108 : vector<1x32xf32>
    %111 = arith.divf %109, %110 : vector<1x32xf32>
    %112 = vector.extract_strided_slice %99 {offsets = [0, 64], sizes = [1, 32], strides = [1, 1]} : vector<1x128xf32> to vector<1x32xf32>
    %113 = math.tanh %112 : vector<1x32xf32>
    %114 = vector.extract_strided_slice %99 {offsets = [0, 96], sizes = [1, 32], strides = [1, 1]} : vector<1x128xf32> to vector<1x32xf32>
    %115 = arith.negf %114 : vector<1x32xf32>
    %116 = math.exp %115 : vector<1x32xf32>
    %cst_64 = arith.constant 1.000000e+00 : f32
    %117 = vector.broadcast %cst_64 : f32 to vector<1x32xf32>
    %118 = arith.addf %117, %116 : vector<1x32xf32>
    %119 = arith.divf %117, %118 : vector<1x32xf32>
    %120 = arith.mulf %111, %95 : vector<1x32xf32>
    %121 = arith.mulf %105, %113 : vector<1x32xf32>
    %122 = arith.addf %120, %121 : vector<1x32xf32>
    %123 = math.tanh %122 : vector<1x32xf32>
    %124 = arith.mulf %119, %123 : vector<1x32xf32>
    %125 = vector.extract_strided_slice %91 {offsets = [1, 0], sizes = [1, 128], strides = [1, 1]} : vector<8x128xf32> to vector<1x128xf32>
    %cst_65 = arith.constant dense<0.000000e+00> : vector<1x128xf32>
    %126 = tpu.matmul %124, %92, %cst_65 {dimension_numbers = #tpu.dot_dimension_numbers<[1], [0], [0], [1], [0, 0, 1, 1], [], []>} : vector<1x32xf32>, vector<32x128xf32>, vector<1x128xf32> -> vector<1x128xf32>
    %127 = arith.addf %125, %126 : vector<1x128xf32>
    %128 = arith.addf %127, %93 : vector<1x128xf32>
    %129 = vector.extract_strided_slice %128 {offsets = [0, 0], sizes = [1, 32], strides = [1, 1]} : vector<1x128xf32> to vector<1x32xf32>
    %130 = arith.negf %129 : vector<1x32xf32>
    %131 = math.exp %130 : vector<1x32xf32>
    %cst_66 = arith.constant 1.000000e+00 : f32
    %132 = vector.broadcast %cst_66 : f32 to vector<1x32xf32>
    %133 = arith.addf %132, %131 : vector<1x32xf32>
    %134 = arith.divf %132, %133 : vector<1x32xf32>
    %135 = vector.extract_strided_slice %128 {offsets = [0, 32], sizes = [1, 32], strides = [1, 1]} : vector<1x128xf32> to vector<1x32xf32>
    %136 = arith.negf %135 : vector<1x32xf32>
    %137 = math.exp %136 : vector<1x32xf32>
    %cst_67 = arith.constant 1.000000e+00 : f32
    %138 = vector.broadcast %cst_67 : f32 to vector<1x32xf32>
    %139 = arith.addf %138, %137 : vector<1x32xf32>
    %140 = arith.divf %138, %139 : vector<1x32xf32>
    %141 = vector.extract_strided_slice %128 {offsets = [0, 64], sizes = [1, 32], strides = [1, 1]} : vector<1x128xf32> to vector<1x32xf32>
    %142 = math.tanh %141 : vector<1x32xf32>
    %143 = vector.extract_strided_slice %128 {offsets = [0, 96], sizes = [1, 32], strides = [1, 1]} : vector<1x128xf32> to vector<1x32xf32>
    %144 = arith.negf %143 : vector<1x32xf32>
    %145 = math.exp %144 : vector<1x32xf32>
    %cst_68 = arith.constant 1.000000e+00 : f32
    %146 = vector.broadcast %cst_68 : f32 to vector<1x32xf32>
    %147 = arith.addf %146, %145 : vector<1x32xf32>
    %148 = arith.divf %146, %147 : vector<1x32xf32>
    %149 = arith.mulf %140, %122 : vector<1x32xf32>
    %150 = arith.mulf %134, %142 : vector<1x32xf32>
    %151 = arith.addf %149, %150 : vector<1x32xf32>
    %152 = math.tanh %151 : vector<1x32xf32>
    %153 = arith.mulf %148, %152 : vector<1x32xf32>
    %154 = vector.extract_strided_slice %91 {offsets = [2, 0], sizes = [1, 128], strides = [1, 1]} : vector<8x128xf32> to vector<1x128xf32>
    %cst_69 = arith.constant dense<0.000000e+00> : vector<1x128xf32>
    %155 = tpu.matmul %153, %92, %cst_69 {dimension_numbers = #tpu.dot_dimension_numbers<[1], [0], [0], [1], [0, 0, 1, 1], [], []>} : vector<1x32xf32>, vector<32x128xf32>, vector<1x128xf32> -> vector<1x128xf32>
    %156 = arith.addf %154, %155 : vector<1x128xf32>
    %157 = arith.addf %156, %93 : vector<1x128xf32>
    %158 = vector.extract_strided_slice %157 {offsets = [0, 0], sizes = [1, 32], strides = [1, 1]} : vector<1x128xf32> to vector<1x32xf32>
    %159 = arith.negf %158 : vector<1x32xf32>
    %160 = math.exp %159 : vector<1x32xf32>
    %cst_70 = arith.constant 1.000000e+00 : f32
    %161 = vector.broadcast %cst_70 : f32 to vector<1x32xf32>
    %162 = arith.addf %161, %160 : vector<1x32xf32>
    %163 = arith.divf %161, %162 : vector<1x32xf32>
    %164 = vector.extract_strided_slice %157 {offsets = [0, 32], sizes = [1, 32], strides = [1, 1]} : vector<1x128xf32> to vector<1x32xf32>
    %165 = arith.negf %164 : vector<1x32xf32>
    %166 = math.exp %165 : vector<1x32xf32>
    %cst_71 = arith.constant 1.000000e+00 : f32
    %167 = vector.broadcast %cst_71 : f32 to vector<1x32xf32>
    %168 = arith.addf %167, %166 : vector<1x32xf32>
    %169 = arith.divf %167, %168 : vector<1x32xf32>
    %170 = vector.extract_strided_slice %157 {offsets = [0, 64], sizes = [1, 32], strides = [1, 1]} : vector<1x128xf32> to vector<1x32xf32>
    %171 = math.tanh %170 : vector<1x32xf32>
    %172 = vector.extract_strided_slice %157 {offsets = [0, 96], sizes = [1, 32], strides = [1, 1]} : vector<1x128xf32> to vector<1x32xf32>
    %173 = arith.negf %172 : vector<1x32xf32>
    %174 = math.exp %173 : vector<1x32xf32>
    %cst_72 = arith.constant 1.000000e+00 : f32
    %175 = vector.broadcast %cst_72 : f32 to vector<1x32xf32>
    %176 = arith.addf %175, %174 : vector<1x32xf32>
    %177 = arith.divf %175, %176 : vector<1x32xf32>
    %178 = arith.mulf %169, %151 : vector<1x32xf32>
    %179 = arith.mulf %163, %171 : vector<1x32xf32>
    %180 = arith.addf %178, %179 : vector<1x32xf32>
    %181 = math.tanh %180 : vector<1x32xf32>
    %182 = arith.mulf %177, %181 : vector<1x32xf32>
    %183 = vector.extract_strided_slice %91 {offsets = [3, 0], sizes = [1, 128], strides = [1, 1]} : vector<8x128xf32> to vector<1x128xf32>
    %cst_73 = arith.constant dense<0.000000e+00> : vector<1x128xf32>
    %184 = tpu.matmul %182, %92, %cst_73 {dimension_numbers = #tpu.dot_dimension_numbers<[1], [0], [0], [1], [0, 0, 1, 1], [], []>} : vector<1x32xf32>, vector<32x128xf32>, vector<1x128xf32> -> vector<1x128xf32>
    %185 = arith.addf %183, %184 : vector<1x128xf32>
    %186 = arith.addf %185, %93 : vector<1x128xf32>
    %187 = vector.extract_strided_slice %186 {offsets = [0, 0], sizes = [1, 32], strides = [1, 1]} : vector<1x128xf32> to vector<1x32xf32>
    %188 = arith.negf %187 : vector<1x32xf32>
    %189 = math.exp %188 : vector<1x32xf32>
    %cst_74 = arith.constant 1.000000e+00 : f32
    %190 = vector.broadcast %cst_74 : f32 to vector<1x32xf32>
    %191 = arith.addf %190, %189 : vector<1x32xf32>
    %192 = arith.divf %190, %191 : vector<1x32xf32>
    %193 = vector.extract_strided_slice %186 {offsets = [0, 32], sizes = [1, 32], strides = [1, 1]} : vector<1x128xf32> to vector<1x32xf32>
    %194 = arith.negf %193 : vector<1x32xf32>
    %195 = math.exp %194 : vector<1x32xf32>
    %cst_75 = arith.constant 1.000000e+00 : f32
    %196 = vector.broadcast %cst_75 : f32 to vector<1x32xf32>
    %197 = arith.addf %196, %195 : vector<1x32xf32>
    %198 = arith.divf %196, %197 : vector<1x32xf32>
    %199 = vector.extract_strided_slice %186 {offsets = [0, 64], sizes = [1, 32], strides = [1, 1]} : vector<1x128xf32> to vector<1x32xf32>
    %200 = math.tanh %199 : vector<1x32xf32>
    %201 = vector.extract_strided_slice %186 {offsets = [0, 96], sizes = [1, 32], strides = [1, 1]} : vector<1x128xf32> to vector<1x32xf32>
    %202 = arith.negf %201 : vector<1x32xf32>
    %203 = math.exp %202 : vector<1x32xf32>
    %cst_76 = arith.constant 1.000000e+00 : f32
    %204 = vector.broadcast %cst_76 : f32 to vector<1x32xf32>
    %205 = arith.addf %204, %203 : vector<1x32xf32>
    %206 = arith.divf %204, %205 : vector<1x32xf32>
    %207 = arith.mulf %198, %180 : vector<1x32xf32>
    %208 = arith.mulf %192, %200 : vector<1x32xf32>
    %209 = arith.addf %207, %208 : vector<1x32xf32>
    %210 = math.tanh %209 : vector<1x32xf32>
    %211 = arith.mulf %206, %210 : vector<1x32xf32>
    %212 = vector.extract_strided_slice %91 {offsets = [4, 0], sizes = [1, 128], strides = [1, 1]} : vector<8x128xf32> to vector<1x128xf32>
    %cst_77 = arith.constant dense<0.000000e+00> : vector<1x128xf32>
    %213 = tpu.matmul %211, %92, %cst_77 {dimension_numbers = #tpu.dot_dimension_numbers<[1], [0], [0], [1], [0, 0, 1, 1], [], []>} : vector<1x32xf32>, vector<32x128xf32>, vector<1x128xf32> -> vector<1x128xf32>
    %214 = arith.addf %212, %213 : vector<1x128xf32>
    %215 = arith.addf %214, %93 : vector<1x128xf32>
    %216 = vector.extract_strided_slice %215 {offsets = [0, 0], sizes = [1, 32], strides = [1, 1]} : vector<1x128xf32> to vector<1x32xf32>
    %217 = arith.negf %216 : vector<1x32xf32>
    %218 = math.exp %217 : vector<1x32xf32>
    %cst_78 = arith.constant 1.000000e+00 : f32
    %219 = vector.broadcast %cst_78 : f32 to vector<1x32xf32>
    %220 = arith.addf %219, %218 : vector<1x32xf32>
    %221 = arith.divf %219, %220 : vector<1x32xf32>
    %222 = vector.extract_strided_slice %215 {offsets = [0, 32], sizes = [1, 32], strides = [1, 1]} : vector<1x128xf32> to vector<1x32xf32>
    %223 = arith.negf %222 : vector<1x32xf32>
    %224 = math.exp %223 : vector<1x32xf32>
    %cst_79 = arith.constant 1.000000e+00 : f32
    %225 = vector.broadcast %cst_79 : f32 to vector<1x32xf32>
    %226 = arith.addf %225, %224 : vector<1x32xf32>
    %227 = arith.divf %225, %226 : vector<1x32xf32>
    %228 = vector.extract_strided_slice %215 {offsets = [0, 64], sizes = [1, 32], strides = [1, 1]} : vector<1x128xf32> to vector<1x32xf32>
    %229 = math.tanh %228 : vector<1x32xf32>
    %230 = vector.extract_strided_slice %215 {offsets = [0, 96], sizes = [1, 32], strides = [1, 1]} : vector<1x128xf32> to vector<1x32xf32>
    %231 = arith.negf %230 : vector<1x32xf32>
    %232 = math.exp %231 : vector<1x32xf32>
    %cst_80 = arith.constant 1.000000e+00 : f32
    %233 = vector.broadcast %cst_80 : f32 to vector<1x32xf32>
    %234 = arith.addf %233, %232 : vector<1x32xf32>
    %235 = arith.divf %233, %234 : vector<1x32xf32>
    %236 = arith.mulf %227, %209 : vector<1x32xf32>
    %237 = arith.mulf %221, %229 : vector<1x32xf32>
    %238 = arith.addf %236, %237 : vector<1x32xf32>
    %239 = math.tanh %238 : vector<1x32xf32>
    %240 = arith.mulf %235, %239 : vector<1x32xf32>
    %241 = vector.extract_strided_slice %91 {offsets = [5, 0], sizes = [1, 128], strides = [1, 1]} : vector<8x128xf32> to vector<1x128xf32>
    %cst_81 = arith.constant dense<0.000000e+00> : vector<1x128xf32>
    %242 = tpu.matmul %240, %92, %cst_81 {dimension_numbers = #tpu.dot_dimension_numbers<[1], [0], [0], [1], [0, 0, 1, 1], [], []>} : vector<1x32xf32>, vector<32x128xf32>, vector<1x128xf32> -> vector<1x128xf32>
    %243 = arith.addf %241, %242 : vector<1x128xf32>
    %244 = arith.addf %243, %93 : vector<1x128xf32>
    %245 = vector.extract_strided_slice %244 {offsets = [0, 0], sizes = [1, 32], strides = [1, 1]} : vector<1x128xf32> to vector<1x32xf32>
    %246 = arith.negf %245 : vector<1x32xf32>
    %247 = math.exp %246 : vector<1x32xf32>
    %cst_82 = arith.constant 1.000000e+00 : f32
    %248 = vector.broadcast %cst_82 : f32 to vector<1x32xf32>
    %249 = arith.addf %248, %247 : vector<1x32xf32>
    %250 = arith.divf %248, %249 : vector<1x32xf32>
    %251 = vector.extract_strided_slice %244 {offsets = [0, 32], sizes = [1, 32], strides = [1, 1]} : vector<1x128xf32> to vector<1x32xf32>
    %252 = arith.negf %251 : vector<1x32xf32>
    %253 = math.exp %252 : vector<1x32xf32>
    %cst_83 = arith.constant 1.000000e+00 : f32
    %254 = vector.broadcast %cst_83 : f32 to vector<1x32xf32>
    %255 = arith.addf %254, %253 : vector<1x32xf32>
    %256 = arith.divf %254, %255 : vector<1x32xf32>
    %257 = vector.extract_strided_slice %244 {offsets = [0, 64], sizes = [1, 32], strides = [1, 1]} : vector<1x128xf32> to vector<1x32xf32>
    %258 = math.tanh %257 : vector<1x32xf32>
    %259 = vector.extract_strided_slice %244 {offsets = [0, 96], sizes = [1, 32], strides = [1, 1]} : vector<1x128xf32> to vector<1x32xf32>
    %260 = arith.negf %259 : vector<1x32xf32>
    %261 = math.exp %260 : vector<1x32xf32>
    %cst_84 = arith.constant 1.000000e+00 : f32
    %262 = vector.broadcast %cst_84 : f32 to vector<1x32xf32>
    %263 = arith.addf %262, %261 : vector<1x32xf32>
    %264 = arith.divf %262, %263 : vector<1x32xf32>
    %265 = arith.mulf %256, %238 : vector<1x32xf32>
    %266 = arith.mulf %250, %258 : vector<1x32xf32>
    %267 = arith.addf %265, %266 : vector<1x32xf32>
    %268 = math.tanh %267 : vector<1x32xf32>
    %269 = arith.mulf %264, %268 : vector<1x32xf32>
    %270 = vector.extract_strided_slice %91 {offsets = [6, 0], sizes = [1, 128], strides = [1, 1]} : vector<8x128xf32> to vector<1x128xf32>
    %cst_85 = arith.constant dense<0.000000e+00> : vector<1x128xf32>
    %271 = tpu.matmul %269, %92, %cst_85 {dimension_numbers = #tpu.dot_dimension_numbers<[1], [0], [0], [1], [0, 0, 1, 1], [], []>} : vector<1x32xf32>, vector<32x128xf32>, vector<1x128xf32> -> vector<1x128xf32>
    %272 = arith.addf %270, %271 : vector<1x128xf32>
    %273 = arith.addf %272, %93 : vector<1x128xf32>
    %274 = vector.extract_strided_slice %273 {offsets = [0, 0], sizes = [1, 32], strides = [1, 1]} : vector<1x128xf32> to vector<1x32xf32>
    %275 = arith.negf %274 : vector<1x32xf32>
    %276 = math.exp %275 : vector<1x32xf32>
    %cst_86 = arith.constant 1.000000e+00 : f32
    %277 = vector.broadcast %cst_86 : f32 to vector<1x32xf32>
    %278 = arith.addf %277, %276 : vector<1x32xf32>
    %279 = arith.divf %277, %278 : vector<1x32xf32>
    %280 = vector.extract_strided_slice %273 {offsets = [0, 32], sizes = [1, 32], strides = [1, 1]} : vector<1x128xf32> to vector<1x32xf32>
    %281 = arith.negf %280 : vector<1x32xf32>
    %282 = math.exp %281 : vector<1x32xf32>
    %cst_87 = arith.constant 1.000000e+00 : f32
    %283 = vector.broadcast %cst_87 : f32 to vector<1x32xf32>
    %284 = arith.addf %283, %282 : vector<1x32xf32>
    %285 = arith.divf %283, %284 : vector<1x32xf32>
    %286 = vector.extract_strided_slice %273 {offsets = [0, 64], sizes = [1, 32], strides = [1, 1]} : vector<1x128xf32> to vector<1x32xf32>
    %287 = math.tanh %286 : vector<1x32xf32>
    %288 = vector.extract_strided_slice %273 {offsets = [0, 96], sizes = [1, 32], strides = [1, 1]} : vector<1x128xf32> to vector<1x32xf32>
    %289 = arith.negf %288 : vector<1x32xf32>
    %290 = math.exp %289 : vector<1x32xf32>
    %cst_88 = arith.constant 1.000000e+00 : f32
    %291 = vector.broadcast %cst_88 : f32 to vector<1x32xf32>
    %292 = arith.addf %291, %290 : vector<1x32xf32>
    %293 = arith.divf %291, %292 : vector<1x32xf32>
    %294 = arith.mulf %285, %267 : vector<1x32xf32>
    %295 = arith.mulf %279, %287 : vector<1x32xf32>
    %296 = arith.addf %294, %295 : vector<1x32xf32>
    %297 = math.tanh %296 : vector<1x32xf32>
    %298 = arith.mulf %293, %297 : vector<1x32xf32>
    %299 = vector.extract_strided_slice %91 {offsets = [7, 0], sizes = [1, 128], strides = [1, 1]} : vector<8x128xf32> to vector<1x128xf32>
    %cst_89 = arith.constant dense<0.000000e+00> : vector<1x128xf32>
    %300 = tpu.matmul %298, %92, %cst_89 {dimension_numbers = #tpu.dot_dimension_numbers<[1], [0], [0], [1], [0, 0, 1, 1], [], []>} : vector<1x32xf32>, vector<32x128xf32>, vector<1x128xf32> -> vector<1x128xf32>
    %301 = arith.addf %299, %300 : vector<1x128xf32>
    %302 = arith.addf %301, %93 : vector<1x128xf32>
    %303 = vector.extract_strided_slice %302 {offsets = [0, 0], sizes = [1, 32], strides = [1, 1]} : vector<1x128xf32> to vector<1x32xf32>
    %304 = arith.negf %303 : vector<1x32xf32>
    %305 = math.exp %304 : vector<1x32xf32>
    %cst_90 = arith.constant 1.000000e+00 : f32
    %306 = vector.broadcast %cst_90 : f32 to vector<1x32xf32>
    %307 = arith.addf %306, %305 : vector<1x32xf32>
    %308 = arith.divf %306, %307 : vector<1x32xf32>
    %309 = vector.extract_strided_slice %302 {offsets = [0, 32], sizes = [1, 32], strides = [1, 1]} : vector<1x128xf32> to vector<1x32xf32>
    %310 = arith.negf %309 : vector<1x32xf32>
    %311 = math.exp %310 : vector<1x32xf32>
    %cst_91 = arith.constant 1.000000e+00 : f32
    %312 = vector.broadcast %cst_91 : f32 to vector<1x32xf32>
    %313 = arith.addf %312, %311 : vector<1x32xf32>
    %314 = arith.divf %312, %313 : vector<1x32xf32>
    %315 = vector.extract_strided_slice %302 {offsets = [0, 64], sizes = [1, 32], strides = [1, 1]} : vector<1x128xf32> to vector<1x32xf32>
    %316 = math.tanh %315 : vector<1x32xf32>
    %317 = vector.extract_strided_slice %302 {offsets = [0, 96], sizes = [1, 32], strides = [1, 1]} : vector<1x128xf32> to vector<1x32xf32>
    %318 = arith.negf %317 : vector<1x32xf32>
    %319 = math.exp %318 : vector<1x32xf32>
    %cst_92 = arith.constant 1.000000e+00 : f32
    %320 = vector.broadcast %cst_92 : f32 to vector<1x32xf32>
    %321 = arith.addf %320, %319 : vector<1x32xf32>
    %322 = arith.divf %320, %321 : vector<1x32xf32>
    %323 = arith.mulf %314, %296 : vector<1x32xf32>
    %324 = arith.mulf %308, %316 : vector<1x32xf32>
    %325 = arith.addf %323, %324 : vector<1x32xf32>
    %326 = math.tanh %325 : vector<1x32xf32>
    %327 = arith.mulf %322, %326 : vector<1x32xf32>
    %328 = tpu.concatenate %124, %153, %182, %211, %240, %269, %298, %327 in 0 : vector<1x32xf32>, vector<1x32xf32>, vector<1x32xf32>, vector<1x32xf32>, vector<1x32xf32>, vector<1x32xf32>, vector<1x32xf32>, vector<1x32xf32> -> vector<8x32xf32>
    %c0_93 = arith.constant 0 : index
    %c0_94 = arith.constant 0 : index
    %329 = vector.load %arg18[%c0_93, %c0_94] : memref<32x16xf32, #tpu.memory_space<vmem>>, vector<32x16xf32>
    %cst_95 = arith.constant dense<0.000000e+00> : vector<8x16xf32>
    %330 = tpu.matmul %328, %329, %cst_95 {dimension_numbers = #tpu.dot_dimension_numbers<[1], [0], [0], [1], [0, 0, 1, 1], [], []>} : vector<8x32xf32>, vector<32x16xf32>, vector<8x16xf32> -> vector<8x16xf32>
    %c0_96 = arith.constant 0 : index
    %c0_97 = arith.constant 0 : index
    %331 = vector.load %arg19[%c0_96, %c0_97] : memref<1x16xf32, #tpu.memory_space<vmem>>, vector<1x16xf32>
    %332 = vector.broadcast %331 : vector<1x16xf32> to vector<8x16xf32>
    %333 = arith.addf %330, %332 : vector<8x16xf32>
    %334 = arith.negf %333 : vector<8x16xf32>
    %335 = math.exp %334 : vector<8x16xf32>
    %cst_98 = arith.constant 1.000000e+00 : f32
    %336 = vector.broadcast %cst_98 : f32 to vector<8x16xf32>
    %337 = arith.addf %336, %335 : vector<8x16xf32>
    %338 = arith.divf %336, %337 : vector<8x16xf32>
    %cst_99 = arith.constant dense<0.000000e+00> : vector<8xf32>
    %339 = vector.multi_reduction <add>, %338, %cst_99 [1] : vector<8x16xf32> to vector<8xf32>
    %340 = vector.shape_cast %339 : vector<8xf32> to vector<8x1xf32>
    %cst_100 = arith.constant 5.000000e-01 : f32
    %341 = vector.broadcast %cst_100 : f32 to vector<8x1xf32>
    %342 = arith.addf %340, %341 : vector<8x1xf32>
    %343 = math.floor %342 : vector<8x1xf32>
    %cst_101 = arith.constant 1.000000e+00 : f32
    %344 = vector.broadcast %cst_101 : f32 to vector<8x1xf32>
    %345 = arith.maximumf %343, %344 : vector<8x1xf32>
    %346 = tpu.iota {dimensions = array<i32: 0>} : vector<8x1xi32>
    %c7_i32 = arith.constant 7 : i32
    %347 = vector.broadcast %c7_i32 : i32 to vector<8x1xi32>
    %348 = arith.cmpi eq, %346, %347 : vector<8x1xi32>
    %cst_102 = arith.constant 5.000000e+00 : f32
    %cst_103 = arith.constant 0.000000e+00 : f32
    %349 = vector.broadcast %cst_102 : f32 to vector<8x1xf32>
    %350 = vector.broadcast %cst_103 : f32 to vector<8x1xf32>
    %351 = arith.select %348, %349, %350 : vector<8x1xi1>, vector<8x1xf32>
    %352 = arith.addf %345, %351 : vector<8x1xf32>
    %353 = tpu.iota {dimensions = array<i32: 0>} : vector<8x8xi32>
    %354 = tpu.iota {dimensions = array<i32: 1>} : vector<8x8xi32>
    %355 = arith.cmpi sle, %354, %353 : vector<8x8xi32>
    %356 = arith.extui %355 : vector<8x8xi1> to vector<8x8xi32>
    %357 = arith.sitofp %356 : vector<8x8xi32> to vector<8x8xf32>
    %cst_104 = arith.constant dense<0.000000e+00> : vector<8x1xf32>
    %358 = tpu.matmul %357, %352, %cst_104 {dimension_numbers = #tpu.dot_dimension_numbers<[1], [0], [0], [1], [0, 0, 1, 1], [], []>} : vector<8x8xf32>, vector<8x1xf32>, vector<8x1xf32> -> vector<8x1xf32>
    %359 = arith.subf %358, %352 : vector<8x1xf32>
    %360 = tpu.iota {dimensions = array<i32: 1>} : vector<8x144xi32>
    %361 = arith.sitofp %360 : vector<8x144xi32> to vector<8x144xf32>
    %362 = vector.broadcast %359 : vector<8x1xf32> to vector<8x144xf32>
    %363 = arith.cmpf oge, %361, %362 : vector<8x144xf32>
    %364 = vector.broadcast %358 : vector<8x1xf32> to vector<8x144xf32>
    %365 = arith.cmpf olt, %361, %364 : vector<8x144xf32>
    %366 = arith.andi %363, %365 : vector<8x144xi1>
    %367 = arith.extui %366 : vector<8x144xi1> to vector<8x144xi32>
    %368 = arith.sitofp %367 : vector<8x144xi32> to vector<8x144xf32>
    %369 = vector.extract_strided_slice %358 {offsets = [7, 0], sizes = [1, 1], strides = [1, 1]} : vector<8x1xf32> to vector<1x1xf32>
    %370 = tpu.iota {dimensions = array<i32: 1>} : vector<1x144xi32>
    %371 = arith.sitofp %370 : vector<1x144xi32> to vector<1x144xf32>
    %372 = vector.broadcast %369 : vector<1x1xf32> to vector<1x144xf32>
    %373 = arith.cmpf olt, %371, %372 : vector<1x144xf32>
    %374 = arith.extui %373 : vector<1x144xi1> to vector<1x144xi32>
    %375 = arith.sitofp %374 : vector<1x144xi32> to vector<1x144xf32>
    %cst_105 = arith.constant dense<0.000000e+00> : vector<32x144xf32>
    %376 = tpu.matmul %86, %368, %cst_105 {dimension_numbers = #tpu.dot_dimension_numbers<[0], [0], [1], [1], [0, 1, 1, 1], [], []>} : vector<8x32xf32>, vector<8x144xf32>, vector<32x144xf32> -> vector<32x144xf32>
    %cst_106 = arith.constant dense<0.000000e+00> : vector<32x144xf32>
    %377 = tpu.matmul %14, %368, %cst_106 {dimension_numbers = #tpu.dot_dimension_numbers<[0], [0], [1], [1], [0, 1, 1, 1], [], []>} : vector<8x32xf32>, vector<8x144xf32>, vector<32x144xf32> -> vector<32x144xf32>
    %c0_107 = arith.constant 0 : index
    %c0_108 = arith.constant 0 : index
    %378 = vector.load %arg20[%c0_107, %c0_108] : memref<128x128xf32, #tpu.memory_space<vmem>>, vector<128x128xf32>
    %cst_109 = arith.constant dense<0.000000e+00> : vector<128x1xf32>
    %379 = tpu.matmul %378, %76, %cst_109 {dimension_numbers = #tpu.dot_dimension_numbers<[0], [1], [1], [0], [0, 1, 1, 0], [], []>} : vector<128x128xf32>, vector<1x128xf32>, vector<128x1xf32> -> vector<128x1xf32>
    %c0_110 = arith.constant 0 : index
    %c0_111 = arith.constant 0 : index
    %380 = vector.load %arg21[%c0_110, %c0_111] : memref<128x1xf32, #tpu.memory_space<vmem>>, vector<128x1xf32>
    %381 = arith.addf %379, %380 : vector<128x1xf32>
    %382 = vector.extract_strided_slice %381 {offsets = [0, 0], sizes = [32, 1], strides = [1, 1]} : vector<128x1xf32> to vector<32x1xf32>
    %383 = vector.extract_strided_slice %381 {offsets = [32, 0], sizes = [32, 1], strides = [1, 1]} : vector<128x1xf32> to vector<32x1xf32>
    %384 = vector.extract_strided_slice %381 {offsets = [64, 0], sizes = [32, 1], strides = [1, 1]} : vector<128x1xf32> to vector<32x1xf32>
    %385 = vector.extract_strided_slice %381 {offsets = [96, 0], sizes = [32, 1], strides = [1, 1]} : vector<128x1xf32> to vector<32x1xf32>
    %c0_112 = arith.constant 0 : index
    %c0_113 = arith.constant 0 : index
    %386 = vector.load %arg24[%c0_112, %c0_113] : memref<32x1xf32, #tpu.memory_space<vmem>>, vector<32x1xf32>
    %cst_114 = arith.constant 1.000000e+00 : f32
    %387 = vector.broadcast %cst_114 : f32 to vector<32x1xf32>
    %388 = arith.addf %387, %382 : vector<32x1xf32>
    %389 = vector.broadcast %388 : vector<32x1xf32> to vector<32x144xf32>
    %390 = arith.mulf %376, %389 : vector<32x144xf32>
    %391 = vector.broadcast %383 : vector<32x1xf32> to vector<32x144xf32>
    %392 = arith.addf %390, %391 : vector<32x144xf32>
    %cst_115 = arith.constant dense<0.000000e+00> : vector<1x144xf32>
    %393 = tpu.matmul %386, %392, %cst_115 {dimension_numbers = #tpu.dot_dimension_numbers<[0], [0], [1], [1], [0, 1, 1, 1], [], []>} : vector<32x1xf32>, vector<32x144xf32>, vector<1x144xf32> -> vector<1x144xf32>
    %c0_116 = arith.constant 0 : index
    %c0_117 = arith.constant 0 : index
    %394 = vector.load %arg25[%c0_116, %c0_117] : memref<1x1xf32, #tpu.memory_space<vmem>>, vector<1x1xf32>
    %395 = vector.broadcast %394 : vector<1x1xf32> to vector<1x144xf32>
    %396 = arith.addf %393, %395 : vector<1x144xf32>
    %c0_118 = arith.constant 0 : index
    %c0_119 = arith.constant 0 : index
    %397 = vector.load %arg26[%c0_118, %c0_119] : memref<32x1xf32, #tpu.memory_space<vmem>>, vector<32x1xf32>
    %cst_120 = arith.constant 1.000000e+00 : f32
    %398 = vector.broadcast %cst_120 : f32 to vector<32x1xf32>
    %399 = arith.addf %398, %384 : vector<32x1xf32>
    %400 = vector.broadcast %399 : vector<32x1xf32> to vector<32x144xf32>
    %401 = arith.mulf %376, %400 : vector<32x144xf32>
    %402 = vector.broadcast %385 : vector<32x1xf32> to vector<32x144xf32>
    %403 = arith.addf %401, %402 : vector<32x144xf32>
    %cst_121 = arith.constant dense<0.000000e+00> : vector<1x144xf32>
    %404 = tpu.matmul %397, %403, %cst_121 {dimension_numbers = #tpu.dot_dimension_numbers<[0], [0], [1], [1], [0, 1, 1, 1], [], []>} : vector<32x1xf32>, vector<32x144xf32>, vector<1x144xf32> -> vector<1x144xf32>
    %c0_122 = arith.constant 0 : index
    %c0_123 = arith.constant 0 : index
    %405 = vector.load %arg27[%c0_122, %c0_123] : memref<1x1xf32, #tpu.memory_space<vmem>>, vector<1x1xf32>
    %406 = vector.broadcast %405 : vector<1x1xf32> to vector<1x144xf32>
    %407 = arith.addf %404, %406 : vector<1x144xf32>
    %c0_124 = arith.constant 0 : index
    %c0_125 = arith.constant 0 : index
    %408 = vector.load %arg22[%c0_124, %c0_125] : memref<128x68xf32, #tpu.memory_space<vmem>>, vector<128x68xf32>
    %cst_126 = arith.constant dense<0.000000e+00> : vector<68x1xf32>
    %409 = tpu.matmul %408, %75, %cst_126 {dimension_numbers = #tpu.dot_dimension_numbers<[0], [1], [1], [0], [0, 1, 1, 0], [], []>} : vector<128x68xf32>, vector<1x128xf32>, vector<68x1xf32> -> vector<68x1xf32>
    %c0_127 = arith.constant 0 : index
    %c0_128 = arith.constant 0 : index
    %410 = vector.load %arg23[%c0_127, %c0_128] : memref<68x1xf32, #tpu.memory_space<vmem>>, vector<68x1xf32>
    %411 = arith.addf %409, %410 : vector<68x1xf32>
    %412 = vector.extract_strided_slice %411 {offsets = [0, 0], sizes = [34, 1], strides = [1, 1]} : vector<68x1xf32> to vector<34x1xf32>
    %413 = vector.extract_strided_slice %411 {offsets = [34, 0], sizes = [34, 1], strides = [1, 1]} : vector<68x1xf32> to vector<34x1xf32>
    %414 = vector.extract_strided_slice %412 {offsets = [0, 0], sizes = [32, 1], strides = [1, 1]} : vector<34x1xf32> to vector<32x1xf32>
    %cst_129 = arith.constant 1.000000e+00 : f32
    %415 = vector.broadcast %cst_129 : f32 to vector<32x1xf32>
    %416 = arith.addf %415, %414 : vector<32x1xf32>
    %417 = vector.broadcast %416 : vector<32x1xf32> to vector<32x144xf32>
    %418 = arith.mulf %377, %417 : vector<32x144xf32>
    %419 = vector.extract_strided_slice %413 {offsets = [0, 0], sizes = [32, 1], strides = [1, 1]} : vector<34x1xf32> to vector<32x1xf32>
    %420 = vector.broadcast %419 : vector<32x1xf32> to vector<32x144xf32>
    %421 = arith.addf %418, %420 : vector<32x144xf32>
    %422 = vector.extract_strided_slice %412 {offsets = [32, 0], sizes = [1, 1], strides = [1, 1]} : vector<34x1xf32> to vector<1x1xf32>
    %cst_130 = arith.constant 1.000000e+00 : f32
    %423 = vector.broadcast %cst_130 : f32 to vector<1x1xf32>
    %424 = arith.addf %423, %422 : vector<1x1xf32>
    %425 = vector.broadcast %424 : vector<1x1xf32> to vector<1x144xf32>
    %426 = arith.mulf %396, %425 : vector<1x144xf32>
    %427 = vector.extract_strided_slice %413 {offsets = [32, 0], sizes = [1, 1], strides = [1, 1]} : vector<34x1xf32> to vector<1x1xf32>
    %428 = vector.broadcast %427 : vector<1x1xf32> to vector<1x144xf32>
    %429 = arith.addf %426, %428 : vector<1x144xf32>
    %430 = vector.extract_strided_slice %412 {offsets = [33, 0], sizes = [1, 1], strides = [1, 1]} : vector<34x1xf32> to vector<1x1xf32>
    %cst_131 = arith.constant 1.000000e+00 : f32
    %431 = vector.broadcast %cst_131 : f32 to vector<1x1xf32>
    %432 = arith.addf %431, %430 : vector<1x1xf32>
    %433 = vector.broadcast %432 : vector<1x1xf32> to vector<1x144xf32>
    %434 = arith.mulf %407, %433 : vector<1x144xf32>
    %435 = vector.extract_strided_slice %413 {offsets = [33, 0], sizes = [1, 1], strides = [1, 1]} : vector<34x1xf32> to vector<1x1xf32>
    %436 = vector.broadcast %435 : vector<1x1xf32> to vector<1x144xf32>
    %437 = arith.addf %434, %436 : vector<1x144xf32>
    %c0_132 = arith.constant 0 : index
    %c0_133 = arith.constant 0 : index
    %438 = vector.load %arg28[%c0_132, %c0_133] : memref<34x8xf32, #tpu.memory_space<vmem>>, vector<32x8xf32>
    %cst_134 = arith.constant dense<0.000000e+00> : vector<8x144xf32>
    %439 = tpu.matmul %438, %421, %cst_134 {dimension_numbers = #tpu.dot_dimension_numbers<[0], [0], [1], [1], [0, 1, 1, 1], [], []>} : vector<32x8xf32>, vector<32x144xf32>, vector<8x144xf32> -> vector<8x144xf32>
    %c32_135 = arith.constant 32 : index
    %c0_136 = arith.constant 0 : index
    %440 = vector.load %arg28[%c32_135, %c0_136] : memref<34x8xf32, #tpu.memory_space<vmem>>, vector<1x8xf32>
    %cst_137 = arith.constant dense<0.000000e+00> : vector<8x144xf32>
    %441 = tpu.matmul %440, %429, %cst_137 {dimension_numbers = #tpu.dot_dimension_numbers<[0], [0], [1], [1], [0, 1, 1, 1], [], []>} : vector<1x8xf32>, vector<1x144xf32>, vector<8x144xf32> -> vector<8x144xf32>
    %442 = arith.addf %439, %441 : vector<8x144xf32>
    %c33 = arith.constant 33 : index
    %c0_138 = arith.constant 0 : index
    %443 = vector.load %arg28[%c33, %c0_138] : memref<34x8xf32, #tpu.memory_space<vmem>>, vector<1x8xf32>
    %cst_139 = arith.constant dense<0.000000e+00> : vector<8x144xf32>
    %444 = tpu.matmul %443, %437, %cst_139 {dimension_numbers = #tpu.dot_dimension_numbers<[0], [0], [1], [1], [0, 1, 1, 1], [], []>} : vector<1x8xf32>, vector<1x144xf32>, vector<8x144xf32> -> vector<8x144xf32>
    %445 = arith.addf %442, %444 : vector<8x144xf32>
    %c0_140 = arith.constant 0 : index
    %c0_141 = arith.constant 0 : index
    %446 = vector.load %arg29[%c0_140, %c0_141] : memref<8x1xf32, #tpu.memory_space<vmem>>, vector<8x1xf32>
    %447 = vector.broadcast %446 : vector<8x1xf32> to vector<8x144xf32>
    %448 = arith.addf %445, %447 : vector<8x144xf32>
    %449 = math.tanh %448 : vector<8x144xf32>
    %450 = vector.broadcast %375 : vector<1x144xf32> to vector<8x144xf32>
    %451 = arith.mulf %449, %450 : vector<8x144xf32>
    %c0_142 = arith.constant 0 : index
    %c0_143 = arith.constant 0 : index
    %452 = vector.load %arg30[%c0_142, %c0_143] : memref<8x144xf32, #tpu.memory_space<vmem>>, vector<8x144xf32>
    tpu.vector_store %arg30[%c0_142, %c0_143], %451 {strides = array<i32>} : memref<8x144xf32, #tpu.memory_space<vmem>>, vector<8x144xf32>,
    %c0_144 = arith.constant 0 : index
    %c0_145 = arith.constant 0 : index
    %453 = vector.load %arg31[%c0_144, %c0_145] : memref<1x1xf32, #tpu.memory_space<vmem>>, vector<1x1xf32>
    tpu.vector_store %arg31[%c0_144, %c0_145], %369 {strides = array<i32>} : memref<1x1xf32, #tpu.memory_space<vmem>>, vector<1x1xf32>,
    return
  }
  func.func @transform_0(%arg0: i32) -> (i32, i32) {
    %c0_i32 = arith.constant 0 : i32
    %c0_i32_0 = arith.constant 0 : i32
    %c0_i32_1 = arith.constant 0 : i32
    return %c0_i32, %c0_i32_0 : i32, i32
  }
  func.func @transform_1(%arg0: i32) -> (i32, i32) {
    %c0_i32 = arith.constant 0 : i32
    %c0_i32_0 = arith.constant 0 : i32
    %c0_i32_1 = arith.constant 0 : i32
    return %c0_i32, %c0_i32_0 : i32, i32
  }
  func.func @transform_2(%arg0: i32) -> (i32, i32) {
    %c0_i32 = arith.constant 0 : i32
    %c0_i32_0 = arith.constant 0 : i32
    %c0_i32_1 = arith.constant 0 : i32
    return %c0_i32, %c0_i32_0 : i32, i32
  }
  func.func @transform_3(%arg0: i32) -> (i32, i32) {
    %c0_i32 = arith.constant 0 : i32
    %c0_i32_0 = arith.constant 0 : i32
    %c0_i32_1 = arith.constant 0 : i32
    return %c0_i32, %c0_i32_0 : i32, i32
  }
  func.func @transform_4(%arg0: i32) -> (i32, i32) {
    %c0_i32 = arith.constant 0 : i32
    %c0_i32_0 = arith.constant 0 : i32
    %c0_i32_1 = arith.constant 0 : i32
    return %c0_i32, %c0_i32_0 : i32, i32
  }
  func.func @transform_5(%arg0: i32) -> (i32, i32) {
    %c0_i32 = arith.constant 0 : i32
    %c0_i32_0 = arith.constant 0 : i32
    %c0_i32_1 = arith.constant 0 : i32
    return %c0_i32, %c0_i32_0 : i32, i32
  }
  func.func @transform_6(%arg0: i32) -> (i32, i32) {
    %c0_i32 = arith.constant 0 : i32
    %c0_i32_0 = arith.constant 0 : i32
    %c0_i32_1 = arith.constant 0 : i32
    return %c0_i32, %c0_i32_0 : i32, i32
  }
  func.func @transform_7(%arg0: i32) -> (i32, i32) {
    %c0_i32 = arith.constant 0 : i32
    %c0_i32_0 = arith.constant 0 : i32
    %c0_i32_1 = arith.constant 0 : i32
    return %c0_i32, %c0_i32_0 : i32, i32
  }
  func.func @transform_8(%arg0: i32) -> (i32, i32) {
    %c0_i32 = arith.constant 0 : i32
    %c0_i32_0 = arith.constant 0 : i32
    %c0_i32_1 = arith.constant 0 : i32
    return %c0_i32, %c0_i32_0 : i32, i32
  }
  func.func @transform_9(%arg0: i32) -> (i32, i32) {
    %c0_i32 = arith.constant 0 : i32
    %c0_i32_0 = arith.constant 0 : i32
    %c0_i32_1 = arith.constant 0 : i32
    return %c0_i32, %c0_i32_0 : i32, i32
  }
  func.func @transform_10(%arg0: i32) -> (i32, i32) {
    %c0_i32 = arith.constant 0 : i32
    %c0_i32_0 = arith.constant 0 : i32
    %c0_i32_1 = arith.constant 0 : i32
    return %c0_i32, %c0_i32_0 : i32, i32
  }
  func.func @transform_11(%arg0: i32) -> (i32, i32) {
    %c0_i32 = arith.constant 0 : i32
    %c0_i32_0 = arith.constant 0 : i32
    %c0_i32_1 = arith.constant 0 : i32
    return %c0_i32, %c0_i32_0 : i32, i32
  }
  func.func @transform_12(%arg0: i32) -> (i32, i32) {
    %c0_i32 = arith.constant 0 : i32
    %c0_i32_0 = arith.constant 0 : i32
    %c0_i32_1 = arith.constant 0 : i32
    return %c0_i32, %c0_i32_0 : i32, i32
  }
  func.func @transform_13(%arg0: i32) -> (i32, i32) {
    %c0_i32 = arith.constant 0 : i32
    %c0_i32_0 = arith.constant 0 : i32
    %c0_i32_1 = arith.constant 0 : i32
    return %c0_i32, %c0_i32_0 : i32, i32
  }
  func.func @transform_14(%arg0: i32) -> (i32, i32) {
    %c0_i32 = arith.constant 0 : i32
    %c0_i32_0 = arith.constant 0 : i32
    %c0_i32_1 = arith.constant 0 : i32
    return %c0_i32, %c0_i32_0 : i32, i32
  }
  func.func @transform_15(%arg0: i32) -> (i32, i32) {
    %c0_i32 = arith.constant 0 : i32
    %c0_i32_0 = arith.constant 0 : i32
    %c0_i32_1 = arith.constant 0 : i32
    return %c0_i32, %c0_i32_0 : i32, i32
  }
  func.func @transform_16(%arg0: i32) -> (i32, i32) {
    %c0_i32 = arith.constant 0 : i32
    %c0_i32_0 = arith.constant 0 : i32
    %c0_i32_1 = arith.constant 0 : i32
    return %c0_i32, %c0_i32_0 : i32, i32
  }
  func.func @transform_17(%arg0: i32) -> (i32, i32) {
    %c0_i32 = arith.constant 0 : i32
    %c0_i32_0 = arith.constant 0 : i32
    %c0_i32_1 = arith.constant 0 : i32
    return %c0_i32, %c0_i32_0 : i32, i32
  }
  func.func @transform_18(%arg0: i32) -> (i32, i32) {
    %c0_i32 = arith.constant 0 : i32
    %c0_i32_0 = arith.constant 0 : i32
    %c0_i32_1 = arith.constant 0 : i32
    return %c0_i32, %c0_i32_0 : i32, i32
  }
  func.func @transform_19(%arg0: i32) -> (i32, i32) {
    %c0_i32 = arith.constant 0 : i32
    %c0_i32_0 = arith.constant 0 : i32
    %c0_i32_1 = arith.constant 0 : i32
    return %c0_i32, %c0_i32_0 : i32, i32
  }
  func.func @transform_20(%arg0: i32) -> (i32, i32) {
    %c0_i32 = arith.constant 0 : i32
    %c0_i32_0 = arith.constant 0 : i32
    %c0_i32_1 = arith.constant 0 : i32
    return %c0_i32, %c0_i32_0 : i32, i32
  }
  func.func @transform_21(%arg0: i32) -> (i32, i32) {
    %c0_i32 = arith.constant 0 : i32
    %c0_i32_0 = arith.constant 0 : i32
    %c0_i32_1 = arith.constant 0 : i32
    return %c0_i32, %c0_i32_0 : i32, i32
  }
  func.func @transform_22(%arg0: i32) -> (i32, i32) {
    %c0_i32 = arith.constant 0 : i32
    %c0_i32_0 = arith.constant 0 : i32
    %c0_i32_1 = arith.constant 0 : i32
    return %c0_i32, %c0_i32_0 : i32, i32
  }
  func.func @transform_23(%arg0: i32) -> (i32, i32) {
    %c0_i32 = arith.constant 0 : i32
    %c0_i32_0 = arith.constant 0 : i32
    %c0_i32_1 = arith.constant 0 : i32
    return %c0_i32, %c0_i32_0 : i32, i32
  }
  func.func @transform_24(%arg0: i32) -> (i32, i32) {
    %c0_i32 = arith.constant 0 : i32
    %c0_i32_0 = arith.constant 0 : i32
    %c0_i32_1 = arith.constant 0 : i32
    return %c0_i32, %c0_i32_0 : i32, i32
  }
  func.func @transform_25(%arg0: i32) -> (i32, i32) {
    %c0_i32 = arith.constant 0 : i32
    %c0_i32_0 = arith.constant 0 : i32
    %c0_i32_1 = arith.constant 0 : i32
    return %c0_i32, %c0_i32_0 : i32, i32
  }
  func.func @transform_26(%arg0: i32) -> (i32, i32) {
    %c0_i32 = arith.constant 0 : i32
    %c0_i32_0 = arith.constant 0 : i32
    %c0_i32_1 = arith.constant 0 : i32
    return %c0_i32, %c0_i32_0 : i32, i32
  }
  func.func @transform_27(%arg0: i32) -> (i32, i32) {
    %c0_i32 = arith.constant 0 : i32
    %c0_i32_0 = arith.constant 0 : i32
    %c0_i32_1 = arith.constant 0 : i32
    return %c0_i32, %c0_i32_0 : i32, i32
  }
  func.func @transform_28(%arg0: i32) -> (i32, i32) {
    %c0_i32 = arith.constant 0 : i32
    %c0_i32_0 = arith.constant 0 : i32
    %c0_i32_1 = arith.constant 0 : i32
    return %c0_i32, %c0_i32_0 : i32, i32
  }
  func.func @transform_29(%arg0: i32) -> (i32, i32) {
    %c0_i32 = arith.constant 0 : i32
    %c0_i32_0 = arith.constant 0 : i32
    %c0_i32_1 = arith.constant 0 : i32
    return %c0_i32, %c0_i32_0 : i32, i32
  }
  func.func @transform_30(%arg0: i32) -> (i32, i32) {
    %c0_i32 = arith.constant 0 : i32
    %c0_i32_0 = arith.constant 0 : i32
    %c0_i32_1 = arith.constant 0 : i32
    return %c0_i32, %c0_i32_0 : i32, i32
  }
}

</mosaic_0001>

<bundles_post_ra>
// kernel: styletts2_forward.1
= control target key start
LH: loop header
LB: loop body
LE: loop exit
PB: predicated region body
PF: predicated region fallthrough
CT: control target
= control target key end

     0   :  { %s5908_s6 = smov 1   ;;  %s5909_s10 = smov 2   ;;  %s7221_s0 = inlined_call_operand.smem [shape: u32[31], index: -1, kind: input, shape index: {}] }
   0x1   :  { %s5961_s5 = sld [smem:[%s7221_s0]]   ;;  %s5910_s14 = smov 3  }
   0x2   :  { %s5966_s9 = sld [smem:[%s7221_s0 + %s5908_s6]]   ;;  %s5911_s18 = smov 4  }
   0x3   :  { %s5971_s13 = sld [smem:[%s7221_s0 + %s5909_s10]]   ;;  %s5912_s22 = smov 5  }
   0x4   :  { %s5976_s17 = sld [smem:[%s7221_s0 + %s5910_s14]]   ;;  %s5913_s26 = smov 6  }
   0x5   :  { %s5981_s21 = sld [smem:[%s7221_s0 + %s5911_s18]]   ;;  %s5914_s30 = smov 7  }
   0x6   :  { %s5986_s25 = sld [smem:[%s7221_s0 + %s5912_s22]]   ;;  %s5915_s4 = smov 8  }
   0x7   :  { %s5991_s29 = sld [smem:[%s7221_s0 + %s5913_s26]]   ;;  %s5916_s10 = smov 9  }
   0x8   :  { %s5996_s3 = sld [smem:[%s7221_s0 + %s5914_s30]]   ;;  %s5917_s15 = smov 10  }
   0x9   :  { %s6001_s8 = sld [smem:[%s7221_s0 + %s5915_s4]]   ;;  %s5918_s20 = smov 11  }
   0xa   :  { %s6006_s14 = sld [smem:[%s7221_s0 + %s5916_s10]]   ;;  %s5919_s26 = smov 12  }
   0xb   :  { %s6011_s19 = sld [smem:[%s7221_s0 + %s5917_s15]]   ;;  %s5920_s1 = smov 13  }
   0xc   :  { %s6016_s24 = sld [smem:[%s7221_s0 + %s5918_s20]]   ;;  %s5921_s7 = smov 14  }
   0xd   :  { %s6021_s30 = sld [smem:[%s7221_s0 + %s5919_s26]]   ;;  %s5922_s15 = smov 15  }
   0xe   :  { %s6026_s6 = sld [smem:[%s7221_s0 + %s5920_s1]]   ;;  %s5923_s22 = smov 16  }
   0xf   :  { %s6031_s12 = sld [smem:[%s7221_s0 + %s5921_s7]]   ;;  %s5924_s28 = smov 17  }
  0x10   :  { %s6036_s20 = sld [smem:[%s7221_s0 + %s5922_s15]]   ;;  %s5925_s7 = smov 18  }
  0x11   :  { %s6041_s27 = sld [smem:[%s7221_s0 + %s5923_s22]]   ;;  %s5926_s15 = smov 19  }
  0x12   :  { %s6046_s4 = sld [smem:[%s7221_s0 + %s5924_s28]]   ;;  %s5927_s22 = smov 20  }
  0x13   :  { %7302 = sst [smem:[#allocation14_spill]] %s6021_s30  ;;  %s5928_s28 = smov 21  }
  0x14   :  { %7303 = sst [smem:[#allocation15_spill]] %s6026_s6  ;;  %s5932_s1 = smov 25  }
  0x15   :  { %7304 = sst [smem:[#allocation16_spill]] %s6031_s12  ;;  %s5933_s10 = smov 27  }
  0x16   :  { %7305 = sst [smem:[#allocation17_spill]] %s6036_s20  ;;  %s5934_s16 = smov 28  }
  0x17   :  { %7306 = sst [smem:[#allocation18_spill]] %s6041_s27  ;;  %s5935_s23 = smov 29  }
  0x18   :  { %7307 = sst [smem:[#allocation19_spill]] %s6046_s4 }
  0x19   :  { %s6051_s12 = sld [smem:[%s7221_s0 + %s5925_s7]]   ;;  %s5929_s7 = smov 22  }
  0x1a   :  { %s6056_s30 = sld [smem:[%s7221_s0 + %s5926_s15]]   ;;  %s5930_s15 = smov 23  }
  0x1b   :  { %s6061_s27 = sld [smem:[%s7221_s0 + %s5927_s22]]   ;;  %s5931_s22 = smov 24  }
  0x1c   :  { %s6066_s4 = sld [smem:[%s7221_s0 + %s5928_s28]]  }
  0x1d   :  { %s6071_s20 = sld [smem:[%s7221_s0 + %s5929_s7]]  }
  0x1e   :  { %s6099_s6 = sld [smem:[%s7221_s0 + %s5935_s23]]  }
  0x20   :  { %7308 = sst [smem:[#allocation20_spill]] %s6056_s30 }
  0x21   :  { %7309 = sst [smem:[#allocation21_spill]] %s6061_s27 }
  0x22   :  { %7310 = sst [smem:[#allocation22_spill]] %s6066_s4 }
  0x23   :  { %7311 = sst [smem:[#allocation23_spill]] %s6071_s20 }
  0x24   :  { %s6076_s30 = sld [smem:[%s7221_s0 + %s5930_s15]]  }
  0x25   :  { %s4419_s27 = sld [smem:[%s7221_s0 + %s5931_s22]]  }
  0x26   :  { %s6084_s4 = sld [smem:[%s7221_s0 + %s5932_s1]]   ;;  %s5936_s1 = smov 30  }
  0x27   :  { %s6089_s20 = sld [smem:[%s7221_s0 + %s5933_s10]]   ;;  %s5937_s10 = smov 26  }
  0x28   :  { %s4421_s15 = sld [smem:[%s7221_s0 + %s5937_s10]]  }
  0x2a   :  { %7312 = sst [smem:[#allocation24_spill]] %s6076_s30 }
  0x2b   :  { %s6094_s30 = sld [smem:[%s7221_s0 + %s5934_s16]]   ;;  %v67_v0 = vstv %s4419_s27 }
  0x2c   :  { %7313 = sst [smem:[#allocation25_spill]] %s6084_s4  ;;  %68 = vst [vmem:[#allocation2] sm:$0x1] %v67_v0 }
  0x2d   :  { %s6104_s4 = sld [smem:[%s7221_s0 + %s5936_s1]]  }
  0x2e   :  { %v69_v1 = vstv %s4421_s15 }
  0x2f   :  { %70 = vst [vmem:[#allocation3] sm:$0x1] %v69_v1 }
  0x30   :  { %71 = vsyncpa [#allocation5], 0 }
  0x31   :  { %72 = vsyncpa [#allocation8], 0 }
  0x32   :  { %73 = vsyncpa [#allocation6], 0  ;;  %s5938_s16 = smov [#allocation7]   ;;  %s5814_s23 = scalar_lea.hbm %s6006_s14, 8192 }
  0x33   :  { %s105_s18 = sshll.u32 %s5938_s16, 4  ;;  %p5815_p0 = scmp.ne.s32.totalorder %s6006_s14, %s5814_s23  ;;  %s106_s18 = int_to_ptr.vmem [resolvable:$true] %s105_s18 }
  0x34   :  { %p5818_p1 = scmp.lt.u32.totalorder %s5814_s23, %s6006_s14 }
  0x36   :  { %p5820_p2 = pnand %p5818_p1, %p5815_p0 }
  0x38   :  { %5823 = shalt.err (!%p5820_p2)
}
  0x39   :  { %s5824_s27 = scalar_lea.vmem %s106_s18, 8192  ;;  %p5829_p4 = scmp.lt.s32.totalorder %s106_s18, %s106_s18 }
  0x3a   :  { %p5825_p3 = scmp.ne.s32.totalorder %s106_s18, %s5824_s27  ;;  %p5830_p5 = scmp.lt.s32.totalorder %s5824_s27, %s5824_s27 }
  0x3c   :  { %p5831_p6 = por %p5830_p5, %p5829_p4 }
  0x3e   :  { %p5832_p7 = pnand %p5831_p6, %p5825_p3 }
  0x40   :  { %5835 = shalt.err (!%p5832_p7)
}
  0x41   :  { %s5939_s0 = smov 256   ;;  %s5940_s22 = smov 16  }
  0x42   :  { %111 = dma.hbm_to_vmem [thread:$0]  %s6006_s14, 8192, %s106_s18, [#allocation8], %s5939_s0, %s5939_s0, %s5940_s22  }
  0x43   :  { %s5941_s26 = smov [#allocation4]   ;;  %s5942_s28 = smov [#allocation9]  }
  0x44   :  { %s92_s1 = sshll.u32 %s5941_s26, 4  ;;  %s134_s2 = sshll.u32 %s5942_s28, 4  ;;  %s93_s1 = int_to_ptr.vmem [resolvable:$true] %s92_s1  ;;  %s135_s2 = int_to_ptr.vmem [resolvable:$true] %s134_s2 }
  0x45   :  { %s5836_s10 = scalar_lea.hbm %s5991_s29, 16 }
  0x46   :  { %p5837_p8 = scmp.ne.s32.totalorder %s5991_s29, %s5836_s10  ;;  %p5840_p9 = scmp.lt.u32.totalorder %s5836_s10, %s5991_s29 }
  0x48   :  { %p5842_p10 = pnand %p5840_p9, %p5837_p8 }
  0x4a   :  { %5845 = shalt.err (!%p5842_p10)
}
  0x4b   :  { %s5846_s7 = scalar_lea.vmem %s93_s1, 16  ;;  %s5850_s11 = scalar_lea.vmem %s93_s1, 32 }
  0x4c   :  { %p5847_p11 = scmp.ne.s32.totalorder %s93_s1, %s5846_s7  ;;  %p5851_p12 = scmp.lt.s32.totalorder %s93_s1, %s93_s1 }
  0x4d   :  { %p5852_p13 = scmp.lt.s32.totalorder %s5850_s11, %s5846_s7 }
  0x4f   :  { %p5853_p0 = por %p5852_p13, %p5851_p12 }
  0x51   :  { %p5854_p1 = pnand %p5853_p0, %p5847_p11 }
  0x53   :  { %5857 = shalt.err (!%p5854_p1)
}
  0x54   :  { %95 = dma.hbm_to_vmem [thread:$0]  %s5991_s29, 16, %s93_s1, [#allocation5]  }
  0x55   :  { %s5858_s14 = scalar_lea.hbm %s6051_s12, 16 }
  0x56   :  { %p5859_p2 = scmp.ne.s32.totalorder %s6051_s12, %s5858_s14  ;;  %p5862_p3 = scmp.lt.u32.totalorder %s5858_s14, %s6051_s12 }
  0x58   :  { %p5864_p4 = pnand %p5862_p3, %p5859_p2 }
  0x5a   :  { %5867 = shalt.err (!%p5864_p4)
}
  0x5b   :  { %s5868_s15 = scalar_lea.vmem %s135_s2, 16  ;;  %s5872_s16 = scalar_lea.vmem %s135_s2, 32 }
  0x5c   :  { %p5869_p5 = scmp.ne.s32.totalorder %s135_s2, %s5868_s15  ;;  %p5873_p6 = scmp.lt.s32.totalorder %s135_s2, %s135_s2 }
  0x5d   :  { %p5874_p7 = scmp.lt.s32.totalorder %s5872_s16, %s5868_s15 }
  0x5f   :  { %p5875_p8 = por %p5874_p7, %p5873_p6 }
  0x61   :  { %p5876_p9 = pnand %p5875_p8, %p5869_p5 }
  0x63   :  { %5879 = shalt.err (!%p5876_p9)
}
  0x64   :  { %137 = dma.hbm_to_vmem [thread:$0]  %s6051_s12, 16, %s135_s2, [#allocation8]  }
  0x65   :  { %5902 = dma.done.wait [#allocation5], 16  }
  0x66   :  { %5903 = vsyncadd [#allocation5], 4294967280 }
  0x67   :  { %5904 = dma.done.wait [#allocation8], 8208  }
  0x68   :  { %5905 = vsyncadd [#allocation8], 4294959088  ;;  %v7231_v2 = vmov 0   ;;  %v7234_v3 = vmov 0.0|0.0   ;;  %v169_v4 = vld [vmem:[%s5961_s5] sm:$0xff]  ;;  %v177_v6 = vld [vmem:[%s5971_s13 + $0x8] sm:$0xff]  ;;  %v167_v31 = vlaneseq }
  0x69   :  { %5716 = vset.pattern.permute.xlu0 %v7231_v2  ;;  %4875 = vmatprep.subr.bf16.mxu0 %v7234_v3  ;;  %v176_v5 = vld [vmem:[%s5971_s13] sm:$0xff]  ;;  %v178_v8 = vld [vmem:[%s5971_s13 + $0x10] sm:$0xff]  ;;  %v179_v9 = vld [vmem:[%s5971_s13 + $0x18] sm:$0xff]  ;;  %vm5945_vm0 = vmmov 0   ;;  %v7232_v10 = vmov 0.0   ;;  %vm193_vm1 = vcmask 1043456  }
  0x6a   :  { %4893 = vmatprep.subr.bf16.mxu1 %v7234_v3  ;;  %171 = vperm.xlu0 %5716, %v169_v4   ;;  %v4876_v7 = vpack.c.bf16 %v177_v6, %v176_v5  ;;  %v4879_v11 = vpack.c.bf16 %v179_v9, %v178_v8  ;;  %v180_v12 = vld [vmem:[%s5971_s13 + $0x20] sm:$0xff]  ;;  %v181_v13 = vld [vmem:[%s5971_s13 + $0x28] sm:$0xff]  ;;  %v269_v16 = vld [vmem:[%s5976_s17 + $0x10] sm:$0xff]  ;;  %v6155_v32 = vand.u32 127, %v167_v31  ;;  %vm189_vm2 = vcmask 818176   ;;  %s5947_s5 = smov 96  }
  0x6b   :  { %4634 = vmatprep.mubr.msk.f32.mxu0 %vm5945_vm0, %v7232_v10  ;;  %4645 = vmatprep.mubr.msk.f32.mxu1 %vm5945_vm0, %v7232_v10  ;;  %v267_v14 = vld [vmem:[%s5976_s17] sm:$0xff]  ;;  %v268_v15 = vld [vmem:[%s5976_s17 + $0x8] sm:$0xff]  ;;  %v270_v17 = vld [vmem:[%s5976_s17 + $0x18] sm:$0xff]  ;;  %v4882_v19 = vpack.c.bf16 %v181_v13, %v180_v12  ;;  %vm278_vm4 = vcmask 261120   ;;  %vm439_vm5 = vcmask 523520   ;;  %s7415_s17 = sld [smem:[#allocation14_spill]] }
  0x6c   :  { %4877 = vmatpush3.bf16.msra.mxu0 %v4876_v7  ;;  %v4894_v18 = vpack.c.bf16 %v268_v15, %v267_v14  ;;  %v182_v20 = vld [vmem:[%s5971_s13 + $0x30] sm:$0xff]  ;;  %v183_v21 = vld [vmem:[%s5971_s13 + $0x38] sm:$0xff]  ;;  %v4897_v22 = vpack.c.bf16 %v270_v17, %v269_v16  ;;  %v184_v24 = vld [vmem:[%s5971_s13 + $0x40] sm:$0xff]  ;;  %7314 = vst [vmem:[#allocation26_spill] sm:$0xff] %v6155_v32  ;;  %s5949_s29 = smov 64   ;;  %vm2697_vm6 = vcmask 1040384  }
  0x6d   :  { %4878 = vmatprep.subr.bf16.mxu0 %v7234_v3  ;;  %v4885_v23 = vpack.c.bf16 %v183_v21, %v182_v20  ;;  %v185_v25 = vld [vmem:[%s5971_s13 + $0x48] sm:$0xff]  ;;  %v186_v27 = vld [vmem:[%s5971_s13 + $0x50] sm:$0xff]  ;;  %v187_v28 = vld [vmem:[%s5971_s13 + $0x58] sm:$0xff]  ;;  %vm2699_vm7 = vcmask 1041408   ;;  %vm2701_vm8 = vcmask 1042432   ;;  %vm2704_vm9 = vcmask 1044480  }
  0x6e   :  { %4895 = vmatpush3.bf16.msra.mxu1 %v4894_v18  ;;  %v4888_v26 = vpack.c.bf16 %v185_v25, %v184_v24  ;;  %v4891_v29 = vpack.c.bf16 %v187_v28, %v186_v27  ;;  %v188_v30 = vld [vmem:[%s5971_s13 + $0x60] sm:$0xf]  ;;  %v354_v38 = vld [vmem:[%s5986_s25 + $0x8] sm:$0xff]  ;;  %v355_v39 = vld [vmem:[%s5986_s25 + $0x10] sm:$0xff]  ;;  %s7414_s13 = sld [smem:[#allocation17_spill]]  ;;  %vm2706_vm10 = vcmask 1045504  }
  0x6f   :  { %4896 = vmatprep.subr.bf16.mxu1 %v7234_v3  ;;  %v353_v37 = vld [vmem:[%s5986_s25] sm:$0xff]  ;;  %v356_v41 = vld [vmem:[%s5986_s25 + $0x18] sm:$0xff]  ;;  %v514_v47 = vld [vmem:[%s5996_s3 + $0x208] sm:$0xff]  ;;  %s7417_s25 = sld [smem:[#allocation18_spill]]  ;;  %vm2708_vm11 = vcmask 1046528   ;;  %vm2802_vm12 = vcmask 130048  }
  0x70   :  { %4880 = vmatpush3.bf16.msra.mxu0 %v4879_v11  ;;  %v4900_v40 = vpack.c.bf16 %v354_v38, %v353_v37  ;;  %v4903_v42 = vpack.c.bf16 %v356_v41, %v355_v39  ;;  %v4429_v43 = vld [vmem:[%s5981_s21] ss:$0 sm:$0xff]  ;;  %v516_v48 = vld [vmem:[%s5996_s3 + $0x218] sm:$0xff]  ;;  %v515_v60 = vld [vmem:[%s5996_s3 + $0x210] sm:$0xff]  ;;  %v6186_v11 = vshrl.u32 %v167_v31, 7  ;;  %s7416_s21 = sld [smem:[#allocation16_spill]] }
  0x71   :  { %4881 = vmatprep.subr.bf16.mxu0 %v7234_v3  ;;  %v4905_v49 = vpack.c.bf16 %v516_v48, %v514_v47  ;;  %v513_v59 = vld [vmem:[%s5996_s3 + $0x200] sm:$0xff]  ;;  %v518_v61 = vld [vmem:[%s5996_s3 + $0x228] sm:$0xff]  ;;  %v520_v62 = vld [vmem:[%s5996_s3 + $0x238] sm:$0xff]  ;;  %vm2817_vm15 = vcmask 64512   ;;  %s7429_s12 = sld [smem:[#allocation21_spill]]  ;;  %s7430_s18 = sld [smem:[#allocation24_spill]] }
  0x72   :  { %4898 = vmatpush3.bf16.msra.mxu1 %v4897_v22  ;;  %v4907_v63 = vpack.c.bf16 %v515_v60, %v513_v59  ;;  %v4909_v0 = vpack.c.bf16 %v520_v62, %v518_v61  ;;  %v517_v1 = vld [vmem:[%s5996_s3 + $0x220] sm:$0xff]  ;;  %v519_v4 = vld [vmem:[%s5996_s3 + $0x230] sm:$0xff]  ;;  %v450_v6 = vld [vmem:[%s5996_s3 + $0x8] sm:$0xff]  ;;  %7317 = vst [vmem:[#allocation29_spill] sm:$0xff] %v6186_v11  ;;  %v6190_v12 = vsub.s32 1, %v6186_v11  ;;  %s7431_s23 = sld [smem:[#allocation22_spill]] }
  0x73   :  { %4899 = vmatprep.subr.bf16.mxu1 %v7234_v3  ;;  %v452_v7 = vld [vmem:[%s5996_s3 + $0x18] sm:$0xff]  ;;  %v4911_v8 = vpack.c.bf16 %v519_v4, %v517_v1  ;;  %v449_v13 = vld [vmem:[%s5996_s3] sm:$0xff]  ;;  %v451_v14 = vld [vmem:[%s5996_s3 + $0x10] sm:$0xff]  ;;  %s7432_s27 = sld [smem:[#allocation23_spill]] }
  0x74   :  { %4883 = vmatpush3.bf16.msra.mxu0 %v4882_v19  ;;  %v6184_v9 = vpack.c.bf16 %v452_v7, %v450_v6  ;;  %v6195_v15 = vld [vmem:[%s5966_s9] sm:$0x3]  ;;  %v454_v16 = vld [vmem:[%s5996_s3 + $0x28] sm:$0xff]  ;;  %v456_v17 = vld [vmem:[%s5996_s3 + $0x38] sm:$0xff]  ;;  %v6199_v18 = vpack.c.bf16 %v451_v14, %v449_v13  ;;  %s7413_s9 = sld [smem:[#allocation15_spill]] }
  0x75   :  { %4884 = vmatprep.subr.bf16.mxu0 %v7234_v3  ;;  %v683_v19 = vrot.slane %v6195_v15, %v6190_v12  ;;  %v6203_v20 = vpack.c.bf16 %v456_v17, %v454_v16  ;;  %v453_v21 = vld [vmem:[%s5996_s3 + $0x20] sm:$0xff]  ;;  %v455_v22 = vld [vmem:[%s5996_s3 + $0x30] sm:$0xff]  ;;  %v458_v24 = vld [vmem:[%s5996_s3 + $0x48] sm:$0xff] }
  0x76   :  { %7316 = vst [vmem:[#allocation28_spill] sm:$0xff] %v6184_v9  ;;  %v460_v25 = vld [vmem:[%s5996_s3 + $0x58] sm:$0xff]  ;;  %v457_v28 = vld [vmem:[%s5996_s3 + $0x40] sm:$0xff]  ;;  %v466_v37 = vld [vmem:[%s5996_s3 + $0x88] sm:$0xff] }
  0x77   :  { %v6214_v27 = vpack.c.bf16 %v460_v25, %v458_v24  ;;  %v464_v31 = vld [vmem:[%s5996_s3 + $0x78] sm:$0xff]  ;;  %v465_v41 = vld [vmem:[%s5996_s3 + $0x80] sm:$0xff]  ;;  %v471_v48 = vld [vmem:[%s5996_s3 + $0xb0] sm:$0xff] }
  0x78   :  { %4886 = vmatpush3.bf16.msra.mxu0 %v4885_v23  ;;  %v468_v38 = vld [vmem:[%s5996_s3 + $0x98] sm:$0xff]  ;;  %v469_v47 = vld [vmem:[%s5996_s3 + $0xa0] sm:$0xff]  ;;  %v479_v61 = vld [vmem:[%s5996_s3 + $0xf0] sm:$0xff] }
  0x79   :  { %4887 = vmatprep.subr.bf16.mxu0 %v7234_v3  ;;  %v477_v60 = vld [vmem:[%s5996_s3 + $0xe0] sm:$0xff]  ;;  %v482_v62 = vld [vmem:[%s5996_s3 + $0x108] sm:$0xff]  ;;  %v488_v7 = vld [vmem:[%s5996_s3 + $0x138] sm:$0xff] }
  0x7a   :  { %v481_v4 = vld [vmem:[%s5996_s3 + $0x100] sm:$0xff]  ;;  %v486_v6 = vld [vmem:[%s5996_s3 + $0x128] sm:$0xff]  ;;  %v487_v16 = vld [vmem:[%s5996_s3 + $0x130] sm:$0xff] }
  0x7b   :  { %v6284_v13 = vpack.c.bf16 %v488_v7, %v486_v6  ;;  %v485_v14 = vld [vmem:[%s5996_s3 + $0x120] sm:$0xff]  ;;  %v490_v17 = vld [vmem:[%s5996_s3 + $0x148] sm:$0xff]  ;;  %v491_v24 = vld [vmem:[%s5996_s3 + $0x150] sm:$0xff] }
  0x7c   :  { %4889 = vmatpush3.bf16.msra.mxu0 %v4888_v26  ;;  %v6211_v26 = vpack.c.bf16 %v455_v22, %v453_v21  ;;  %v6291_v21 = vpack.c.bf16 %v487_v16, %v485_v14  ;;  %v494_v25 = vld [vmem:[%s5996_s3 + $0x168] sm:$0xff]  ;;  %v509_v7 = vld [vmem:[%s5996_s3 + $0x1e0] sm:$0xff]  ;;  %v511_v14 = vld [vmem:[%s5996_s3 + $0x1f0] sm:$0xff]  ;;  %v6349_v16 = vsub.s32 0, %v6186_v11 }
  0x7d   :  { %4890 = vmatprep.subr.bf16.mxu0 %v7234_v3  ;;  %7320 = vst [vmem:[#allocation32_spill] sm:$0xff] %v6284_v13 }
  0x7e   :  { %7321 = vst [vmem:[#allocation33_spill] sm:$0xff] %v6291_v21 }
  0x80   :  { %4892 = vmatpush3.bf16.msra.mxu0 %v4891_v29  ;;  %v459_v29 = vld [vmem:[%s5996_s3 + $0x50] sm:$0xff] }
  0x81   :  { %4632 = vmatprep.subr.mxu0 %v7232_v10 }
  0x84   :  { %4633 = vmatpush3.msk.msra.mxu0 %vm193_vm1, %v188_v30  ;;  %v462_v30 = vld [vmem:[%s5996_s3 + $0x68] sm:$0xff] }
  0xe9   :  { %v172_v33 = vpop.permute.xlu0 %171 }
  0xea   :  { %vm173_vm3 = vcmp.eq.s32.totalorder %v6155_v32, %v172_v33  ;;  %v6221_v33 = vpack.c.bf16 %v459_v29, %v457_v28  ;;  %v496_v28 = vld [vmem:[%s5996_s3 + $0x178] sm:$0xff] }
  0xeb   :  { %v4426_v34 = vsel %vm173_vm3, 1.0, %v7232_v10 }
  0xec   :  { %4635 = vmatmul.mubr.msk.f32.vlgmr.msra.gmra.mrb[0].mxu0 %vm189_vm2, %v4426_v34  ;;  %v6224_v34 = vpack.c.bf16 %v464_v31, %v462_v30  ;;  %v6304_v30 = vpack.c.bf16 %v496_v28, %v494_v25  ;;  %v493_v31 = vld [vmem:[%s5996_s3 + $0x160] sm:$0xff] }
  0xed   :  { %v609_v25 = vld [vmem:[#allocation7] sm:$0xff] }
  0xee   :  { %7324 = vst [vmem:[#allocation36_spill] sm:$0xff] %v6304_v30 }
 0x1bf   :  { %v263_v35 = vpop.f32.mrb[0].mxu0 }
 0x1c0   :  { %v4636_v36 = vpop.f32.mrb[1].mxu0  ;;  %4646 = vmatmul.mubr.msk.f32.vlgmr.msra.gmra.mrb[0].mxu1 %vm278_vm4, %v263_v35  ;;  %v461_v35 = vld [vmem:[%s5996_s3 + $0x60] sm:$0xff] }
 0x1c1   :  { %4656 = vmatprep.mubr.msk.f32.mxu1 %vm5945_vm0, %v7232_v10  ;;  %4901 = vmatpush3.bf16.msra.mxu1 %v4900_v40  ;;  %v463_v36 = vld [vmem:[%s5996_s3 + $0x70] sm:$0xff]  ;;  %v6234_v40 = vpack.c.bf16 %v468_v38, %v466_v37  ;;  %v500_v37 = vld [vmem:[%s5996_s3 + $0x198] sm:$0xff] }
 0x1c2   :  { %4902 = vmatprep.subr.bf16.mxu1 %v7234_v3  ;;  %v6231_v39 = vpack.c.bf16 %v463_v36, %v461_v35  ;;  %v495_v35 = vld [vmem:[%s5996_s3 + $0x170] sm:$0xff]  ;;  %v498_v36 = vld [vmem:[%s5996_s3 + $0x188] sm:$0xff] }
 0x1c3   :  { %v6311_v38 = vpack.c.bf16 %v495_v35, %v493_v31  ;;  %v611_v31 = vld [vmem:[#allocation7 + $0x10] sm:$0xff]  ;;  %v614_v35 = vld [vmem:[#allocation7 + $0x28] sm:$0xff] }
 0x1c5   :  { %4904 = vmatpush3.bf16.msra.mxu1 %v4903_v42  ;;  %v467_v42 = vld [vmem:[%s5996_s3 + $0x90] sm:$0xff]  ;;  %7325 = vst [vmem:[#allocation37_spill] sm:$0xff] %v6311_v38 }
 0x1c6   :  { %4906 = vmatprep.subr.bf16.mxu1 %v4905_v49  ;;  %v474_v49 = vld [vmem:[%s5996_s3 + $0xc8] sm:$0xff] }
 0x293   :  { %v348_v44 = vpop.f32.mrb[0].mxu1 }
 0x294   :  { %v349_v45 = vadd.f32 %v4429_v43, %v348_v44  ;;  %v4647_v46 = vpop.f32.mrb[1].mxu1  ;;  %v470_v43 = vld [vmem:[%s5996_s3 + $0xa8] sm:$0xff]  ;;  %v472_v44 = vld [vmem:[%s5996_s3 + $0xb8] sm:$0xff] }
 0x295   :  { %v6244_v46 = vpack.c.bf16 %v472_v44, %v470_v43  ;;  %v499_v43 = vld [vmem:[%s5996_s3 + $0x190] sm:$0xff]  ;;  %v502_v44 = vld [vmem:[%s5996_s3 + $0x1a8] sm:$0xff] }
 0x296   :  { %5718 = vtanh.f32 %v349_v45  ;;  %v6241_v45 = vpack.c.bf16 %v467_v42, %v465_v41  ;;  %v6314_v41 = vpack.c.bf16 %v500_v37, %v498_v36  ;;  %v497_v42 = vld [vmem:[%s5996_s3 + $0x180] sm:$0xff]  ;;  %v6373_v37 = vpack.c.bf16 %v611_v31, %v609_v25 }
 0x297   :  { %v616_v36 = vld [vmem:[#allocation7 + $0x38] sm:$0xff] }
 0x298   :  { %7326 = vst [vmem:[#allocation38_spill] sm:$0xff] %v6314_v41 }
 0x2a0   :  { %v6170_v50 = vpop.eup %5718 }
 0x2a1   :  { %7315 = vst [vmem:[#allocation27_spill] sm:$0xff] %v6170_v50  ;;  %365 = vrot.lane.b32.xlu0 %v6170_v50, %s5947_s5  ;;  %v440_v51 = vsel %vm439_vm5, %v6170_v50, 0.0  ;;  %v647_v50 = vld [vmem:[#allocation7 + $0x130] sm:$0xff] }
 0x2a2   :  { %v441_v52 = vrot.slane %v440_v51, 4 }
 0x2a4   :  { %v442_v53 = vadd.f32 %v441_v52, %v440_v51  ;;  %v476_v51 = vld [vmem:[%s5996_s3 + $0xd8] sm:$0xff]  ;;  %v6251_v52 = vpack.c.bf16 %v471_v48, %v469_v47  ;;  %v6321_v48 = vpack.c.bf16 %v499_v43, %v497_v42  ;;  %v6375_v42 = vpack.c.bf16 %v616_v36, %v614_v35  ;;  %v613_v43 = vld [vmem:[#allocation7 + $0x20] sm:$0xff] }
 0x2a5   :  { %v504_v47 = vld [vmem:[%s5996_s3 + $0x1b8] sm:$0xff]  ;;  %v625_v35 = vld [vmem:[#allocation7 + $0x80] sm:$0xff] }
 0x2a6   :  { %v443_v54 = vrot.slane %v442_v53, 2  ;;  %7327 = vst [vmem:[#allocation39_spill] sm:$0xff] %v6321_v48  ;;  %v627_v36 = vld [vmem:[#allocation7 + $0x90] sm:$0xff] }
 0x2a8   :  { %v444_v55 = vadd.f32 %v443_v54, %v442_v53  ;;  %v6254_v53 = vpack.c.bf16 %v476_v51, %v474_v49  ;;  %v473_v54 = vld [vmem:[%s5996_s3 + $0xc0] sm:$0xff]  ;;  %v6324_v49 = vpack.c.bf16 %v504_v47, %v502_v44  ;;  %v615_v44 = vld [vmem:[#allocation7 + $0x30] sm:$0xff]  ;;  %v618_v47 = vld [vmem:[#allocation7 + $0x48] sm:$0xff] }
 0x2a9   :  { %v501_v51 = vld [vmem:[%s5996_s3 + $0x1a0] sm:$0xff] }
 0x2aa   :  { %v445_v56 = vrot.slane %v444_v55, 1  ;;  %7328 = vst [vmem:[#allocation40_spill] sm:$0xff] %v6324_v49 }
 0x2ac   :  { %v446_v57 = vadd.f32 %v445_v56, %v444_v55  ;;  %v475_v55 = vld [vmem:[%s5996_s3 + $0xd0] sm:$0xff]  ;;  %v478_v56 = vld [vmem:[%s5996_s3 + $0xe8] sm:$0xff] }
 0x2ae   :  { %v448_v58 = vmul.f32 0.125, %v446_v57  ;;  %v480_v57 = vld [vmem:[%s5996_s3 + $0xf8] sm:$0xff] }
 0x2af   :  { %v6264_v59 = vpack.c.bf16 %v480_v57, %v478_v56  ;;  %v508_v56 = vld [vmem:[%s5996_s3 + $0x1d8] sm:$0xff] }
 0x2b0   :  { %523 = vrot.lane.b32.xlu1 %v448_v58, %s5947_s5  ;;  %v6261_v58 = vpack.c.bf16 %v475_v55, %v473_v54  ;;  %v503_v54 = vld [vmem:[%s5996_s3 + $0x1b0] sm:$0xff]  ;;  %v506_v55 = vld [vmem:[%s5996_s3 + $0x1c8] sm:$0xff] }
 0x2b1   :  { %v6331_v57 = vpack.c.bf16 %v503_v54, %v501_v51  ;;  %v620_v51 = vld [vmem:[#allocation7 + $0x58] sm:$0xff]  ;;  %v6379_v54 = vpack.c.bf16 %v615_v44, %v613_v43  ;;  %v630_v43 = vld [vmem:[#allocation7 + $0xa8] sm:$0xff] }
 0x2b2   :  { %v632_v44 = vld [vmem:[#allocation7 + $0xb8] sm:$0xff] }
 0x2b3   :  { %7329 = vst [vmem:[#allocation41_spill] sm:$0xff] %v6331_v57 }
 0x313   :  { %v366_v5 = vpop.permute.xlu0 %365 }
 0x314   :  { %4657 = vmatmul.mubr.msk.f32.vlgmr.msra.gmra.mrb[2].mxu1 %vm278_vm4, %v366_v5  ;;  %v483_v5 = vld [vmem:[%s5996_s3 + $0x110] sm:$0xff] }
 0x315   :  { %4908 = vmatpush1.bf16.msra.mxu1 %v4907_v63  ;;  %602 = vmatprep.mubr.f32.mxu1 %v7232_v10  ;;  %v484_v63 = vld [vmem:[%s5996_s3 + $0x118] sm:$0xff] }
 0x316   :  { %4910 = vmatprep.subr.bf16.mxu1 %v4909_v0  ;;  %v6271_v0 = vpack.c.bf16 %v479_v61, %v477_v60  ;;  %v6274_v1 = vpack.c.bf16 %v484_v63, %v482_v62  ;;  %v6334_v60 = vpack.c.bf16 %v508_v56, %v506_v55  ;;  %v505_v61 = vld [vmem:[%s5996_s3 + $0x1c0] sm:$0xff]  ;;  %v507_v62 = vld [vmem:[%s5996_s3 + $0x1d0] sm:$0xff]  ;;  %v510_v63 = vld [vmem:[%s5996_s3 + $0x1e8] sm:$0xff]  ;;  %v6383_v55 = vpack.c.bf16 %v620_v51, %v618_v47 }
 0x317   :  { %v617_v56 = vld [vmem:[#allocation7 + $0x40] sm:$0xff]  ;;  %v6403_v47 = vpack.c.bf16 %v627_v36, %v625_v35  ;;  %v6407_v51 = vpack.c.bf16 %v632_v44, %v630_v43  ;;  %v638_v35 = vld [vmem:[#allocation7 + $0xe8] sm:$0xff]  ;;  %v640_v36 = vld [vmem:[#allocation7 + $0xf8] sm:$0xff] }
 0x318   :  { %7318 = vst [vmem:[#allocation30_spill] sm:$0xff] %v6274_v1  ;;  %7330 = vst [vmem:[#allocation42_spill] sm:$0xff] %v6334_v60  ;;  %v6423_v44 = vpack.c.bf16 %v640_v36, %v638_v35  ;;  %v643_v10 = vld [vmem:[#allocation7 + $0x110] sm:$0xff]  ;;  %v646_v35 = vld [vmem:[#allocation7 + $0x128] sm:$0xff] }
 0x319   :  { %4912 = vmatpush1.bf16.msra.mxu1 %v4911_v8  ;;  %v6281_v8 = vpack.c.bf16 %v483_v5, %v481_v4  ;;  %v512_v4 = vld [vmem:[%s5996_s3 + $0x1f8] sm:$0xff]  ;;  %v6341_v5 = vpack.c.bf16 %v507_v62, %v505_v61  ;;  %v622_v62 = vld [vmem:[#allocation7 + $0x68] sm:$0xff] }
 0x31a   :  { %4914 = vmatprep.subr.bf16.mxu1 %v6184_v9  ;;  %v6344_v6 = vpack.c.bf16 %v512_v4, %v510_v63  ;;  %v619_v61 = vld [vmem:[#allocation7 + $0x50] sm:$0xff]  ;;  %v624_v63 = vld [vmem:[#allocation7 + $0x78] sm:$0xff] }
 0x31b   :  { %7319 = vst [vmem:[#allocation31_spill] sm:$0xff] %v6281_v8  ;;  %7331 = vst [vmem:[#allocation43_spill] sm:$0xff] %v6341_v5  ;;  %v6387_v4 = vpack.c.bf16 %v619_v61, %v617_v56  ;;  %v629_v56 = vld [vmem:[#allocation7 + $0xa0] sm:$0xff]  ;;  %v631_v61 = vld [vmem:[#allocation7 + $0xb0] sm:$0xff] }
 0x31c   :  { %7332 = vst [vmem:[#allocation44_spill] sm:$0xff] %v6344_v6  ;;  %v648_v36 = vld [vmem:[#allocation7 + $0x138] sm:$0xff] }
 0x322   :  { %v524_v23 = vpop.permute.xlu1 %523 }
 0x323   :  { %4433 = vmatmul.mubr.msk.f32.vlgmr.msra.gmra.mrb[4].mxu1 %vm278_vm4, %v524_v23  ;;  %v489_v23 = vld [vmem:[%s5996_s3 + $0x140] sm:$0xff] }
 0x324   :  { %4916 = vmatpush1.bf16.msra.mxu1 %v6199_v18  ;;  %750 = vmatprep.mubr.f32.mxu1 %v683_v19  ;;  %v492_v19 = vld [vmem:[%s5996_s3 + $0x158] sm:$0xff]  ;;  %v6301_v29 = vpack.c.bf16 %v491_v24, %v489_v23  ;;  %v610_v23 = vld [vmem:[#allocation7 + $0x8] sm:$0xff]  ;;  %s5950_s3 = smov 32  }
 0x325   :  { %4918 = vmatprep.subr.bf16.mxu1 %v6203_v20  ;;  %v6294_v22 = vpack.c.bf16 %v492_v19, %v490_v17  ;;  %v6352_v17 = vpack.c.bf16 %v511_v14, %v509_v7  ;;  %v679_v19 = vrot.slane %v6195_v15, %v6349_v16  ;;  %v612_v24 = vld [vmem:[#allocation7 + $0x18] sm:$0xff]  ;;  %v6391_v7 = vpack.c.bf16 %v624_v63, %v622_v62  ;;  %v621_v14 = vld [vmem:[#allocation7 + $0x60] sm:$0xff]  ;;  %v634_v62 = vld [vmem:[#allocation7 + $0xc8] sm:$0xff] }
 0x326   :  { %7323 = vst [vmem:[#allocation35_spill] sm:$0xff] %v6301_v29  ;;  %v6370_v28 = vpack.c.bf16 %v612_v24, %v610_v23  ;;  %v626_v23 = vld [vmem:[#allocation7 + $0x88] sm:$0xff]  ;;  %v628_v24 = vld [vmem:[#allocation7 + $0x98] sm:$0xff] }
 0x327   :  { %7322 = vst [vmem:[#allocation34_spill] sm:$0xff] %v6294_v22  ;;  %7333 = vst [vmem:[#allocation45_spill] sm:$0xff] %v6352_v17  ;;  %v6399_v31 = vpack.c.bf16 %v628_v24, %v626_v23  ;;  %v636_v63 = vld [vmem:[#allocation7 + $0xd8] sm:$0xff]  ;;  %v633_v23 = vld [vmem:[#allocation7 + $0xc0] sm:$0xff] }
 0x328   :  { %4920 = vmatpush1.bf16.msra.mxu1 %v6211_v26  ;;  %7334 = vst [vmem:[#allocation46_spill] sm:$0xff] %v6370_v28  ;;  %4978 = vmatprep.subr.bf16.mxu0 %v6370_v28  ;;  %v635_v24 = vld [vmem:[#allocation7 + $0xd0] sm:$0xff] }
 0x329   :  { %4922 = vmatprep.subr.bf16.mxu1 %v6214_v27  ;;  %4980 = vmatpush1.bf16.msra.mxu0 %v6373_v37  ;;  %v6419_v43 = vpack.c.bf16 %v635_v24, %v633_v23  ;;  %v641_v24 = vld [vmem:[#allocation7 + $0x100] sm:$0xff] }
 0x32a   :  { %4982 = vmatprep.subr.bf16.mxu0 %v6375_v42  ;;  %v6435_v3 = vpack.c.bf16 %v643_v10, %v641_v24  ;;  %v649_v24 = vld [vmem:[#allocation7 + $0x140] sm:$0xff] }
 0x32c   :  { %4924 = vmatpush1.bf16.msra.mxu1 %v6221_v33  ;;  %7335 = vst [vmem:[#allocation47_spill] sm:$0xff] %v6435_v3 }
 0x32d   :  { %4926 = vmatprep.subr.bf16.mxu1 %v6224_v34  ;;  %4984 = vmatpush1.bf16.msra.mxu0 %v6379_v54 }
 0x32e   :  { %4986 = vmatprep.subr.bf16.mxu0 %v6383_v55 }
 0x330   :  { %4928 = vmatpush1.bf16.msra.mxu1 %v6231_v39 }
 0x331   :  { %4930 = vmatprep.subr.bf16.mxu1 %v6234_v40  ;;  %4988 = vmatpush1.bf16.msra.mxu0 %v6387_v4 }
 0x332   :  { %4990 = vmatprep.subr.bf16.mxu0 %v6391_v7 }
 0x334   :  { %4932 = vmatpush1.bf16.msra.mxu1 %v6241_v45 }
 0x335   :  { %4934 = vmatprep.subr.bf16.mxu1 %v6244_v46 }
 0x338   :  { %4936 = vmatpush1.bf16.msra.mxu1 %v6251_v52 }
 0x339   :  { %4938 = vmatprep.subr.bf16.mxu1 %v6254_v53 }
 0x33c   :  { %4940 = vmatpush1.bf16.msra.mxu1 %v6261_v58 }
 0x33d   :  { %4942 = vmatprep.subr.bf16.mxu1 %v6264_v59 }
 0x340   :  { %4944 = vmatpush1.bf16.msra.mxu1 %v6271_v0 }
 0x341   :  { %4946 = vmatprep.subr.bf16.mxu1 %v6274_v1 }
 0x344   :  { %4948 = vmatpush1.bf16.msra.mxu1 %v6281_v8 }
 0x345   :  { %4950 = vmatprep.subr.bf16.mxu1 %v6284_v13 }
 0x348   :  { %4952 = vmatpush1.bf16.msra.mxu1 %v6291_v21 }
 0x349   :  { %4954 = vmatprep.subr.bf16.mxu1 %v6294_v22 }
 0x34c   :  { %4956 = vmatpush1.bf16.msra.mxu1 %v6301_v29 }
 0x34d   :  { %4958 = vmatprep.subr.bf16.mxu1 %v6304_v30 }
 0x350   :  { %4960 = vmatpush1.bf16.msra.mxu1 %v6311_v38 }
 0x351   :  { %4962 = vmatprep.subr.bf16.mxu1 %v6314_v41 }
 0x354   :  { %4964 = vmatpush1.bf16.msra.mxu1 %v6321_v48 }
 0x355   :  { %4966 = vmatprep.subr.bf16.mxu1 %v6324_v49 }
 0x358   :  { %4968 = vmatpush1.bf16.msra.mxu1 %v6331_v57 }
 0x359   :  { %4970 = vmatprep.subr.bf16.mxu1 %v6334_v60 }
 0x35c   :  { %4972 = vmatpush1.bf16.msra.mxu1 %v6341_v5 }
 0x35d   :  { %4974 = vmatprep.subr.bf16.mxu1 %v6344_v6 }
 0x360   :  { %4976 = vmatpush1.bf16.msra.mxu1 %v6352_v17 }
 0x361   :  { %5042 = vmatprep.subr.bf16.mxu1 %v6184_v9 }
 0x363   :  { %751 = vmatmul.mubr.f32.vlgmr.msra.gmra.mrb[6].mxu1 %v679_v19  ;;  %v623_v19 = vld [vmem:[#allocation7 + $0x70] sm:$0xff] }
 0x364   :  { %5044 = vmatpush1.bf16.msra.mxu1 %v6199_v18  ;;  %v6395_v25 = vpack.c.bf16 %v623_v19, %v621_v14  ;;  %v6411_v14 = vpack.c.bf16 %v631_v61, %v629_v56  ;;  %v6415_v19 = vpack.c.bf16 %v636_v63, %v634_v62  ;;  %v637_v56 = vld [vmem:[#allocation7 + $0xe0] sm:$0xff]  ;;  %v639_v61 = vld [vmem:[#allocation7 + $0xf0] sm:$0xff]  ;;  %v642_v62 = vld [vmem:[#allocation7 + $0x108] sm:$0xff] }
 0x365   :  { %5046 = vmatprep.subr.bf16.mxu1 %v6203_v20  ;;  %v644_v63 = vld [vmem:[#allocation7 + $0x118] sm:$0xff]  ;;  %v6427_v2 = vpack.c.bf16 %v639_v61, %v637_v56  ;;  %v6439_v56 = vpack.c.bf16 %v648_v36, %v646_v35  ;;  %v645_v61 = vld [vmem:[#allocation7 + $0x120] sm:$0xff]  ;;  %v654_v35 = vld [vmem:[#allocation7 + $0x168] sm:$0xff] }
 0x366   :  { %4992 = vmatpush1.bf16.msra.mxu0 %v6395_v25  ;;  %v6431_v23 = vpack.c.bf16 %v644_v63, %v642_v62  ;;  %v650_v62 = vld [vmem:[#allocation7 + $0x148] sm:$0xff]  ;;  %v652_v63 = vld [vmem:[#allocation7 + $0x158] sm:$0xff]  ;;  %v6443_v32 = vpack.c.bf16 %v647_v50, %v645_v61  ;;  %v653_v61 = vld [vmem:[#allocation7 + $0x160] sm:$0xff] }
 0x367   :  { %4994 = vmatprep.subr.bf16.mxu0 %v6399_v31  ;;  %7336 = vst [vmem:[#allocation48_spill] sm:$0xff] %v6439_v56  ;;  %v6447_v10 = vpack.c.bf16 %v652_v63, %v650_v62  ;;  %v656_v36 = vld [vmem:[#allocation7 + $0x178] sm:$0xff] }
 0x368   :  { %5048 = vmatpush1.bf16.msra.mxu1 %v6211_v26  ;;  %7337 = vst [vmem:[#allocation49_spill] sm:$0xff] %v6443_v32  ;;  %v6455_v50 = vpack.c.bf16 %v656_v36, %v654_v35  ;;  %v660_v63 = vld [vmem:[#allocation7 + $0x198] sm:$0xff]  ;;  %v662_v36 = vld [vmem:[#allocation7 + $0x1a8] sm:$0xff] }
 0x369   :  { %5050 = vmatprep.subr.bf16.mxu1 %v6214_v27  ;;  %7338 = vst [vmem:[#allocation50_spill] sm:$0xff] %v6447_v10 }
 0x36a   :  { %4996 = vmatpush1.bf16.msra.mxu0 %v6403_v47  ;;  %7340 = vst [vmem:[#allocation52_spill] sm:$0xff] %v6455_v50 }
 0x36b   :  { %4998 = vmatprep.subr.bf16.mxu0 %v6407_v51 }
 0x36c   :  { %5052 = vmatpush1.bf16.msra.mxu1 %v6221_v33 }
 0x36d   :  { %5054 = vmatprep.subr.bf16.mxu1 %v6224_v34 }
 0x36e   :  { %5000 = vmatpush1.bf16.msra.mxu0 %v6411_v14 }
 0x36f   :  { %5002 = vmatprep.subr.bf16.mxu0 %v6415_v19 }
 0x370   :  { %5056 = vmatpush1.bf16.msra.mxu1 %v6231_v39 }
 0x371   :  { %5058 = vmatprep.subr.bf16.mxu1 %v6234_v40 }
 0x372   :  { %5004 = vmatpush1.bf16.msra.mxu0 %v6419_v43 }
 0x373   :  { %5006 = vmatprep.subr.bf16.mxu0 %v6423_v44 }
 0x374   :  { %5060 = vmatpush1.bf16.msra.mxu1 %v6241_v45 }
 0x375   :  { %5062 = vmatprep.subr.bf16.mxu1 %v6244_v46 }
 0x376   :  { %5008 = vmatpush1.bf16.msra.mxu0 %v6427_v2 }
 0x377   :  { %5010 = vmatprep.subr.bf16.mxu0 %v6431_v23 }
 0x378   :  { %5064 = vmatpush1.bf16.msra.mxu1 %v6251_v52 }
 0x379   :  { %5066 = vmatprep.subr.bf16.mxu1 %v6254_v53 }
 0x37a   :  { %5012 = vmatpush1.bf16.msra.mxu0 %v6435_v3 }
 0x37b   :  { %5014 = vmatprep.subr.bf16.mxu0 %v6439_v56 }
 0x37c   :  { %5068 = vmatpush1.bf16.msra.mxu1 %v6261_v58 }
 0x37d   :  { %5070 = vmatprep.subr.bf16.mxu1 %v6264_v59 }
 0x37e   :  { %5016 = vmatpush1.bf16.msra.mxu0 %v6443_v32 }
 0x37f   :  { %5018 = vmatprep.subr.bf16.mxu0 %v6447_v10 }
 0x380   :  { %5072 = vmatpush1.bf16.msra.mxu1 %v6271_v0 }
 0x381   :  { %5074 = vmatprep.subr.bf16.mxu1 %v6274_v1 }
 0x384   :  { %5076 = vmatpush1.bf16.msra.mxu1 %v6281_v8 }
 0x385   :  { %5078 = vmatprep.subr.bf16.mxu1 %v6284_v13 }
 0x388   :  { %5080 = vmatpush1.bf16.msra.mxu1 %v6291_v21 }
 0x389   :  { %5082 = vmatprep.subr.bf16.mxu1 %v6294_v22 }
 0x38c   :  { %5084 = vmatpush1.bf16.msra.mxu1 %v6301_v29 }
 0x38d   :  { %5086 = vmatprep.subr.bf16.mxu1 %v6304_v30  ;;  %v672_v30 = vld [vmem:[#allocation7 + $0x1f8] sm:$0xff] }
 0x390   :  { %5088 = vmatpush1.bf16.msra.mxu1 %v6311_v38  ;;  %v670_v38 = vld [vmem:[#allocation7 + $0x1e8] sm:$0xff] }
 0x391   :  { %5090 = vmatprep.subr.bf16.mxu1 %v6314_v41  ;;  %v665_v41 = vld [vmem:[#allocation7 + $0x1c0] sm:$0xff] }
 0x394   :  { %5092 = vmatpush1.bf16.msra.mxu1 %v6321_v48 }
 0x395   :  { %5094 = vmatprep.subr.bf16.mxu1 %v6324_v49  ;;  %v663_v49 = vld [vmem:[#allocation7 + $0x1b0] sm:$0xff] }
 0x398   :  { %5096 = vmatpush1.bf16.msra.mxu1 %v6331_v57  ;;  %v651_v57 = vld [vmem:[#allocation7 + $0x150] sm:$0xff] }
 0x399   :  { %5098 = vmatprep.subr.bf16.mxu1 %v6334_v60  ;;  %v6451_v60 = vpack.c.bf16 %v651_v57, %v649_v24  ;;  %v658_v57 = vld [vmem:[#allocation7 + $0x188] sm:$0xff] }
 0x39a   :  { %v6463_v24 = vpack.c.bf16 %v660_v63, %v658_v57  ;;  %v666_v57 = vld [vmem:[#allocation7 + $0x1c8] sm:$0xff]  ;;  %v668_v63 = vld [vmem:[#allocation7 + $0x1d8] sm:$0xff] }
 0x39b   :  { %7339 = vst [vmem:[#allocation51_spill] sm:$0xff] %v6451_v60  ;;  %5020 = vmatpush1.bf16.msra.mxu0 %v6451_v60 }
 0x39c   :  { %5100 = vmatpush1.bf16.msra.mxu1 %v6341_v5  ;;  %v655_v5 = vld [vmem:[#allocation7 + $0x170] sm:$0xff]  ;;  %5022 = vmatprep.subr.bf16.mxu0 %v6455_v50  ;;  %7342 = vst [vmem:[#allocation54_spill] sm:$0xff] %v6463_v24 }
 0x39d   :  { %5102 = vmatprep.subr.bf16.mxu1 %v6344_v6  ;;  %v6459_v62 = vpack.c.bf16 %v655_v5, %v653_v61  ;;  %v659_v6 = vld [vmem:[#allocation7 + $0x190] sm:$0xff]  ;;  %v661_v61 = vld [vmem:[#allocation7 + $0x1a0] sm:$0xff] }
 0x39e   :  { %v6471_v48 = vpack.c.bf16 %v663_v49, %v661_v61  ;;  %v671_v49 = vld [vmem:[#allocation7 + $0x1f0] sm:$0xff] }
 0x39f   :  { %7341 = vst [vmem:[#allocation53_spill] sm:$0xff] %v6459_v62  ;;  %5024 = vmatpush1.bf16.msra.mxu0 %v6459_v62 }
 0x3a0   :  { %5104 = vmatpush1.bf16.msra.mxu1 %v6352_v17  ;;  %v657_v17 = vld [vmem:[#allocation7 + $0x180] sm:$0xff]  ;;  %5026 = vmatprep.subr.bf16.mxu0 %v6463_v24  ;;  %7345 = vst [vmem:[#allocation57_spill] sm:$0xff] %v6471_v48 }
 0x3a1   :  { %5170 = vmatprep.subr.bf16.mxu1 %v6184_v9  ;;  %v6465_v35 = vpack.c.bf16 %v659_v6, %v657_v17  ;;  %v664_v9 = vld [vmem:[#allocation7 + $0x1b8] sm:$0xff]  ;;  %v6475_v6 = vpack.c.bf16 %v668_v63, %v666_v57  ;;  %v667_v17 = vld [vmem:[#allocation7 + $0x1d0] sm:$0xff] }
 0x3a2   :  { %v6469_v5 = vpack.c.bf16 %v664_v9, %v662_v36  ;;  %v6477_v29 = vpack.c.bf16 %v667_v17, %v665_v41  ;;  %v6479_v9 = vpack.c.bf16 %v672_v30, %v670_v38  ;;  %v669_v36 = vld [vmem:[#allocation7 + $0x1e0] sm:$0xff]  ;;  %v521_v38 = vld [vmem:[%s6001_s8] sm:$0x3]  ;;  %s7418_s8 = sld [smem:[#allocation19_spill]] }
 0x3a3   :  { %7343 = vst [vmem:[#allocation55_spill] sm:$0xff] %v6465_v35  ;;  %5028 = vmatpush1.bf16.msra.mxu0 %v6465_v35  ;;  %7346 = vst [vmem:[#allocation58_spill] sm:$0xff] %v6475_v6  ;;  %v6483_v61 = vpack.c.bf16 %v671_v49, %v669_v36  ;;  %v529_v17 = vrot.slane %v521_v38, %v6349_v16  ;;  %v533_v22 = vrot.slane %v521_v38, %v6190_v12 }
 0x3a4   :  { %7344 = vst [vmem:[#allocation56_spill] sm:$0xff] %v6469_v5  ;;  %5030 = vmatprep.subr.bf16.mxu0 %v6469_v5  ;;  %7347 = vst [vmem:[#allocation59_spill] sm:$0xff] %v6477_v29 }
 0x3a5   :  { %7348 = vst [vmem:[#allocation60_spill] sm:$0xff] %v6479_v9  ;;  %7349 = vst [vmem:[#allocation61_spill] sm:$0xff] %v6483_v61 }
 0x3a7   :  { %5032 = vmatpush1.bf16.msra.mxu0 %v6471_v48 }
 0x3a8   :  { %5034 = vmatprep.subr.bf16.mxu0 %v6475_v6 }
 0x3ab   :  { %5036 = vmatpush1.bf16.msra.mxu0 %v6477_v29 }
 0x3ac   :  { %5038 = vmatprep.subr.bf16.mxu0 %v6479_v9 }
 0x3af   :  { %5040 = vmatpush1.bf16.msra.mxu0 %v6483_v61 }
 0x3b0   :  { %5106 = vmatprep.subr.bf16.mxu0 %v6370_v28 }
 0x3e7   :  { %v6488_v57 = vpop.f32.mrb[2].mxu1 }
 0x3e8   :  { %7350 = vst [vmem:[#allocation62_spill] sm:$0xff] %v6488_v57  ;;  %v4658_v41 = vpop.f32.mrb[3].mxu1 }
 0x3f6   :  { %v604_v63 = vpop.f32.mrb[4].mxu1 }
 0x3f7   :  { %v606_v30 = vpop.f32.mrb[5].mxu1  ;;  %v6493_v21 = vadd.f32 %v604_v63, %v529_v17 }
 0x3f8   :  { %v6495_v36 = vadd.f32 %v606_v30, %v533_v22 }
 0x436   :  { %v752_v49 = vpop.f32.mrb[6].mxu1 }
 0x437   :  { %v753_v13 = vadd.f32 %v752_v49, %v6493_v21  ;;  %v754_v8 = vpop.f32.mrb[7].mxu1 }
 0x438   :  { %v755_v1 = vadd.f32 %v754_v8, %v6495_v36  ;;  %v5948_v8 = vmov 1966171168  }
 0x43a   :  { %5720 = vtanh.f32 %v755_v1  ;;  %v673_v1 = vld [vmem:[%s6011_s19] sm:$0x3]  ;;  %s7419_s19 = sld [smem:[#allocation20_spill]] }
 0x43b   :  { %5722 = vtanh.f32 %v753_v13  ;;  %v847_v13 = vunpack.c.l.s4 %v5948_v8  ;;  %v6533_v22 = vrot.slane %v673_v1, %v6349_v16 }
 0x43d   :  { %v848_v63 = vunpack.c.0.s8 %v847_v13 }
 0x444   :  { %v5721_v41 = vpop.eup %5720 }
 0x445   :  { %v5723_v57 = vpop.eup %5722  ;;  %834 = vmatprep.mubr.f32.mxu0 %v5721_v41 }
 0x446   :  { %835 = vmatmul.mubr.f32.vlgmr.msra.gmra.mrb[2].mxu0 %v5723_v57  ;;  %v6536_v57 = vrot.slane %v673_v1, %v6190_v12 }
 0x447   :  { %5108 = vmatpush1.bf16.msra.mxu0 %v6373_v37 }
 0x448   :  { %5110 = vmatprep.subr.bf16.mxu0 %v6375_v42 }
 0x44b   :  { %5112 = vmatpush1.bf16.msra.mxu0 %v6379_v54 }
 0x44c   :  { %5114 = vmatprep.subr.bf16.mxu0 %v6383_v55 }
 0x44f   :  { %5116 = vmatpush1.bf16.msra.mxu0 %v6387_v4 }
 0x450   :  { %5118 = vmatprep.subr.bf16.mxu0 %v6391_v7 }
 0x453   :  { %5120 = vmatpush1.bf16.msra.mxu0 %v6395_v25 }
 0x454   :  { %5122 = vmatprep.subr.bf16.mxu0 %v6399_v31 }
 0x457   :  { %5124 = vmatpush1.bf16.msra.mxu0 %v6403_v47 }
 0x458   :  { %5126 = vmatprep.subr.bf16.mxu0 %v6407_v51 }
 0x45b   :  { %5128 = vmatpush1.bf16.msra.mxu0 %v6411_v14 }
 0x45c   :  { %5130 = vmatprep.subr.bf16.mxu0 %v6415_v19 }
 0x45f   :  { %5132 = vmatpush1.bf16.msra.mxu0 %v6419_v43 }
 0x460   :  { %5134 = vmatprep.subr.bf16.mxu0 %v6423_v44 }
 0x463   :  { %5136 = vmatpush1.bf16.msra.mxu0 %v6427_v2 }
 0x464   :  { %5138 = vmatprep.subr.bf16.mxu0 %v6431_v23 }
 0x467   :  { %5140 = vmatpush1.bf16.msra.mxu0 %v6435_v3 }
 0x468   :  { %5142 = vmatprep.subr.bf16.mxu0 %v6439_v56 }
 0x46b   :  { %5144 = vmatpush1.bf16.msra.mxu0 %v6443_v32 }
 0x46c   :  { %5146 = vmatprep.subr.bf16.mxu0 %v6447_v10 }
 0x46f   :  { %5148 = vmatpush1.bf16.msra.mxu0 %v6451_v60 }
 0x470   :  { %5150 = vmatprep.subr.bf16.mxu0 %v6455_v50 }
 0x473   :  { %5152 = vmatpush1.bf16.msra.mxu0 %v6459_v62 }
 0x474   :  { %5154 = vmatprep.subr.bf16.mxu0 %v6463_v24 }
 0x477   :  { %5156 = vmatpush1.bf16.msra.mxu0 %v6465_v35 }
 0x478   :  { %5158 = vmatprep.subr.bf16.mxu0 %v6469_v5 }
 0x47b   :  { %5160 = vmatpush1.bf16.msra.mxu0 %v6471_v48 }
 0x47c   :  { %5162 = vmatprep.subr.bf16.mxu0 %v6475_v6 }
 0x47f   :  { %5164 = vmatpush1.bf16.msra.mxu0 %v6477_v29 }
 0x480   :  { %5166 = vmatprep.subr.bf16.mxu0 %v6479_v9 }
 0x483   :  { %5168 = vmatpush1.bf16.msra.mxu0 %v6483_v61  ;;  %v6541_v61 = vsub.s32 %v848_v63, %v6186_v11  ;;  %v7355_v63 = vld [vmem:[#allocation34_spill] sm:$0xff] }
 0x484   :  { %5234 = vmatprep.subr.bf16.mxu0 %v6370_v28  ;;  %v7363_v11 = vld [vmem:[#allocation42_spill] sm:$0xff] }
 0x519   :  { %v836_v30 = vpop.f32.mrb[2].mxu0 }
 0x51a   :  { %v837_v38 = vadd.f32 %v836_v30, %v6533_v22  ;;  %v838_v17 = vpop.f32.mrb[3].mxu0 }
 0x51b   :  { %v839_v49 = vadd.f32 %v838_v17, %v6536_v57  ;;  %v7357_v17 = vld [vmem:[#allocation36_spill] sm:$0xff] }
 0x51c   :  { %v841_v41 = vmul.f32 0.2, %v837_v38  ;;  %v7356_v38 = vld [vmem:[#allocation35_spill] sm:$0xff] }
 0x51d   :  { %v842_v28 = vmul.f32 0.2, %v839_v49  ;;  %v7358_v49 = vld [vmem:[#allocation37_spill] sm:$0xff] }
 0x51f   :  { %v845_v9 = vcombine.low %v841_v41, %v842_v28  ;;  %v7353_v28 = vld [vmem:[#allocation32_spill] sm:$0xff]  ;;  %v7359_v41 = vld [vmem:[#allocation38_spill] sm:$0xff] }
 0x521   :  { %v852_v8 = vrot.slane %v845_v9, %v6541_v61  ;;  %v7354_v9 = vld [vmem:[#allocation33_spill] sm:$0xff] }
 0x523   :  { %v859_v29 = vrot.slane %v852_v8, %v6541_v61  ;;  %v7360_v8 = vld [vmem:[#allocation39_spill] sm:$0xff] }
 0x525   :  { %v6546_v1 = vsub.f32 %v6195_v15, %v859_v29  ;;  %v7351_v15 = vld [vmem:[#allocation30_spill] sm:$0xff]  ;;  %v7352_v29 = vld [vmem:[#allocation31_spill] sm:$0xff] }
 0x527   :  { %v870_v13 = vrot.slane %v6546_v1, %v6190_v12  ;;  %v866_v30 = vrot.slane %v6546_v1, %v6349_v16 }
 0x529   :  { %937 = vmatprep.mubr.f32.mxu1 %v870_v13  ;;  %v7361_v13 = vld [vmem:[#allocation40_spill] sm:$0xff] }
 0x52a   :  { %938 = vmatmul.mubr.f32.vlgmr.msra.gmra.mrb[8].mxu1 %v866_v30  ;;  %v7362_v30 = vld [vmem:[#allocation41_spill] sm:$0xff] }
 0x52b   :  { %5172 = vmatpush1.bf16.msra.mxu1 %v6199_v18 }
 0x52c   :  { %5174 = vmatprep.subr.bf16.mxu1 %v6203_v20 }
 0x52f   :  { %5176 = vmatpush1.bf16.msra.mxu1 %v6211_v26 }
 0x530   :  { %5178 = vmatprep.subr.bf16.mxu1 %v6214_v27 }
 0x533   :  { %5180 = vmatpush1.bf16.msra.mxu1 %v6221_v33 }
 0x534   :  { %5182 = vmatprep.subr.bf16.mxu1 %v6224_v34 }
 0x537   :  { %5184 = vmatpush1.bf16.msra.mxu1 %v6231_v39 }
 0x538   :  { %5186 = vmatprep.subr.bf16.mxu1 %v6234_v40 }
 0x53b   :  { %5188 = vmatpush1.bf16.msra.mxu1 %v6241_v45 }
 0x53c   :  { %5190 = vmatprep.subr.bf16.mxu1 %v6244_v46 }
 0x53f   :  { %5192 = vmatpush1.bf16.msra.mxu1 %v6251_v52 }
 0x540   :  { %5194 = vmatprep.subr.bf16.mxu1 %v6254_v53 }
 0x543   :  { %5196 = vmatpush1.bf16.msra.mxu1 %v6261_v58 }
 0x544   :  { %5198 = vmatprep.subr.bf16.mxu1 %v6264_v59 }
 0x547   :  { %5200 = vmatpush1.bf16.msra.mxu1 %v6271_v0 }
 0x548   :  { %5202 = vmatprep.subr.bf16.mxu1 %v7351_v15 }
 0x54b   :  { %5204 = vmatpush1.bf16.msra.mxu1 %v7352_v29 }
 0x54c   :  { %5206 = vmatprep.subr.bf16.mxu1 %v7353_v28  ;;  %v7364_v28 = vld [vmem:[#allocation43_spill] sm:$0xff] }
 0x54f   :  { %5208 = vmatpush1.bf16.msra.mxu1 %v7354_v9  ;;  %v7365_v9 = vld [vmem:[#allocation44_spill] sm:$0xff] }
 0x550   :  { %5210 = vmatprep.subr.bf16.mxu1 %v7355_v63  ;;  %v7366_v63 = vld [vmem:[#allocation45_spill] sm:$0xff] }
 0x553   :  { %5212 = vmatpush1.bf16.msra.mxu1 %v7356_v38  ;;  %v7367_v38 = vld [vmem:[#allocation28_spill] sm:$0xff] }
 0x554   :  { %5214 = vmatprep.subr.bf16.mxu1 %v7357_v17 }
 0x557   :  { %5216 = vmatpush1.bf16.msra.mxu1 %v7358_v49 }
 0x558   :  { %5218 = vmatprep.subr.bf16.mxu1 %v7359_v41 }
 0x55b   :  { %5220 = vmatpush1.bf16.msra.mxu1 %v7360_v8 }
 0x55c   :  { %5222 = vmatprep.subr.bf16.mxu1 %v7361_v13 }
 0x55f   :  { %5224 = vmatpush1.bf16.msra.mxu1 %v7362_v30 }
 0x560   :  { %5226 = vmatprep.subr.bf16.mxu1 %v7363_v11 }
 0x563   :  { %5228 = vmatpush1.bf16.msra.mxu1 %v7364_v28 }
 0x564   :  { %5230 = vmatprep.subr.bf16.mxu1 %v7365_v9 }
 0x567   :  { %5232 = vmatpush1.bf16.msra.mxu1 %v7366_v63 }
 0x568   :  { %5298 = vmatprep.subr.bf16.mxu1 %v7367_v38 }
 0x5fd   :  { %v939_v17 = vpop.f32.mrb[8].mxu1 }
 0x5fe   :  { %v940_v49 = vadd.f32 %v939_v17, %v6493_v21  ;;  %v941_v41 = vpop.f32.mrb[9].mxu1  ;;  %v7368_v17 = vld [vmem:[#allocation59_spill] sm:$0xff] }
 0x5ff   :  { %v942_v8 = vadd.f32 %v941_v41, %v6495_v36  ;;  %v7370_v41 = vld [vmem:[#allocation61_spill] sm:$0xff] }
 0x601   :  { %5724 = vtanh.f32 %v942_v8  ;;  %v7371_v8 = vld [vmem:[#allocation46_spill] sm:$0xff] }
 0x602   :  { %5726 = vtanh.f32 %v940_v49  ;;  %v7369_v49 = vld [vmem:[#allocation60_spill] sm:$0xff] }
 0x60b   :  { %v5725_v13 = vpop.eup %5724 }
 0x60c   :  { %v5727_v30 = vpop.eup %5726  ;;  %1010 = vmatprep.mubr.f32.mxu0 %v5725_v13 }
 0x60d   :  { %1011 = vmatmul.mubr.f32.vlgmr.msra.gmra.mrb[4].mxu0 %v5727_v30 }
 0x60e   :  { %5236 = vmatpush1.bf16.msra.mxu0 %v6373_v37 }
 0x60f   :  { %5238 = vmatprep.subr.bf16.mxu0 %v6375_v42 }
 0x612   :  { %5240 = vmatpush1.bf16.msra.mxu0 %v6379_v54 }
 0x613   :  { %5242 = vmatprep.subr.bf16.mxu0 %v6383_v55 }
 0x616   :  { %5244 = vmatpush1.bf16.msra.mxu0 %v6387_v4 }
 0x617   :  { %5246 = vmatprep.subr.bf16.mxu0 %v6391_v7 }
 0x61a   :  { %5248 = vmatpush1.bf16.msra.mxu0 %v6395_v25 }
 0x61b   :  { %5250 = vmatprep.subr.bf16.mxu0 %v6399_v31 }
 0x61e   :  { %5252 = vmatpush1.bf16.msra.mxu0 %v6403_v47 }
 0x61f   :  { %5254 = vmatprep.subr.bf16.mxu0 %v6407_v51 }
 0x622   :  { %5256 = vmatpush1.bf16.msra.mxu0 %v6411_v14 }
 0x623   :  { %5258 = vmatprep.subr.bf16.mxu0 %v6415_v19 }
 0x626   :  { %5260 = vmatpush1.bf16.msra.mxu0 %v6419_v43 }
 0x627   :  { %5262 = vmatprep.subr.bf16.mxu0 %v6423_v44 }
 0x62a   :  { %5264 = vmatpush1.bf16.msra.mxu0 %v6427_v2 }
 0x62b   :  { %5266 = vmatprep.subr.bf16.mxu0 %v6431_v23 }
 0x62e   :  { %5268 = vmatpush1.bf16.msra.mxu0 %v6435_v3 }
 0x62f   :  { %5270 = vmatprep.subr.bf16.mxu0 %v6439_v56 }
 0x632   :  { %5272 = vmatpush1.bf16.msra.mxu0 %v6443_v32 }
 0x633   :  { %5274 = vmatprep.subr.bf16.mxu0 %v6447_v10 }
 0x636   :  { %5276 = vmatpush1.bf16.msra.mxu0 %v6451_v60 }
 0x637   :  { %5278 = vmatprep.subr.bf16.mxu0 %v6455_v50 }
 0x63a   :  { %5280 = vmatpush1.bf16.msra.mxu0 %v6459_v62 }
 0x63b   :  { %5282 = vmatprep.subr.bf16.mxu0 %v6463_v24 }
 0x63e   :  { %5284 = vmatpush1.bf16.msra.mxu0 %v6465_v35 }
 0x63f   :  { %5286 = vmatprep.subr.bf16.mxu0 %v6469_v5 }
 0x642   :  { %5288 = vmatpush1.bf16.msra.mxu0 %v6471_v48 }
 0x643   :  { %5290 = vmatprep.subr.bf16.mxu0 %v6475_v6 }
 0x646   :  { %5292 = vmatpush1.bf16.msra.mxu0 %v7368_v17 }
 0x647   :  { %5294 = vmatprep.subr.bf16.mxu0 %v7369_v49 }
 0x64a   :  { %5296 = vmatpush1.bf16.msra.mxu0 %v7370_v41 }
 0x64b   :  { %5362 = vmatprep.subr.bf16.mxu0 %v7371_v8 }
 0x6e0   :  { %v1012_v13 = vpop.f32.mrb[4].mxu0 }
 0x6e1   :  { %v1013_v30 = vadd.f32 %v1012_v13, %v6533_v22  ;;  %v1014_v24 = vpop.f32.mrb[5].mxu0 }
 0x6e2   :  { %v1015_v35 = vadd.f32 %v1014_v24, %v6536_v57  ;;  %v7375_v24 = vld [vmem:[#allocation35_spill] sm:$0xff] }
 0x6e3   :  { %v1017_v62 = vmul.f32 0.2, %v1013_v30 }
 0x6e4   :  { %v1018_v5 = vmul.f32 0.2, %v1015_v35  ;;  %v7376_v35 = vld [vmem:[#allocation36_spill] sm:$0xff] }
 0x6e6   :  { %v1021_v50 = vcombine.low %v1017_v62, %v1018_v5  ;;  %v7374_v62 = vld [vmem:[#allocation34_spill] sm:$0xff]  ;;  %v7377_v5 = vld [vmem:[#allocation37_spill] sm:$0xff] }
 0x6e8   :  { %v1028_v48 = vrot.slane %v1021_v50, %v6541_v61  ;;  %v7373_v50 = vld [vmem:[#allocation33_spill] sm:$0xff] }
 0x6ea   :  { %v1035_v6 = vrot.slane %v1028_v48, %v6541_v61  ;;  %v7372_v48 = vld [vmem:[#allocation32_spill] sm:$0xff] }
 0x6ec   :  { %v6623_v17 = vsub.f32 %v6546_v1, %v1035_v6  ;;  %v7378_v6 = vld [vmem:[#allocation38_spill] sm:$0xff]  ;;  %v7379_v1 = vld [vmem:[#allocation39_spill] sm:$0xff] }
 0x6ee   :  { %v1046_v41 = vrot.slane %v6623_v17, %v6190_v12  ;;  %v1042_v8 = vrot.slane %v6623_v17, %v6349_v16 }
 0x6f0   :  { %1113 = vmatprep.mubr.f32.mxu1 %v1046_v41  ;;  %v7380_v41 = vld [vmem:[#allocation40_spill] sm:$0xff] }
 0x6f1   :  { %1114 = vmatmul.mubr.f32.vlgmr.msra.gmra.mrb[10].mxu1 %v1042_v8  ;;  %v7381_v8 = vld [vmem:[#allocation41_spill] sm:$0xff] }
 0x6f2   :  { %5300 = vmatpush1.bf16.msra.mxu1 %v6199_v18 }
 0x6f3   :  { %5302 = vmatprep.subr.bf16.mxu1 %v6203_v20 }
 0x6f6   :  { %5304 = vmatpush1.bf16.msra.mxu1 %v6211_v26 }
 0x6f7   :  { %5306 = vmatprep.subr.bf16.mxu1 %v6214_v27 }
 0x6fa   :  { %5308 = vmatpush1.bf16.msra.mxu1 %v6221_v33 }
 0x6fb   :  { %5310 = vmatprep.subr.bf16.mxu1 %v6224_v34 }
 0x6fe   :  { %5312 = vmatpush1.bf16.msra.mxu1 %v6231_v39 }
 0x6ff   :  { %5314 = vmatprep.subr.bf16.mxu1 %v6234_v40 }
 0x702   :  { %5316 = vmatpush1.bf16.msra.mxu1 %v6241_v45 }
 0x703   :  { %5318 = vmatprep.subr.bf16.mxu1 %v6244_v46 }
 0x706   :  { %5320 = vmatpush1.bf16.msra.mxu1 %v6251_v52 }
 0x707   :  { %5322 = vmatprep.subr.bf16.mxu1 %v6254_v53 }
 0x70a   :  { %5324 = vmatpush1.bf16.msra.mxu1 %v6261_v58 }
 0x70b   :  { %5326 = vmatprep.subr.bf16.mxu1 %v6264_v59 }
 0x70e   :  { %5328 = vmatpush1.bf16.msra.mxu1 %v6271_v0 }
 0x70f   :  { %5330 = vmatprep.subr.bf16.mxu1 %v7351_v15 }
 0x712   :  { %5332 = vmatpush1.bf16.msra.mxu1 %v7352_v29 }
 0x713   :  { %5334 = vmatprep.subr.bf16.mxu1 %v7372_v48 }
 0x716   :  { %5336 = vmatpush1.bf16.msra.mxu1 %v7373_v50 }
 0x717   :  { %5338 = vmatprep.subr.bf16.mxu1 %v7374_v62 }
 0x71a   :  { %5340 = vmatpush1.bf16.msra.mxu1 %v7375_v24 }
 0x71b   :  { %5342 = vmatprep.subr.bf16.mxu1 %v7376_v35 }
 0x71e   :  { %5344 = vmatpush1.bf16.msra.mxu1 %v7377_v5 }
 0x71f   :  { %5346 = vmatprep.subr.bf16.mxu1 %v7378_v6 }
 0x722   :  { %5348 = vmatpush1.bf16.msra.mxu1 %v7379_v1 }
 0x723   :  { %5350 = vmatprep.subr.bf16.mxu1 %v7380_v41 }
 0x726   :  { %5352 = vmatpush1.bf16.msra.mxu1 %v7381_v8 }
 0x727   :  { %5354 = vmatprep.subr.bf16.mxu1 %v7363_v11 }
 0x72a   :  { %5356 = vmatpush1.bf16.msra.mxu1 %v7364_v28 }
 0x72b   :  { %5358 = vmatprep.subr.bf16.mxu1 %v7365_v9 }
 0x72e   :  { %5360 = vmatpush1.bf16.msra.mxu1 %v7366_v63 }
 0x72f   :  { %5426 = vmatprep.subr.bf16.mxu1 %v7367_v38  ;;  %v7382_v38 = vld [vmem:[#allocation52_spill] sm:$0xff] }
 0x7c4   :  { %v1115_v13 = vpop.f32.mrb[10].mxu1 }
 0x7c5   :  { %v1116_v30 = vadd.f32 %v1115_v13, %v6493_v21  ;;  %v1117_v6 = vpop.f32.mrb[11].mxu1  ;;  %v7387_v13 = vld [vmem:[#allocation57_spill] sm:$0xff] }
 0x7c6   :  { %v1118_v1 = vadd.f32 %v1117_v6, %v6495_v36  ;;  %v7383_v6 = vld [vmem:[#allocation53_spill] sm:$0xff] }
 0x7c8   :  { %5728 = vtanh.f32 %v1118_v1  ;;  %v7384_v1 = vld [vmem:[#allocation54_spill] sm:$0xff] }
 0x7c9   :  { %5730 = vtanh.f32 %v1116_v30  ;;  %v7388_v30 = vld [vmem:[#allocation58_spill] sm:$0xff] }
 0x7d2   :  { %v5729_v41 = vpop.eup %5728 }
 0x7d3   :  { %v5731_v8 = vpop.eup %5730  ;;  %1186 = vmatprep.mubr.f32.mxu0 %v5729_v41  ;;  %v7385_v41 = vld [vmem:[#allocation55_spill] sm:$0xff] }
 0x7d4   :  { %1187 = vmatmul.mubr.f32.vlgmr.msra.gmra.mrb[6].mxu0 %v5731_v8  ;;  %v7386_v8 = vld [vmem:[#allocation56_spill] sm:$0xff] }
 0x7d5   :  { %5364 = vmatpush1.bf16.msra.mxu0 %v6373_v37 }
 0x7d6   :  { %5366 = vmatprep.subr.bf16.mxu0 %v6375_v42 }
 0x7d9   :  { %5368 = vmatpush1.bf16.msra.mxu0 %v6379_v54 }
 0x7da   :  { %5370 = vmatprep.subr.bf16.mxu0 %v6383_v55 }
 0x7dd   :  { %5372 = vmatpush1.bf16.msra.mxu0 %v6387_v4 }
 0x7de   :  { %5374 = vmatprep.subr.bf16.mxu0 %v6391_v7 }
 0x7e1   :  { %5376 = vmatpush1.bf16.msra.mxu0 %v6395_v25 }
 0x7e2   :  { %5378 = vmatprep.subr.bf16.mxu0 %v6399_v31 }
 0x7e5   :  { %5380 = vmatpush1.bf16.msra.mxu0 %v6403_v47 }
 0x7e6   :  { %5382 = vmatprep.subr.bf16.mxu0 %v6407_v51 }
 0x7e9   :  { %5384 = vmatpush1.bf16.msra.mxu0 %v6411_v14 }
 0x7ea   :  { %5386 = vmatprep.subr.bf16.mxu0 %v6415_v19 }
 0x7ed   :  { %5388 = vmatpush1.bf16.msra.mxu0 %v6419_v43 }
 0x7ee   :  { %5390 = vmatprep.subr.bf16.mxu0 %v6423_v44 }
 0x7f1   :  { %5392 = vmatpush1.bf16.msra.mxu0 %v6427_v2 }
 0x7f2   :  { %5394 = vmatprep.subr.bf16.mxu0 %v6431_v23 }
 0x7f5   :  { %5396 = vmatpush1.bf16.msra.mxu0 %v6435_v3 }
 0x7f6   :  { %5398 = vmatprep.subr.bf16.mxu0 %v6439_v56  ;;  %v7389_v56 = vld [vmem:[#allocation59_spill] sm:$0xff] }
 0x7f9   :  { %5400 = vmatpush1.bf16.msra.mxu0 %v6443_v32 }
 0x7fa   :  { %5402 = vmatprep.subr.bf16.mxu0 %v6447_v10  ;;  %v7390_v10 = vld [vmem:[#allocation61_spill] sm:$0xff] }
 0x7fd   :  { %5404 = vmatpush1.bf16.msra.mxu0 %v6451_v60  ;;  %v7391_v60 = vld [vmem:[#allocation46_spill] sm:$0xff] }
 0x7fe   :  { %5406 = vmatprep.subr.bf16.mxu0 %v7382_v38 }
 0x801   :  { %5408 = vmatpush1.bf16.msra.mxu0 %v7383_v6 }
 0x802   :  { %5410 = vmatprep.subr.bf16.mxu0 %v7384_v1 }
 0x805   :  { %5412 = vmatpush1.bf16.msra.mxu0 %v7385_v41 }
 0x806   :  { %5414 = vmatprep.subr.bf16.mxu0 %v7386_v8 }
 0x809   :  { %5416 = vmatpush1.bf16.msra.mxu0 %v7387_v13 }
 0x80a   :  { %5418 = vmatprep.subr.bf16.mxu0 %v7388_v30 }
 0x80d   :  { %5420 = vmatpush1.bf16.msra.mxu0 %v7389_v56 }
 0x80e   :  { %5422 = vmatprep.subr.bf16.mxu0 %v7369_v49 }
 0x811   :  { %5424 = vmatpush1.bf16.msra.mxu0 %v7390_v10 }
 0x812   :  { %5490 = vmatprep.subr.bf16.mxu0 %v7391_v60 }
 0x8a7   :  { %v1188_v38 = vpop.f32.mrb[6].mxu0 }
 0x8a8   :  { %v1189_v6 = vadd.f32 %v1188_v38, %v6533_v22  ;;  %v1190_v1 = vpop.f32.mrb[7].mxu0 }
 0x8a9   :  { %v1191_v41 = vadd.f32 %v1190_v1, %v6536_v57 }
 0x8aa   :  { %v1193_v32 = vmul.f32 0.2, %v1189_v6 }
 0x8ab   :  { %v1194_v8 = vmul.f32 0.2, %v1191_v41 }
 0x8ad   :  { %v1197_v3 = vcombine.low %v1193_v32, %v1194_v8  ;;  %v7393_v32 = vld [vmem:[#allocation39_spill] sm:$0xff] }
 0x8af   :  { %v1204_v13 = vrot.slane %v1197_v3, %v6541_v61  ;;  %v7392_v3 = vld [vmem:[#allocation38_spill] sm:$0xff] }
 0x8b1   :  { %v1211_v30 = vrot.slane %v1204_v13, %v6541_v61  ;;  %v1566_v13 = vld [vmem:[%s6016_s24] sm:$0xff] }
 0x8b3   :  { %v6700_v56 = vsub.f32 %v6623_v17, %v1211_v30  ;;  %v1572_v17 = vld [vmem:[%s6016_s24 + $0x30] sm:$0xff]  ;;  %v1567_v30 = vld [vmem:[%s6016_s24 + $0x8] sm:$0xff] }
 0x8b5   :  { %v1222_v10 = vrot.slane %v6700_v56, %v6190_v12  ;;  %v1218_v60 = vrot.slane %v6700_v56, %v6349_v16 }
 0x8b7   :  { %1289 = vmatprep.mubr.f32.mxu1 %v1222_v10 }
 0x8b8   :  { %1290 = vmatmul.mubr.f32.vlgmr.msra.gmra.mrb[12].mxu1 %v1218_v60  ;;  %v5578_v60 = vpack.c.bf16 %v1567_v30, %v1566_v13 }
 0x8b9   :  { %5428 = vmatpush1.bf16.msra.mxu1 %v6199_v18  ;;  %v7394_v18 = vld [vmem:[#allocation40_spill] sm:$0xff] }
 0x8ba   :  { %5430 = vmatprep.subr.bf16.mxu1 %v6203_v20  ;;  %v7395_v20 = vld [vmem:[#allocation41_spill] sm:$0xff] }
 0x8bd   :  { %5432 = vmatpush1.bf16.msra.mxu1 %v6211_v26  ;;  %v7396_v26 = vmov 0.0|0.0  }
 0x8be   :  { %5434 = vmatprep.subr.bf16.mxu1 %v6214_v27 }
 0x8c1   :  { %5436 = vmatpush1.bf16.msra.mxu1 %v6221_v33 }
 0x8c2   :  { %5438 = vmatprep.subr.bf16.mxu1 %v6224_v34 }
 0x8c5   :  { %5440 = vmatpush1.bf16.msra.mxu1 %v6231_v39 }
 0x8c6   :  { %5442 = vmatprep.subr.bf16.mxu1 %v6234_v40 }
 0x8c9   :  { %5444 = vmatpush1.bf16.msra.mxu1 %v6241_v45 }
 0x8ca   :  { %5446 = vmatprep.subr.bf16.mxu1 %v6244_v46  ;;  %v7398_v46 = vld [vmem:[#allocation48_spill] sm:$0xff] }
 0x8cd   :  { %5448 = vmatpush1.bf16.msra.mxu1 %v6251_v52  ;;  %v7399_v52 = vld [vmem:[#allocation49_spill] sm:$0xff] }
 0x8ce   :  { %5450 = vmatprep.subr.bf16.mxu1 %v6254_v53  ;;  %v7400_v53 = vld [vmem:[#allocation50_spill] sm:$0xff] }
 0x8d1   :  { %5452 = vmatpush1.bf16.msra.mxu1 %v6261_v58  ;;  %v7401_v58 = vld [vmem:[#allocation51_spill] sm:$0xff] }
 0x8d2   :  { %5454 = vmatprep.subr.bf16.mxu1 %v6264_v59  ;;  %v7402_v59 = vld [vmem:[#allocation52_spill] sm:$0xff] }
 0x8d5   :  { %5456 = vmatpush1.bf16.msra.mxu1 %v6271_v0  ;;  %v7403_v0 = vld [vmem:[#allocation53_spill] sm:$0xff] }
 0x8d6   :  { %5458 = vmatprep.subr.bf16.mxu1 %v7351_v15 }
 0x8d9   :  { %5460 = vmatpush1.bf16.msra.mxu1 %v7352_v29 }
 0x8da   :  { %5462 = vmatprep.subr.bf16.mxu1 %v7372_v48  ;;  %v1573_v48 = vld [vmem:[%s6016_s24 + $0x38] sm:$0xff] }
 0x8dd   :  { %5464 = vmatpush1.bf16.msra.mxu1 %v7373_v50  ;;  %v1574_v50 = vld [vmem:[%s6016_s24 + $0x40] sm:$0xff] }
 0x8de   :  { %5466 = vmatprep.subr.bf16.mxu1 %v7374_v62  ;;  %v1575_v62 = vld [vmem:[%s6016_s24 + $0x48] sm:$0xff] }
 0x8e1   :  { %5468 = vmatpush1.bf16.msra.mxu1 %v7375_v24  ;;  %v5560_v24 = vpack.c.bf16 %v1575_v62, %v1574_v50  ;;  %v4435_v50 = vld [vmem:[%s7415_s17] ss:$0 sm:$0xff] }
 0x8e2   :  { %5470 = vmatprep.subr.bf16.mxu1 %v7376_v35  ;;  %v1576_v35 = vld [vmem:[%s6016_s24 + $0x50] sm:$0xff] }
 0x8e5   :  { %5472 = vmatpush1.bf16.msra.mxu1 %v7377_v5  ;;  %v1577_v5 = vld [vmem:[%s6016_s24 + $0x58] sm:$0xff] }
 0x8e6   :  { %5474 = vmatprep.subr.bf16.mxu1 %v7392_v3  ;;  %v5563_v38 = vpack.c.bf16 %v1577_v5, %v1576_v35 }
 0x8e9   :  { %5476 = vmatpush1.bf16.msra.mxu1 %v7393_v32  ;;  %v1568_v32 = vld [vmem:[%s6016_s24 + $0x10] sm:$0xff] }
 0x8ea   :  { %5478 = vmatprep.subr.bf16.mxu1 %v7394_v18  ;;  %v1569_v18 = vld [vmem:[%s6016_s24 + $0x18] sm:$0xff] }
 0x8ed   :  { %5480 = vmatpush1.bf16.msra.mxu1 %v7395_v20 }
 0x8ee   :  { %5482 = vmatprep.subr.bf16.mxu1 %v7363_v11  ;;  %v7397_v11 = vld [vmem:[#allocation47_spill] sm:$0xff] }
 0x8f1   :  { %5484 = vmatpush1.bf16.msra.mxu1 %v7364_v28  ;;  %v7411_v28 = vmov 0.0  }
 0x8f2   :  { %5486 = vmatprep.subr.bf16.mxu1 %v7365_v9  ;;  %v1570_v9 = vld [vmem:[%s6016_s24 + $0x20] sm:$0xff] }
 0x8f5   :  { %5488 = vmatpush1.bf16.msra.mxu1 %v7366_v63  ;;  %v1571_v63 = vld [vmem:[%s6016_s24 + $0x28] sm:$0xff] }
 0x8f6   :  { %5553 = vmatprep.subr.bf16.mxu1 %v7396_v26 }
 0x98b   :  { %v1291_v27 = vpop.f32.mrb[12].mxu1 }
 0x98c   :  { %v1292_v33 = vadd.f32 %v1291_v27, %v6493_v21  ;;  %v1293_v34 = vpop.f32.mrb[13].mxu1  ;;  %v7412_v27 = vld [vmem:[#allocation62_spill] sm:$0xff] }
 0x98d   :  { %v1294_v39 = vadd.f32 %v1293_v34, %v6495_v36  ;;  %v1578_v34 = vld [vmem:[%s6016_s24 + $0x60] sm:$0xff] }
 0x98f   :  { %5732 = vtanh.f32 %v1294_v39  ;;  %v1579_v39 = vld [vmem:[%s6016_s24 + $0x68] sm:$0xff] }
 0x990   :  { %5734 = vtanh.f32 %v1292_v33 }
 0x999   :  { %v5733_v40 = vpop.eup %5732 }
 0x99a   :  { %v5735_v45 = vpop.eup %5734  ;;  %1362 = vmatprep.mubr.f32.mxu0 %v5733_v40  ;;  %v5566_v40 = vpack.c.bf16 %v1579_v39, %v1578_v34 }
 0x99b   :  { %1363 = vmatmul.mubr.f32.vlgmr.msra.gmra.mrb[8].mxu0 %v5735_v45  ;;  %v1580_v45 = vld [vmem:[%s6016_s24 + $0x70] sm:$0xff] }
 0x99c   :  { %5492 = vmatpush1.bf16.msra.mxu0 %v6373_v37  ;;  %v7404_v37 = vld [vmem:[#allocation54_spill] sm:$0xff] }
 0x99d   :  { %5494 = vmatprep.subr.bf16.mxu0 %v6375_v42  ;;  %v7405_v42 = vld [vmem:[#allocation55_spill] sm:$0xff] }
 0x9a0   :  { %5496 = vmatpush1.bf16.msra.mxu0 %v6379_v54  ;;  %v7407_v54 = vld [vmem:[#allocation57_spill] sm:$0xff] }
 0x9a1   :  { %5498 = vmatprep.subr.bf16.mxu0 %v6383_v55  ;;  %v7408_v55 = vld [vmem:[#allocation58_spill] sm:$0xff] }
 0x9a4   :  { %5500 = vmatpush1.bf16.msra.mxu0 %v6387_v4  ;;  %v7409_v4 = vld [vmem:[#allocation59_spill] sm:$0xff] }
 0x9a5   :  { %5502 = vmatprep.subr.bf16.mxu0 %v6391_v7  ;;  %v7410_v7 = vld [vmem:[#allocation61_spill] sm:$0xff] }
 0x9a8   :  { %5504 = vmatpush1.bf16.msra.mxu0 %v6395_v25 }
 0x9a9   :  { %5506 = vmatprep.subr.bf16.mxu0 %v6399_v31 }
 0x9ac   :  { %5508 = vmatpush1.bf16.msra.mxu0 %v6403_v47 }
 0x9ad   :  { %5510 = vmatprep.subr.bf16.mxu0 %v6407_v51 }
 0x9b0   :  { %5512 = vmatpush1.bf16.msra.mxu0 %v6411_v14 }
 0x9b1   :  { %5514 = vmatprep.subr.bf16.mxu0 %v6415_v19 }
 0x9b4   :  { %5516 = vmatpush1.bf16.msra.mxu0 %v6419_v43 }
 0x9b5   :  { %5518 = vmatprep.subr.bf16.mxu0 %v6423_v44 }
 0x9b8   :  { %5520 = vmatpush1.bf16.msra.mxu0 %v6427_v2  ;;  %v7406_v2 = vld [vmem:[#allocation56_spill] sm:$0xff] }
 0x9b9   :  { %5522 = vmatprep.subr.bf16.mxu0 %v6431_v23 }
 0x9bc   :  { %5524 = vmatpush1.bf16.msra.mxu0 %v7397_v11  ;;  %v1581_v11 = vld [vmem:[%s6016_s24 + $0x78] sm:$0xff] }
 0x9bd   :  { %5526 = vmatprep.subr.bf16.mxu0 %v7398_v46  ;;  %v5569_v46 = vpack.c.bf16 %v1581_v11, %v1580_v45 }
 0x9c0   :  { %5528 = vmatpush1.bf16.msra.mxu0 %v7399_v52  ;;  %v1582_v52 = vld [vmem:[%s6016_s24 + $0x80] sm:$0xff] }
 0x9c1   :  { %5530 = vmatprep.subr.bf16.mxu0 %v7400_v53  ;;  %v1583_v53 = vld [vmem:[%s6016_s24 + $0x88] sm:$0xff] }
 0x9c4   :  { %5532 = vmatpush1.bf16.msra.mxu0 %v7401_v58  ;;  %v5572_v58 = vpack.c.bf16 %v1583_v53, %v1582_v52 }
 0x9c5   :  { %5534 = vmatprep.subr.bf16.mxu0 %v7402_v59  ;;  %v1584_v59 = vld [vmem:[%s6016_s24 + $0x90] sm:$0xff] }
 0x9c8   :  { %5536 = vmatpush1.bf16.msra.mxu0 %v7403_v0  ;;  %v1585_v0 = vld [vmem:[%s6016_s24 + $0x98] sm:$0xff]  ;;  %s7422_s24 = sld [smem:[#allocation25_spill]] }
 0x9c9   :  { %5538 = vmatprep.subr.bf16.mxu0 %v7404_v37  ;;  %v5575_v37 = vpack.c.bf16 %v1585_v0, %v1584_v59 }
 0x9cc   :  { %5540 = vmatpush1.bf16.msra.mxu0 %v7405_v42 }
 0x9cd   :  { %5542 = vmatprep.subr.bf16.mxu0 %v7406_v2 }
 0x9d0   :  { %5544 = vmatpush1.bf16.msra.mxu0 %v7407_v54 }
 0x9d1   :  { %5546 = vmatprep.subr.bf16.mxu0 %v7408_v55 }
 0x9d4   :  { %5548 = vmatpush1.bf16.msra.mxu0 %v7409_v4 }
 0x9d5   :  { %5550 = vmatprep.subr.bf16.mxu0 %v7369_v49  ;;  %v5554_v49 = vpack.c.bf16 %v1571_v63, %v1570_v9  ;;  %v1834_v9 = vld [vmem:[%s7414_s13 + $0x10] sm:$0xff]  ;;  %v1835_v63 = vld [vmem:[%s7414_s13 + $0x18] sm:$0xff] }
 0x9d8   :  { %5552 = vmatpush1.bf16.msra.mxu0 %v7410_v7 }
 0x9d9   :  { %5577 = vmatprep.subr.bf16.mxu0 %v7396_v26 }
 0xa6e   :  { %v1364_v25 = vpop.f32.mrb[8].mxu0 }
 0xa6f   :  { %v1365_v31 = vadd.f32 %v1364_v25, %v6533_v22  ;;  %v1366_v47 = vpop.f32.mrb[9].mxu0 }
 0xa70   :  { %v1367_v51 = vadd.f32 %v1366_v47, %v6536_v57 }
 0xa71   :  { %v1369_v14 = vmul.f32 0.2, %v1365_v31 }
 0xa72   :  { %v1370_v19 = vmul.f32 0.2, %v1367_v51 }
 0xa74   :  { %v1373_v43 = vcombine.low %v1369_v14, %v1370_v19 }
 0xa76   :  { %v1380_v44 = vrot.slane %v1373_v43, %v6541_v61  ;;  %v1749_v43 = vld [vmem:[%s7413_s9 + $0x8] sm:$0xff] }
 0xa78   :  { %v1387_v23 = vrot.slane %v1380_v44, %v6541_v61  ;;  %v1750_v44 = vld [vmem:[%s7413_s9 + $0x10] sm:$0xff] }
 0xa7a   :  { %v6777_v10 = vsub.f32 %v6700_v56, %v1387_v23  ;;  %v5557_v56 = vpack.c.bf16 %v1573_v48, %v1572_v17  ;;  %v6851_v17 = vpack.c.bf16 %v1835_v63, %v1834_v9 }
 0xa7c   :  { %v1398_v15 = vrot.slane %v6777_v10, %v6190_v12  ;;  %v1394_v29 = vrot.slane %v6777_v10, %v6349_v16 }
 0xa7e   :  { %1465 = vmatprep.mubr.f32.mxu1 %v1398_v15 }
 0xa7f   :  { %1466 = vmatmul.mubr.f32.vlgmr.msra.gmra.mrb[14].mxu1 %v1394_v29 }
 0xa80   :  { %4691 = vmatprep.mubr.msk.f32.mxu1 %vm5945_vm0, %v7411_v28  ;;  %5555 = vmatpush3.bf16.msra.mxu1 %v5554_v49 }
 0xa81   :  { %5556 = vmatprep.subr.bf16.mxu1 %v7396_v26 }
 0xa84   :  { %5558 = vmatpush3.bf16.msra.mxu1 %v5557_v56 }
 0xa85   :  { %5559 = vmatprep.subr.bf16.mxu1 %v7396_v26 }
 0xa88   :  { %5561 = vmatpush3.bf16.msra.mxu1 %v5560_v24 }
 0xa89   :  { %5562 = vmatprep.subr.bf16.mxu1 %v7396_v26 }
 0xa8c   :  { %5564 = vmatpush3.bf16.msra.mxu1 %v5563_v38 }
 0xa8d   :  { %5565 = vmatprep.subr.bf16.mxu1 %v7396_v26 }
 0xa90   :  { %5567 = vmatpush3.bf16.msra.mxu1 %v5566_v40 }
 0xa91   :  { %5568 = vmatprep.subr.bf16.mxu1 %v7396_v26 }
 0xa94   :  { %5570 = vmatpush3.bf16.msra.mxu1 %v5569_v46 }
 0xa95   :  { %5571 = vmatprep.subr.bf16.mxu1 %v7396_v26 }
 0xa98   :  { %5573 = vmatpush3.bf16.msra.mxu1 %v5572_v58 }
 0xa99   :  { %5574 = vmatprep.subr.bf16.mxu1 %v7396_v26 }
 0xa9c   :  { %5576 = vmatpush3.bf16.msra.mxu1 %v5575_v37 }
 0xa9d   :  { %5601 = vmatprep.subr.bf16.mxu1 %v7396_v26 }
 0xb52   :  { %v1467_v6 = vpop.f32.mrb[14].mxu1 }
 0xb53   :  { %v1468_v1 = vadd.f32 %v1467_v6, %v6493_v21  ;;  %v1469_v41 = vpop.f32.mrb[15].mxu1  ;;  %v5581_v21 = vpack.c.bf16 %v1569_v18, %v1568_v32  ;;  %v4436_v6 = vld [vmem:[%s7416_s21] ss:$0 sm:$0xff] }
 0xb54   :  { %v1470_v8 = vadd.f32 %v1469_v41, %v6495_v36  ;;  %v4431_v36 = vld [vmem:[#allocation4] ss:$0 sm:$0xff]  ;;  %v1836_v41 = vld [vmem:[%s7417_s25] sm:$0x1] }
 0xb55   :  { %v436_v33 = vadd.f32 %v4431_v36, %v7412_v27  ;;  %v6894_v53 = vrot.slane %v1836_v41, %v6349_v16 }
 0xb56   :  { %5736 = vtanh.f32 %v1470_v8 }
 0xb57   :  { %5738 = vtanh.f32 %v1468_v1 }
 0xb60   :  { %v5737_v3 = vpop.eup %5736 }
 0xb61   :  { %v5739_v20 = vpop.eup %5738  ;;  %1538 = vmatprep.mubr.f32.mxu0 %v5737_v3 }
 0xb62   :  { %1539 = vmatmul.mubr.f32.vlgmr.msra.gmra.mrb[10].mxu0 %v5739_v20 }
 0xb63   :  { %5579 = vmatpush3.bf16.msra.mxu0 %v5578_v60  ;;  %4702 = vmatprep.mubr.msk.f32.mxu0 %vm5945_vm0, %v7411_v28 }
 0xb64   :  { %5580 = vmatprep.subr.bf16.mxu0 %v7396_v26 }
 0xb67   :  { %5582 = vmatpush3.bf16.msra.mxu0 %v5581_v21 }
 0xb68   :  { %5583 = vmatprep.subr.bf16.mxu0 %v7396_v26 }
 0xb6a   :  { %4703 = vmatmul.mubr.msk.f32.vlgmr.msra.gmra.mrb[12].mxu0 %vm278_vm4, %v436_v33 }
 0xb6b   :  { %4713 = vmatprep.mubr.msk.f32.mxu0 %vm5945_vm0, %v7411_v28 }
 0xc35   :  { %v1540_v42 = vpop.f32.mrb[10].mxu0 }
 0xc36   :  { %v1541_v2 = vadd.f32 %v1540_v42, %v6533_v22  ;;  %v1542_v54 = vpop.f32.mrb[11].mxu0 }
 0xc37   :  { %v1543_v55 = vadd.f32 %v1542_v54, %v6536_v57  ;;  %v1748_v57 = vld [vmem:[%s7413_s9] sm:$0xff] }
 0xc38   :  { %v1545_v4 = vmul.f32 0.2, %v1541_v2  ;;  %v5584_v23 = vpack.c.bf16 %v1749_v43, %v1748_v57 }
 0xc39   :  { %v1546_v7 = vmul.f32 0.2, %v1543_v55 }
 0xc3a   :  { %5585 = vmatpush3.bf16.msra.mxu0 %v5584_v23 }
 0xc3b   :  { %v1549_v25 = vcombine.low %v1545_v4, %v1546_v7  ;;  %5586 = vmatprep.subr.bf16.mxu0 %v7396_v26 }
 0xc3d   :  { %v1556_v31 = vrot.slane %v1549_v25, %v6541_v61  ;;  %v1735_v47 = vpop.f32.mrb[12].mxu0 }
 0xc3e   :  { %v4704_v51 = vpop.f32.mrb[13].mxu0 }
 0xc3f   :  { %v1563_v14 = vrot.slane %v1556_v31, %v6541_v61  ;;  %v1751_v61 = vld [vmem:[%s7413_s9 + $0x18] sm:$0xff] }
 0xc40   :  { %v5587_v15 = vpack.c.bf16 %v1751_v61, %v1750_v44 }
 0xc41   :  { %v6828_v19 = vsub.f32 %v6777_v10, %v1563_v14  ;;  %v1833_v10 = vld [vmem:[%s7414_s13 + $0x8] sm:$0xff] }
 0xc42   :  { %5588 = vmatpush3.bf16.msra.mxu0 %v5587_v15 }
 0xc43   :  { %v6832_v22 = vrot.slane %v6828_v19, %v6190_v12  ;;  %5589 = vmatprep.subr.bf16.mxu0 %v7396_v26  ;;  %v1832_v12 = vld [vmem:[%s7414_s13] sm:$0xff] }
 0xc44   :  { %v6845_v29 = vpack.c.bf16 %v1833_v10, %v1832_v12 }
 0xc45   :  { %4692 = vmatmul.mubr.f32.vlgmr.msra.gmra.mrb[16].mxu1 %v6832_v22 }
 0xc46   :  { %4746 = vmatprep.mubr.msk.f32.mxu1 %vm5945_vm0, %v7411_v28  ;;  %5603 = vmatpush3.bf16.msra.mxu1 %v6845_v29 }
 0xc47   :  { %5604 = vmatprep.subr.bf16.mxu1 %v7396_v26 }
 0xc4a   :  { %5606 = vmatpush3.bf16.msra.mxu1 %v6851_v17 }
 0xc4b   :  { %5613 = vmatprep.subr.bf16.mxu1 %v7396_v26 }
 0xd18   :  { %v1658_v49 = vpop.f32.mrb[16].mxu1 }
 0xd19   :  { %v1665_v48 = vrot.slane %v1658_v49, %v6349_v16  ;;  %v4693_v56 = vpop.f32.mrb[17].mxu1 }
 0xd1b   :  { %v1736_v62 = vadd.f32 %v1735_v47, %v1665_v48 }
 0xd1d   :  { %v1746_v24 = vadd.f32 %v4435_v50, %v1736_v62 }
 0xd1f   :  { %5740 = vtanh.f32 %v1746_v24 }
 0xd29   :  { %v6857_v35 = vpop.eup %5740 }
 0xd2a   :  { %4714 = vmatmul.mubr.msk.f32.vlgmr.msra.gmra.mrb[14].mxu0 %vm278_vm4, %v6857_v35 }
 0xd2b   :  { %5591 = vmatpush3.bf16.msra.mxu0 %v6845_v29  ;;  %4724 = vmatprep.mubr.msk.f32.mxu0 %vm5945_vm0, %v7411_v28 }
 0xd2c   :  { %5592 = vmatprep.subr.bf16.mxu0 %v7396_v26 }
 0xd2f   :  { %5594 = vmatpush3.bf16.msra.mxu0 %v6851_v17 }
 0xd30   :  { %5595 = vmatprep.subr.bf16.mxu0 %v7396_v26 }
 0xd32   :  { %4725 = vmatmul.mubr.f32.vlgmr.msra.gmra.mrb[16].mxu0 %v7411_v28 }
 0xd33   :  { %5597 = vmatpush3.bf16.msra.mxu0 %v6845_v29  ;;  %4735 = vmatprep.mubr.msk.f32.mxu0 %vm5945_vm0, %v7411_v28 }
 0xd34   :  { %5598 = vmatprep.subr.bf16.mxu0 %v7396_v26 }
 0xd37   :  { %5600 = vmatpush3.bf16.msra.mxu0 %v6851_v17 }
 0xd38   :  { %5607 = vmatprep.subr.bf16.mxu0 %v7396_v26 }
 0xdfd   :  { %v1828_v5 = vpop.f32.mrb[14].mxu0 }
 0xdfe   :  { %v4715_v38 = vpop.f32.mrb[15].mxu0  ;;  %v6875_v1 = vadd.f32 %v4436_v6, %v1828_v5 }
 0xe05   :  { %v1906_v8 = vpop.f32.mrb[16].mxu0 }
 0xe06   :  { %v1910_v13 = vadd.f32 %v1906_v8, %v6875_v1  ;;  %v4726_v30 = vpop.f32.mrb[17].mxu0 }
 0xe08   :  { %v1911_v60 = vadd.f32 %v1910_v13, %v1836_v41 }
 0xe0a   :  { %5742 = vtanh.f32 %v1911_v60  ;;  %v4438_v32 = vmul.f32 -1.442695, %v1911_v60 }
 0xe0c   :  { %5744 = vpow2.f32 %v4438_v32 }
 0xe14   :  { %v5743_v3 = vpop.eup %5742 }
 0xe15   :  { %1921 = vrot.lane.b32.xlu1 %v5743_v3, %s5949_s29 }
 0xe16   :  { %v5745_v18 = vpop.eup %5744 }
 0xe17   :  { %v1915_v20 = vadd.f32 1.0, %v5745_v18 }
 0xe19   :  { %5746 = vrcp.f32 %v1915_v20 }
 0xe23   :  { %v5747_v21 = vpop.eup %5746 }
 0xe24   :  { %v1919_v33 = vmul.f32 0.0, %v5747_v21 }
 0xe87   :  { %v1922_v36 = vpop.permute.xlu1 %1921 }
 0xe88   :  { %v1924_v27 = vmul.f32 %v5747_v21, %v1922_v36 }
 0xe8a   :  { %1926 = vrot.lane.b32.xlu0 %v1924_v27, %s5950_s3 }
 0xefc   :  { %v1927_v34 = vpop.permute.xlu0 %1926 }
 0xefd   :  { %v1929_v39 = vadd.f32 %v1927_v34, %v1919_v33 }
 0xeff   :  { %5748 = vtanh.f32 %v1929_v39  ;;  %v2030_v31 = vrot.slane %v1929_v39, 7 }
 0xf09   :  { %v5749_v40 = vpop.eup %5748 }
 0xf0a   :  { %1932 = vrot.lane.b32.xlu1 %v5749_v40, %s5949_s29 }
 0xf7c   :  { %v1933_v45 = vpop.permute.xlu1 %1932 }
 0xf7d   :  { %v6882_v11 = vmul.f32 %v5747_v21, %v1933_v45 }
 0xf7f   :  { %1937 = vrot.lane.b32.xlu0 %v6882_v11, %s5950_s3 }
 0xff1   :  { %v1938_v46 = vpop.permute.xlu0 %1937 }
 0xff2   :  { %4736 = vmatmul.mubr.msk.f32.vlgmr.msra.gmra.mrb[18].mxu0 %vm278_vm4, %v1938_v46 }
 0xff3   :  { %5609 = vmatpush3.bf16.msra.mxu0 %v6845_v29  ;;  %4757 = vmatprep.mubr.msk.f32.mxu0 %vm5945_vm0, %v7411_v28 }
 0xff4   :  { %5610 = vmatprep.subr.bf16.mxu0 %v7396_v26 }
 0xff7   :  { %5612 = vmatpush3.bf16.msra.mxu0 %v6851_v17 }
 0xff8   :  { %5619 = vmatprep.subr.bf16.mxu0 %v7396_v26 }
0x10c5   :  { %v2007_v52 = vpop.f32.mrb[18].mxu0 }
0x10c6   :  { %v2012_v58 = vrot.slane %v2007_v52, 7  ;;  %v4737_v59 = vpop.f32.mrb[19].mxu0 }
0x10c8   :  { %v2014_v0 = vadd.f32 %v2012_v58, %v6875_v1 }
0x10ca   :  { %v2021_v37 = vadd.f32 %v6894_v53, %v2014_v0 }
0x10cc   :  { %5750 = vtanh.f32 %v2021_v37  ;;  %v4440_v2 = vmul.f32 -1.442695, %v2021_v37 }
0x10ce   :  { %5752 = vpow2.f32 %v4440_v2 }
0x10d6   :  { %v5751_v42 = vpop.eup %5750 }
0x10d7   :  { %2034 = vrot.lane.b32.xlu1 %v5751_v42, %s5949_s29 }
0x10d8   :  { %v5753_v54 = vpop.eup %5752 }
0x10d9   :  { %v2025_v55 = vadd.f32 1.0, %v5753_v54 }
0x10db   :  { %5754 = vrcp.f32 %v2025_v55 }
0x10e5   :  { %v5755_v4 = vpop.eup %5754 }
0x10e6   :  { %v2032_v47 = vmul.f32 %v5755_v4, %v2030_v31 }
0x1149   :  { %v2035_v7 = vpop.permute.xlu1 %2034 }
0x114a   :  { %v2037_v25 = vmul.f32 %v5755_v4, %v2035_v7 }
0x114c   :  { %2039 = vrot.lane.b32.xlu0 %v2037_v25, %s5950_s3 }
0x11be   :  { %v2040_v51 = vpop.permute.xlu0 %2039 }
0x11bf   :  { %v2042_v14 = vadd.f32 %v2040_v51, %v2032_v47 }
0x11c1   :  { %5756 = vtanh.f32 %v2042_v14  ;;  %v2138_v38 = vrot.slane %v2042_v14, 7 }
0x11cb   :  { %v5757_v57 = vpop.eup %5756 }
0x11cc   :  { %2045 = vrot.lane.b32.xlu1 %v5757_v57, %s5949_s29 }
0x123e   :  { %v2046_v43 = vpop.permute.xlu1 %2045 }
0x123f   :  { %v2048_v44 = vmul.f32 %v5755_v4, %v2046_v43 }
0x1241   :  { %v2050_v23 = vrot.slane %v2048_v44, 1  ;;  %v2698_v3 = vsel %vm2697_vm6, %v6882_v11, %v2048_v44 }
0x1243   :  { %2051 = vrot.lane.b32.xlu0 %v2050_v23, %s5950_s3 }
0x12b5   :  { %v2052_v61 = vpop.permute.xlu0 %2051 }
0x12b6   :  { %4747 = vmatmul.mubr.msk.f32.vlgmr.msra.gmra.mrb[18].mxu1 %vm278_vm4, %v2052_v61 }
0x12b7   :  { %5615 = vmatpush3.bf16.msra.mxu1 %v6845_v29  ;;  %4768 = vmatprep.mubr.msk.f32.mxu1 %vm5945_vm0, %v7411_v28 }
0x12b8   :  { %5616 = vmatprep.subr.bf16.mxu1 %v7396_v26 }
0x12bb   :  { %5618 = vmatpush3.bf16.msra.mxu1 %v6851_v17 }
0x12bc   :  { %5625 = vmatprep.subr.bf16.mxu1 %v7396_v26 }
0x1389   :  { %v2121_v15 = vpop.f32.mrb[18].mxu1 }
0x138a   :  { %v2126_v12 = vrot.slane %v2121_v15, 6  ;;  %v4748_v10 = vpop.f32.mrb[19].mxu1 }
0x138c   :  { %v2128_v9 = vadd.f32 %v2126_v12, %v6875_v1 }
0x138e   :  { %v2129_v63 = vadd.f32 %v2128_v9, %v6894_v53 }
0x1390   :  { %5758 = vtanh.f32 %v2129_v63  ;;  %v4442_v48 = vmul.f32 -1.442695, %v2129_v63 }
0x1392   :  { %5760 = vpow2.f32 %v4442_v48 }
0x139a   :  { %v5759_v49 = vpop.eup %5758 }
0x139b   :  { %2142 = vrot.lane.b32.xlu1 %v5759_v49, %s5949_s29 }
0x139c   :  { %v5761_v56 = vpop.eup %5760 }
0x139d   :  { %v2133_v50 = vadd.f32 1.0, %v5761_v56 }
0x139f   :  { %5762 = vrcp.f32 %v2133_v50 }
0x13a9   :  { %v5763_v62 = vpop.eup %5762 }
0x13aa   :  { %v2140_v6 = vmul.f32 %v5763_v62, %v2138_v38 }
0x140d   :  { %v2143_v24 = vpop.permute.xlu1 %2142 }
0x140e   :  { %v2145_v5 = vmul.f32 %v5763_v62, %v2143_v24 }
0x1410   :  { %2147 = vrot.lane.b32.xlu0 %v2145_v5, %s5950_s3 }
0x1482   :  { %v2148_v41 = vpop.permute.xlu0 %2147 }
0x1483   :  { %v2150_v8 = vadd.f32 %v2148_v41, %v2140_v6 }
0x1485   :  { %5764 = vtanh.f32 %v2150_v8  ;;  %v2246_v59 = vrot.slane %v2150_v8, 7 }
0x148f   :  { %v5765_v13 = vpop.eup %5764 }
0x1490   :  { %2153 = vrot.lane.b32.xlu1 %v5765_v13, %s5949_s29 }
0x1502   :  { %v2154_v30 = vpop.permute.xlu1 %2153 }
0x1503   :  { %v2156_v60 = vmul.f32 %v5763_v62, %v2154_v30 }
0x1505   :  { %v2158_v32 = vrot.slane %v2156_v60, 2  ;;  %v2700_v18 = vsel %vm2699_vm7, %v2698_v3, %v2156_v60 }
0x1507   :  { %2159 = vrot.lane.b32.xlu0 %v2158_v32, %s5950_s3 }
0x1579   :  { %v2160_v20 = vpop.permute.xlu0 %2159 }
0x157a   :  { %4758 = vmatmul.mubr.msk.f32.vlgmr.msra.gmra.mrb[20].mxu0 %vm278_vm4, %v2160_v20 }
0x157b   :  { %5621 = vmatpush3.bf16.msra.mxu0 %v6845_v29  ;;  %4779 = vmatprep.mubr.msk.f32.mxu0 %vm5945_vm0, %v7411_v28 }
0x157c   :  { %5622 = vmatprep.subr.bf16.mxu0 %v7396_v26 }
0x157f   :  { %5624 = vmatpush3.bf16.msra.mxu0 %v6851_v17 }
0x1580   :  { %5631 = vmatprep.subr.bf16.mxu0 %v7396_v26 }
0x164d   :  { %v2229_v21 = vpop.f32.mrb[20].mxu0 }
0x164e   :  { %v2234_v36 = vrot.slane %v2229_v21, 5  ;;  %v4759_v27 = vpop.f32.mrb[21].mxu0 }
0x1650   :  { %v2236_v33 = vadd.f32 %v2234_v36, %v6875_v1 }
0x1652   :  { %v2237_v34 = vadd.f32 %v2236_v33, %v6894_v53 }
0x1654   :  { %5766 = vtanh.f32 %v2237_v34  ;;  %v4444_v40 = vmul.f32 -1.442695, %v2237_v34 }
0x1656   :  { %5768 = vpow2.f32 %v4444_v40 }
0x165e   :  { %v5767_v39 = vpop.eup %5766 }
0x165f   :  { %2250 = vrot.lane.b32.xlu1 %v5767_v39, %s5949_s29 }
0x1660   :  { %v5769_v45 = vpop.eup %5768 }
0x1661   :  { %v2241_v11 = vadd.f32 1.0, %v5769_v45 }
0x1663   :  { %5770 = vrcp.f32 %v2241_v11 }
0x166d   :  { %v5771_v46 = vpop.eup %5770 }
0x166e   :  { %v2248_v0 = vmul.f32 %v5771_v46, %v2246_v59 }
0x16d1   :  { %v2251_v52 = vpop.permute.xlu1 %2250 }
0x16d2   :  { %v2253_v58 = vmul.f32 %v5771_v46, %v2251_v52 }
0x16d4   :  { %2255 = vrot.lane.b32.xlu0 %v2253_v58, %s5950_s3 }
0x1746   :  { %v2256_v37 = vpop.permute.xlu0 %2255 }
0x1747   :  { %v2258_v42 = vadd.f32 %v2256_v37, %v2248_v0 }
0x1749   :  { %5772 = vtanh.f32 %v2258_v42  ;;  %v2354_v9 = vrot.slane %v2258_v42, 7 }
0x1753   :  { %v5773_v2 = vpop.eup %5772 }
0x1754   :  { %2261 = vrot.lane.b32.xlu1 %v5773_v2, %s5949_s29 }
0x17c6   :  { %v2262_v54 = vpop.permute.xlu1 %2261 }
0x17c7   :  { %v2264_v55 = vmul.f32 %v5771_v46, %v2262_v54 }
0x17c9   :  { %v2266_v4 = vrot.slane %v2264_v55, 3  ;;  %v2702_v7 = vsel %vm2701_vm8, %v2700_v18, %v2264_v55 }
0x17cb   :  { %2267 = vrot.lane.b32.xlu0 %v2266_v4, %s5950_s3 }
0x183d   :  { %v2268_v25 = vpop.permute.xlu0 %2267 }
0x183e   :  { %4769 = vmatmul.mubr.msk.f32.vlgmr.msra.gmra.mrb[20].mxu1 %vm278_vm4, %v2268_v25 }
0x183f   :  { %5627 = vmatpush3.bf16.msra.mxu1 %v6845_v29  ;;  %4790 = vmatprep.mubr.msk.f32.mxu1 %vm5945_vm0, %v7411_v28 }
0x1840   :  { %5628 = vmatprep.subr.bf16.mxu1 %v7396_v26 }
0x1843   :  { %5630 = vmatpush3.bf16.msra.mxu1 %v6851_v17 }
0x1844   :  { %5637 = vmatprep.subr.bf16.mxu1 %v7396_v26 }
0x1911   :  { %v2337_v31 = vpop.f32.mrb[20].mxu1 }
0x1912   :  { %v2342_v47 = vrot.slane %v2337_v31, 4  ;;  %v4770_v51 = vpop.f32.mrb[21].mxu1 }
0x1914   :  { %v2344_v14 = vadd.f32 %v2342_v47, %v6875_v1 }
0x1916   :  { %v2345_v57 = vadd.f32 %v2344_v14, %v6894_v53 }
0x1918   :  { %5774 = vtanh.f32 %v2345_v57  ;;  %v4446_v44 = vmul.f32 -1.442695, %v2345_v57 }
0x191a   :  { %5776 = vpow2.f32 %v4446_v44 }
0x1922   :  { %v5775_v43 = vpop.eup %5774 }
0x1923   :  { %2358 = vrot.lane.b32.xlu1 %v5775_v43, %s5949_s29 }
0x1924   :  { %v5777_v23 = vpop.eup %5776 }
0x1925   :  { %v2349_v61 = vadd.f32 1.0, %v5777_v23 }
0x1927   :  { %5778 = vrcp.f32 %v2349_v61 }
0x1931   :  { %v5779_v15 = vpop.eup %5778 }
0x1932   :  { %v2356_v63 = vmul.f32 %v5779_v15, %v2354_v9 }
0x1995   :  { %v2359_v12 = vpop.permute.xlu1 %2358 }
0x1996   :  { %v2361_v10 = vmul.f32 %v5779_v15, %v2359_v12 }
0x1998   :  { %2363 = vrot.lane.b32.xlu0 %v2361_v10, %s5950_s3 }
0x1a0a   :  { %v2364_v49 = vpop.permute.xlu0 %2363 }
0x1a0b   :  { %v2366_v48 = vadd.f32 %v2364_v49, %v2356_v63 }
0x1a0d   :  { %5780 = vtanh.f32 %v2366_v48  ;;  %v2462_v21 = vrot.slane %v2366_v48, 7 }
0x1a17   :  { %v5781_v56 = vpop.eup %5780 }
0x1a18   :  { %2369 = vrot.lane.b32.xlu1 %v5781_v56, %s5949_s29 }
0x1a8a   :  { %v2370_v50 = vpop.permute.xlu1 %2369 }
0x1a8b   :  { %v2372_v62 = vmul.f32 %v5779_v15, %v2370_v50 }
0x1a8d   :  { %v2374_v24 = vrot.slane %v2372_v62, 4  ;;  %v2703_v5 = vsel %vm193_vm1, %v2702_v7, %v2372_v62  ;;  %vm4374_vm1 = vcmask 7175  }
0x1a8f   :  { %2375 = vrot.lane.b32.xlu0 %v2374_v24, %s5950_s3 }
0x1b01   :  { %v2376_v38 = vpop.permute.xlu0 %2375 }
0x1b02   :  { %4780 = vmatmul.mubr.msk.f32.vlgmr.msra.gmra.mrb[22].mxu0 %vm278_vm4, %v2376_v38 }
0x1b03   :  { %5633 = vmatpush3.bf16.msra.mxu0 %v6845_v29  ;;  %4801 = vmatprep.mubr.msk.f32.mxu0 %vm5945_vm0, %v7411_v28 }
0x1b04   :  { %5634 = vmatprep.subr.bf16.mxu0 %v7396_v26 }
0x1b07   :  { %5636 = vmatpush3.bf16.msra.mxu0 %v6851_v17 }
0x1b08   :  { %4815 = vmatprep.subr.mxu0 %v7411_v28 }
0x1bd5   :  { %v2445_v6 = vpop.f32.mrb[22].mxu0 }
0x1bd6   :  { %v2450_v41 = vrot.slane %v2445_v6, 3  ;;  %v4781_v8 = vpop.f32.mrb[23].mxu0 }
0x1bd7   :  { %v2710_v8 = vld [vmem:[%s7418_s8] sm:$0xff] }
0x1bd8   :  { %v2452_v13 = vadd.f32 %v2450_v41, %v6875_v1 }
0x1bda   :  { %v2453_v30 = vadd.f32 %v2452_v13, %v6894_v53  ;;  %v2711_v13 = vld [vmem:[%s7418_s8 + $0x8] sm:$0xff] }
0x1bdc   :  { %5782 = vtanh.f32 %v2453_v30  ;;  %v4448_v29 = vmul.f32 -1.442695, %v2453_v30  ;;  %v2712_v30 = vld [vmem:[%s7418_s8 + $0x10] sm:$0xff] }
0x1bde   :  { %5784 = vpow2.f32 %v4448_v29  ;;  %v2713_v29 = vld [vmem:[%s7418_s8 + $0x18] sm:$0xff] }
0x1be6   :  { %v5783_v60 = vpop.eup %5782 }
0x1be7   :  { %2466 = vrot.lane.b32.xlu1 %v5783_v60, %s5949_s29  ;;  %v5638_v60 = vpack.c.bf16 %v2711_v13, %v2710_v8 }
0x1be8   :  { %v5785_v3 = vpop.eup %5784 }
0x1be9   :  { %v2457_v32 = vadd.f32 1.0, %v5785_v3  ;;  %v5641_v3 = vpack.c.bf16 %v2713_v29, %v2712_v30 }
0x1beb   :  { %5786 = vrcp.f32 %v2457_v32 }
0x1bf5   :  { %v5787_v18 = vpop.eup %5786 }
0x1bf6   :  { %v2464_v36 = vmul.f32 %v5787_v18, %v2462_v21 }
0x1c59   :  { %v2467_v17 = vpop.permute.xlu1 %2466 }
0x1c5a   :  { %v2469_v20 = vmul.f32 %v5787_v18, %v2467_v17 }
0x1c5c   :  { %2471 = vrot.lane.b32.xlu0 %v2469_v20, %s5950_s3 }
0x1cce   :  { %v2472_v27 = vpop.permute.xlu0 %2471 }
0x1ccf   :  { %v2474_v33 = vadd.f32 %v2472_v27, %v2464_v36  ;;  %v4453_v36 = vld [vmem:[#allocation9] ss:$0 sm:$0xff] }
0x1cd1   :  { %5788 = vtanh.f32 %v2474_v33  ;;  %v2570_v31 = vrot.slane %v2474_v33, 7 }
0x1cdb   :  { %v5789_v34 = vpop.eup %5788 }
0x1cdc   :  { %2477 = vrot.lane.b32.xlu1 %v5789_v34, %s5949_s29 }
0x1d4e   :  { %v2478_v39 = vpop.permute.xlu1 %2477 }
0x1d4f   :  { %v2480_v40 = vmul.f32 %v5787_v18, %v2478_v39 }
0x1d51   :  { %v2482_v45 = vrot.slane %v2480_v40, 5  ;;  %v2705_v11 = vsel %vm2704_vm9, %v2703_v5, %v2480_v40 }
0x1d53   :  { %2483 = vrot.lane.b32.xlu0 %v2482_v45, %s5950_s3 }
0x1dc5   :  { %v2484_v46 = vpop.permute.xlu0 %2483 }
0x1dc6   :  { %4791 = vmatmul.mubr.msk.f32.vlgmr.msra.gmra.mrb[22].mxu1 %vm278_vm4, %v2484_v46 }
0x1dc7   :  { %4812 = vmatprep.mubr.msk.f32.mxu1 %vm5945_vm0, %v7411_v28  ;;  %5639 = vmatpush3.bf16.msra.mxu1 %v5638_v60 }
0x1dc8   :  { %5640 = vmatprep.subr.bf16.mxu1 %v7396_v26 }
0x1dcb   :  { %5642 = vmatpush3.bf16.msra.mxu1 %v5641_v3  ;;  %v5951_v3 = vmov 1.0  }
0x1e99   :  { %v2553_v52 = vpop.f32.mrb[22].mxu1 }
0x1e9a   :  { %v2558_v58 = vrot.slane %v2553_v52, 2  ;;  %v4792_v59 = vpop.f32.mrb[23].mxu1  ;;  %v7420_v52 = vld [vmem:[#allocation29_spill] sm:$0xff] }
0x1e9b   :  { %vm2811_vm13 = vcmp.eq.s32.totalorder %v7420_v52, 7 }
0x1e9c   :  { %v2560_v0 = vadd.f32 %v2558_v58, %v6875_v1 }
0x1e9e   :  { %v2561_v37 = vadd.f32 %v2560_v0, %v6894_v53  ;;  %v2812_v0 = vsel %vm2811_vm13, 5.0, %v7411_v28 }
0x1ea0   :  { %5790 = vtanh.f32 %v2561_v37  ;;  %v4450_v2 = vmul.f32 -1.442695, %v2561_v37  ;;  %v7421_v37 = vld [vmem:[#allocation26_spill] sm:$0xff] }
0x1ea1   :  { %vm2814_vm14 = vcmp.le.s32.totalorder %v7421_v37, %v7420_v52  ;;  %v2893_v8 = vcvt.s32.f32 %v7421_v37 }
0x1ea2   :  { %5792 = vpow2.f32 %v4450_v2 }
0x1eaa   :  { %v5791_v42 = vpop.eup %5790 }
0x1eab   :  { %2574 = vrot.lane.b32.xlu1 %v5791_v42, %s5949_s29 }
0x1eac   :  { %v5793_v54 = vpop.eup %5792 }
0x1ead   :  { %v2565_v55 = vadd.f32 1.0, %v5793_v54  ;;  %v4456_v54 = vsel %vm2814_vm14, 1.0, %v7411_v28 }
0x1eaf   :  { %5794 = vrcp.f32 %v2565_v55  ;;  %v3185_v55 = vld [vmem:[%s7419_s19] sm:$0xff] }
0x1eb9   :  { %v5795_v4 = vpop.eup %5794 }
0x1eba   :  { %v2572_v47 = vmul.f32 %v5795_v4, %v2570_v31  ;;  %v3189_v31 = vld [vmem:[%s7419_s19 + $0x20] sm:$0xff] }
0x1f1d   :  { %v2575_v7 = vpop.permute.xlu1 %2574 }
0x1f1e   :  { %v2577_v25 = vmul.f32 %v5795_v4, %v2575_v7  ;;  %v3187_v7 = vld [vmem:[%s7419_s19 + $0x10] sm:$0xff] }
0x1f20   :  { %2579 = vrot.lane.b32.xlu0 %v2577_v25, %s5950_s3  ;;  %v3188_v25 = vld [vmem:[%s7419_s19 + $0x18] sm:$0xff] }
0x1f92   :  { %v2580_v51 = vpop.permute.xlu0 %2579 }
0x1f93   :  { %v2582_v14 = vadd.f32 %v2580_v51, %v2572_v47  ;;  %v3190_v47 = vld [vmem:[%s7419_s19 + $0x28] sm:$0xff]  ;;  %v3191_v51 = vld [vmem:[%s7419_s19 + $0x30] sm:$0xff] }
0x1f95   :  { %5796 = vtanh.f32 %v2582_v14 }
0x1f9f   :  { %v5797_v57 = vpop.eup %5796 }
0x1fa0   :  { %2585 = vrot.lane.b32.xlu1 %v5797_v57, %s5949_s29  ;;  %v3193_v57 = vld [vmem:[%s7419_s19 + $0x40] sm:$0xff] }
0x2012   :  { %v2586_v43 = vpop.permute.xlu1 %2585 }
0x2013   :  { %v2588_v44 = vmul.f32 %v5795_v4, %v2586_v43  ;;  %v3186_v4 = vld [vmem:[%s7419_s19 + $0x8] sm:$0xff] }
0x2014   :  { %v3194_v43 = vld [vmem:[%s7419_s19 + $0x48] sm:$0xff] }
0x2015   :  { %v2590_v23 = vrot.slane %v2588_v44, 6  ;;  %v2707_v61 = vsel %vm2706_vm10, %v2705_v11, %v2588_v44  ;;  %v3195_v44 = vld [vmem:[%s7419_s19 + $0x50] sm:$0xff] }
0x2017   :  { %2591 = vrot.lane.b32.xlu0 %v2590_v23, %s5950_s3  ;;  %v3196_v23 = vld [vmem:[%s7419_s19 + $0x58] sm:$0xff] }
0x2089   :  { %v2592_v15 = vpop.permute.xlu0 %2591 }
0x208a   :  { %4802 = vmatmul.mubr.msk.f32.vlgmr.msra.gmra.mrb[24].mxu0 %vm278_vm4, %v2592_v15  ;;  %v3198_v15 = vld [vmem:[%s7419_s19 + $0x68] sm:$0xff] }
0x208b   :  { %4817 = vmatprep.mubr.msk.f32.mxu0 %vm5945_vm0, %v7411_v28 }
0x215d   :  { %v2661_v12 = vpop.f32.mrb[24].mxu0 }
0x215e   :  { %v2666_v10 = vrot.slane %v2661_v12, 1  ;;  %v4803_v9 = vpop.f32.mrb[25].mxu0  ;;  %v3199_v12 = vld [vmem:[%s7419_s19 + $0x70] sm:$0xff] }
0x215f   :  { %v7423_v9 = vmov 0  }
0x2160   :  { %v2668_v63 = vadd.f32 %v2666_v10, %v6875_v1  ;;  %v2678_v1 = vrot.slane %v2582_v14, 7  ;;  %v3192_v14 = vld [vmem:[%s7419_s19 + $0x38] sm:$0xff] }
0x2161   :  { %v3200_v10 = vld [vmem:[%s7419_s19 + $0x78] sm:$0xff] }
0x2162   :  { %v2669_v49 = vadd.f32 %v2668_v63, %v6894_v53 }
0x2164   :  { %5798 = vtanh.f32 %v2669_v49  ;;  %v4452_v56 = vmul.f32 -1.442695, %v2669_v49 }
0x2166   :  { %5800 = vpow2.f32 %v4452_v56  ;;  %v7424_v56 = vld [vmem:[#allocation27_spill] sm:$0xff] }
0x216e   :  { %v5799_v48 = vpop.eup %5798 }
0x216f   :  { %2682 = vrot.lane.b32.xlu1 %v5799_v48, %s5949_s29 }
0x2170   :  { %v5801_v50 = vpop.eup %5800 }
0x2171   :  { %v2673_v62 = vadd.f32 1.0, %v5801_v50  ;;  %v3574_v50 = vld [vmem:[%s7422_s24] sm:$0xff] }
0x2173   :  { %5802 = vrcp.f32 %v2673_v62  ;;  %v3575_v62 = vld [vmem:[%s7422_s24 + $0x8] sm:$0xff] }
0x217d   :  { %v5803_v24 = vpop.eup %5802 }
0x217e   :  { %v2680_v53 = vmul.f32 %v5803_v24, %v2678_v1 }
0x21e1   :  { %v2683_v5 = vpop.permute.xlu1 %2682 }
0x21e2   :  { %v2685_v38 = vmul.f32 %v5803_v24, %v2683_v5  ;;  %v3577_v5 = vld [vmem:[%s7422_s24 + $0x18] sm:$0xff] }
0x21e4   :  { %2687 = vrot.lane.b32.xlu0 %v2685_v38, %s5950_s3 }
0x2256   :  { %v2688_v6 = vpop.permute.xlu0 %2687 }
0x2257   :  { %v2690_v41 = vadd.f32 %v2688_v6, %v2680_v53  ;;  %v2892_v53 = vadd.s32 128, %v7421_v37 }
0x2259   :  { %5804 = vtanh.f32 %v2690_v41  ;;  %v2894_v13 = vcvt.s32.f32 %v2892_v53 }
0x2263   :  { %v5805_v32 = vpop.eup %5804 }
0x2264   :  { %2693 = vrot.lane.b32.xlu1 %v5805_v32, %s5949_s29 }
0x22d6   :  { %v2694_v18 = vpop.permute.xlu1 %2693 }
0x22d7   :  { %v2696_v17 = vmul.f32 %v5803_v24, %v2694_v18  ;;  %v3576_v24 = vld [vmem:[%s7422_s24 + $0x10] sm:$0xff] }
0x22d9   :  { %v2709_v20 = vsel %vm2708_vm11, %v2707_v61, %v2696_v17  ;;  %v3197_v61 = vld [vmem:[%s7419_s19 + $0x60] sm:$0xff] }
0x22da   :  { %2722 = vrot.lane.b32.xlu0 %v2709_v20, %s5950_s3 }
0x234c   :  { %v2723_v21 = vpop.permute.xlu0 %2722 }
0x234d   :  { %4813 = vmatmul.mubr.msk.f32.vlgmr.msra.gmra.mrb[24].mxu1 %vm278_vm4, %v2723_v21 }
0x234e   :  { %3160 = vmatprep.mubr.f32.mxu1 %v7411_v28 }
0x2420   :  { %v2792_v27 = vpop.f32.mrb[24].mxu1 }
0x2421   :  { %v2793_v33 = vadd.f32 %v4453_v36, %v2792_v27  ;;  %v4814_v34 = vpop.f32.mrb[25].mxu1 }
0x2423   :  { %v4455_v26 = vmul.f32 -1.442695, %v2793_v33 }
0x2425   :  { %5806 = vpow2.f32 %v4455_v26 }
0x242f   :  { %v5807_v39 = vpop.eup %5806 }
0x2430   :  { %v2799_v40 = vadd.f32 1.0, %v5807_v39 }
0x2432   :  { %5808 = vrcp.f32 %v2799_v40 }
0x243c   :  { %v5809_v45 = vpop.eup %5808 }
0x243d   :  { %v2803_v11 = vsel %vm2802_vm12, %v5809_v45, 0.0 }
0x243e   :  { %2804 = vadd.xlane.f32.xlu1 %v2803_v11 }
0x2471   :  { %3217 = vxpose.xlu1.b32.start [1/16] %v3185_v55, 128 }
0x2475   :  { %3218 = vxpose.xlu1.b32.cont [2/16] %v3186_v4, 128 }
0x2479   :  { %3219 = vxpose.xlu1.b32.cont [3/16] %v3187_v7, 128 }
0x247d   :  { %3220 = vxpose.xlu1.b32.cont [4/16] %v3188_v25, 128 }
0x2481   :  { %3221 = vxpose.xlu1.b32.cont [5/16] %v3189_v31, 128 }
0x2485   :  { %3222 = vxpose.xlu1.b32.cont [6/16] %v3190_v47, 128  ;;  %v3201_v47 = vld [vmem:[%s7429_s12] sm:$0xff] }
0x2489   :  { %3223 = vxpose.xlu1.b32.cont [7/16] %v3191_v51, 128 }
0x248d   :  { %3224 = vxpose.xlu1.b32.cont [8/16] %v3192_v14, 128  ;;  %v3202_v14 = vld [vmem:[%s7429_s12 + $0x8] sm:$0xff] }
0x2491   :  { %3225 = vxpose.xlu1.b32.cont [9/16] %v3193_v57, 128 }
0x2495   :  { %3226 = vxpose.xlu1.b32.cont [10/16] %v3194_v43, 128 }
0x2499   :  { %3227 = vxpose.xlu1.b32.cont [11/16] %v3195_v44, 128 }
0x249d   :  { %3228 = vxpose.xlu1.b32.cont [12/16] %v3196_v23, 128 }
0x24a1   :  { %3229 = vxpose.xlu1.b32.cont [13/16] %v3197_v61, 128 }
0x24a5   :  { %3230 = vxpose.xlu1.b32.cont [14/16] %v3198_v15, 128 }
0x24a9   :  { %3231 = vxpose.xlu1.b32.cont [15/16] %v3199_v12, 128 }
0x24ad   :  { %3232 = vxpose.xlu1.b32.end [16/16] %v3200_v10, 128 }
0x24cb   :  { %v2805_v46 = vpop.xlane.xlu1 %2804  ;;  %5717 = vset.pattern.permute.xlu1 %v7423_v9 }
0x24cc   :  { %v2806_v58 = vadd.f32 0.5, %v2805_v46 }
0x24ce   :  { %v2807_v59 = vfloor.f32 %v2806_v58 }
0x24d0   :  { %v2808_v42 = vmax.f32 %v2807_v59, 1.0 }
0x24d2   :  { %v2813_v2 = vadd.f32 %v2812_v0, %v2808_v42 }
0x24d4   :  { %4816 = vmatpush3.msra.mxu0 %v2813_v2 }
0x24d5   :  { %4818 = vmatmul.mubr.msk.f32.vlgmr.msra.gmra.mrb[26].mxu0 %vm2817_vm15, %v4456_v54 }
0x24d6   :  { %3027 = vmatprep.mubr.f32.mxu0 %v7411_v28 }
0x24f1   :  { %v3233_v38 = vpop.trf.xlu1 }
0x24f5   :  { %v3234_v1 = vpop.trf.xlu1 }
0x24f9   :  { %v3235_v6 = vpop.trf.xlu1 }
0x24fd   :  { %v3236_v29 = vpop.trf.xlu1 }
0x2501   :  { %v3237_v32 = vpop.trf.xlu1 }
0x2505   :  { %v3238_v18 = vpop.trf.xlu1 }
0x2509   :  { %v3239_v17 = vpop.trf.xlu1 }
0x250d   :  { %v3240_v20 = vpop.trf.xlu1 }
0x2511   :  { %v3241_v36 = vpop.trf.xlu1 }
0x2515   :  { %v3242_v33 = vpop.trf.xlu1 }
0x2519   :  { %v3243_v39 = vpop.trf.xlu1 }
0x25a8   :  { %v2887_v63 = vpop.f32.mrb[26].mxu0 }
0x25a9   :  { %v2891_v49 = vsub.f32 %v2887_v63, %v2813_v2  ;;  %v4819_v48 = vpop.f32.mrb[27].mxu0  ;;  %4375 = vst.msk [vmem:[#allocation10 - $0x7] sm:$0x80] %vm4374_vm1, %v2887_v63 }
0x25ab   :  { %2897 = vperm.xlu0 %5716, %v2891_v49  }
0x25af   :  { %2904 = vperm.xlu0 %5716, %v2887_v63   ;;  %v3205_v63 = vld [vmem:[%s7429_s12 + $0x20] sm:$0xff] }
0x25cd   :  { %2919 = vxpose.xlu0.b32.start.end [1/1] (short) (narrow) %v6857_v35, 32 }
0x25da   :  { %3052 = vxpose.xlu0.b32.start.end [1/1] (short) (narrow) %v7424_v56, 32  ;;  %v3203_v56 = vld [vmem:[%s7429_s12 + $0x10] sm:$0xff] }
0x25e7   :  { %3648 = vxpose.xlu0.b32.start [1/4] (short) (narrow) %v3574_v50, 8  ;;  %v3206_v50 = vld [vmem:[%s7429_s12 + $0x28] sm:$0xff] }
0x25eb   :  { %3649 = vxpose.xlu0.b32.cont [2/4] (short) (narrow) %v3575_v62, 8 }
0x25ef   :  { %3650 = vxpose.xlu0.b32.cont [3/4] (short) (narrow) %v3576_v24, 8 }
0x25f3   :  { %3651 = vxpose.xlu0.b32.end [4/4] (short) (narrow) %v3577_v5, 8 }
0x262a   :  { %v2898_v41 = vpop.permute.xlu0 %2897 }
0x262b   :  { %vm2900_vm2 = vcmp.ge.f32.partialorder %v2893_v8, %v2898_v41  ;;  %vm2901_vm7 = vcmp.ge.f32.partialorder %v2894_v13, %v2898_v41 }
0x262e   :  { %v2905_v35 = vpop.permute.xlu0 %2904 }
0x262f   :  { %vm7016_vm3 = vcmp.lt.f32.partialorder %v2893_v8, %v2905_v35  ;;  %vm7020_vm5 = vcmp.lt.f32.partialorder %v2894_v13, %v2905_v35 }
0x2630   :  { %vm2909_vm8 = vmand %vm2900_vm2, %vm7016_vm3 }
0x2631   :  { %vm2910_vm9 = vmand %vm2901_vm7, %vm7020_vm5 }
0x2632   :  { %4462 = vmatprep.subr.msk.mxu0 %vm2910_vm9, %v5951_v3  ;;  %4468 = vmatprep.subr.msk.mxu1 %vm2910_vm9, %v5951_v3 }
0x2633   :  { %4463 = vmatpush1.msk.msra.mxu0 %vm2909_vm8, %v5951_v3  ;;  %4469 = vmatpush1.msk.msra.mxu1 %vm2909_vm8, %v5951_v3  ;;  %v3207_v3 = vld [vmem:[%s7429_s12 + $0x30] sm:$0xff] }
0x2634   :  { %4820 = vmatprep.subr.mxu0 %v6832_v22 }
0x264d   :  { %v2935_v21 = vpop.trf.xlu0 }
0x264e   :  { %4464 = vmatmul.mubr.msk.f32.vlgmr.msra.gmra.mrb[28].mxu0 %vm2817_vm15, %v2935_v21  ;;  %v3208_v21 = vld [vmem:[%s7429_s12 + $0x38] sm:$0xff] }
0x264f   :  { %4821 = vmatpush3.xpose.msra.mxu0 %v6832_v22  ;;  %3033 = vmatprep.mubr.f32.mxu0 %v7411_v28  ;;  %v3244_v22 = vpop.trf.xlu1 }
0x2651   :  { %v2936_v27 = vpop.trf.xlu0 }
0x2652   :  { %4465 = vmatmul.mubr.msk.f32.gmra.mrb[30].mxu0 %vm2817_vm15, %v2936_v27 }
0x2653   :  { %3039 = vmatprep.mubr.f32.mxu0 %v7411_v28  ;;  %v3245_v40 = vpop.trf.xlu1 }
0x2655   :  { %v2937_v34 = vpop.trf.xlu0 }
0x2656   :  { %4466 = vmatmul.mubr.msk.f32.gmra.mrb[32].mxu0 %vm2817_vm15, %v2937_v34 }
0x2657   :  { %3045 = vmatprep.mubr.f32.mxu0 %v7411_v28  ;;  %v3246_v45 = vpop.trf.xlu1 }
0x2659   :  { %v2938_v26 = vpop.trf.xlu0 }
0x265a   :  { %4467 = vmatmul.mubr.msk.f32.gmra.mrb[34].mxu0 %vm2817_vm15, %v2938_v26 }
0x265b   :  { %4822 = vmatprep.mubr.f32.mxu0 %v3233_v38  ;;  %v3247_v11 = vpop.trf.xlu1 }
0x265d   :  { %v3068_v59 = vpop.trf.xlu0 }
0x265e   :  { %4823 = vmatmul.mubr.f32.vlgmr.msra.gmra.mrb[36].mxu0 %v3234_v1  ;;  %4470 = vmatmul.mubr.msk.f32.vlgmr.msra.gmra.mrb[26].mxu1 %vm2817_vm15, %v3068_v59  ;;  %v3204_v1 = vld [vmem:[%s7429_s12 + $0x18] sm:$0xff]  ;;  %v3211_v59 = vld [vmem:[%s7429_s12 + $0x50] sm:$0xff] }
0x265f   :  { %4825 = vmatprep.mubr.f32.mxu0 %v3235_v6  ;;  %v3248_v46 = vpop.trf.xlu1  ;;  %3166 = vmatprep.mubr.f32.mxu1 %v7411_v28 }
0x2661   :  { %v3069_v42 = vpop.trf.xlu0 }
0x2662   :  { %4826 = vmatmul.mubr.f32.gmra.mrb[38].mxu0 %v3236_v29  ;;  %4471 = vmatmul.mubr.msk.f32.gmra.mrb[28].mxu1 %vm2817_vm15, %v3069_v42  ;;  %v3214_v42 = vld [vmem:[%s7429_s12 + $0x68] sm:$0xff] }
0x2663   :  { %4828 = vmatprep.mubr.f32.mxu0 %v3237_v32  ;;  %3172 = vmatprep.mubr.f32.mxu1 %v7411_v28 }
0x2665   :  { %v3070_v55 = vpop.trf.xlu0 }
0x2666   :  { %4829 = vmatmul.mubr.f32.gmra.mrb[40].mxu0 %v3238_v18  ;;  %4472 = vmatmul.mubr.msk.f32.gmra.mrb[30].mxu1 %vm2817_vm15, %v3070_v55  ;;  %v3216_v18 = vld [vmem:[%s7429_s12 + $0x78] sm:$0xff] }
0x2667   :  { %4831 = vmatprep.mubr.f32.mxu0 %v3239_v17  ;;  %3178 = vmatprep.mubr.f32.mxu1 %v7411_v28 }
0x2669   :  { %v3071_v25 = vpop.trf.xlu0 }
0x266a   :  { %4832 = vmatmul.mubr.f32.gmra.mrb[42].mxu0 %v3240_v20  ;;  %4473 = vmatmul.mubr.msk.f32.gmra.mrb[32].mxu1 %vm2817_vm15, %v3071_v25 }
0x266b   :  { %4834 = vmatprep.mubr.f32.mxu0 %v3241_v36  ;;  %3567 = vmatprep.mubr.f32.mxu1 %v7411_v28  ;;  %v3209_v36 = vld [vmem:[%s7429_s12 + $0x40] sm:$0xff] }
0x266e   :  { %4835 = vmatmul.mubr.f32.gmra.mrb[44].mxu0 %v3242_v33 }
0x266f   :  { %4837 = vmatprep.mubr.f32.mxu0 %v3243_v39  ;;  %v3210_v39 = vld [vmem:[%s7429_s12 + $0x48] sm:$0xff] }
0x2672   :  { %4838 = vmatmul.mubr.f32.gmra.mrb[46].mxu0 %v3244_v22 }
0x2673   :  { %4840 = vmatprep.mubr.f32.mxu0 %v3245_v40 }
0x2676   :  { %4841 = vmatmul.mubr.f32.gmra.mrb[48].mxu0 %v3246_v45 }
0x2677   :  { %4843 = vmatprep.mubr.f32.mxu0 %v3247_v11  ;;  %v3213_v11 = vld [vmem:[%s7429_s12 + $0x60] sm:$0xff] }
0x267a   :  { %4844 = vmatmul.mubr.f32.gmra.mrb[50].mxu0 %v3248_v46 }
0x267b   :  { %4124 = vmatprep.mubr.f32.mxu0 %v7411_v28 }
0x2721   :  { %v7038_v58 = vpop.f32.mrb[28].mxu0 }
0x2722   :  { %v7040_v0 = vpop.f32.mrb[29].mxu0 }
0x2725   :  { %v7044_v37 = vpop.f32.mrb[30].mxu0 }
0x2726   :  { %v7046_v2 = vpop.f32.mrb[31].mxu0 }
0x2729   :  { %v7050_v54 = vpop.f32.mrb[32].mxu0 }
0x272a   :  { %v7052_v4 = vpop.f32.mrb[33].mxu0 }
0x272d   :  { %v7056_v7 = vpop.f32.mrb[34].mxu0 }
0x272e   :  { %v7058_v31 = vpop.f32.mrb[35].mxu0 }
0x2731   :  { %v4824_v51 = vpop.f32.mrb[36].mxu0 }
0x2732   :  { %v3315_v57 = vpop.f32.mrb[37].mxu0  ;;  %v3321_v44 = vadd.f32 %v4824_v51, %v3202_v14 }
0x2733   :  { %v3316_v43 = vadd.f32 %v3315_v57, %v3201_v47  ;;  %v3212_v47 = vld [vmem:[%s7429_s12 + $0x58] sm:$0xff] }
0x2734   :  { %v3399_v12 = vadd.f32 1.0, %v3321_v44 }
0x2735   :  { %v3398_v23 = vadd.f32 1.0, %v3316_v43  ;;  %v4827_v61 = vpop.f32.mrb[38].mxu0  ;;  %v3215_v43 = vld [vmem:[%s7429_s12 + $0x70] sm:$0xff] }
0x2736   :  { %v3325_v15 = vpop.f32.mrb[39].mxu0  ;;  %v3331_v6 = vadd.f32 %v4827_v61, %v3204_v1  ;;  %v3395_v61 = vld [vmem:[%s7430_s18 + $0x8] sm:$0xff] }
0x2737   :  { %3404 = vperm.xlu0 %5716, %v3398_v23   ;;  %v3326_v24 = vadd.f32 %v3325_v15, %v3203_v56  ;;  %v3394_v23 = vld [vmem:[%s7430_s18] sm:$0xff]  ;;  %v3396_v15 = vld [vmem:[%s7430_s18 + $0x10] sm:$0xff]  ;;  %v3759_v56 = vld [vmem:[%s7431_s23 + $0x28] sm:$0xff] }
0x2738   :  { %v3401_v35 = vadd.f32 1.0, %v3331_v6  ;;  %v3763_v1 = vld [vmem:[%s7431_s23 + $0x48] sm:$0xff]  ;;  %v3764_v6 = vld [vmem:[%s7431_s23 + $0x50] sm:$0xff] }
0x2739   :  { %v4830_v10 = vpop.f32.mrb[40].mxu0  ;;  %v3400_v41 = vadd.f32 1.0, %v3326_v24  ;;  %v3638_v24 = vld [vmem:[#allocation3] sm:$0x1] }
0x273a   :  { %v3335_v9 = vpop.f32.mrb[41].mxu0  ;;  %v3341_v5 = vadd.f32 %v4830_v10, %v3206_v50  ;;  %v3754_v10 = vld [vmem:[%s7431_s23] sm:$0xff] }
0x273b   :  { %3409 = vperm.xlu0 %5716, %v3399_v12   ;;  %v3336_v49 = vadd.f32 %v3335_v9, %v3205_v63  ;;  %v3397_v12 = vld [vmem:[%s7430_s18 + $0x18] sm:$0xff]  ;;  %v3755_v9 = vld [vmem:[%s7431_s23 + $0x8] sm:$0xff]  ;;  %v3756_v63 = vld [vmem:[%s7431_s23 + $0x10] sm:$0xff] }
0x273c   :  { %v3458_v50 = vld [vmem:[#allocation2] sm:$0x1] }
0x273d   :  { %v4833_v48 = vpop.f32.mrb[42].mxu0 }
0x273e   :  { %v3345_v62 = vpop.f32.mrb[43].mxu0  ;;  %v3351_v34 = vadd.f32 %v4833_v48, %v3208_v21  ;;  %v3758_v48 = vld [vmem:[%s7431_s23 + $0x20] sm:$0xff] }
0x273f   :  { %3432 = vperm.xlu0 %5716, %v3336_v49   ;;  %v3346_v17 = vadd.f32 %v3345_v62, %v3207_v3  ;;  %v3757_v49 = vld [vmem:[%s7431_s23 + $0x18] sm:$0xff]  ;;  %v3760_v62 = vld [vmem:[%s7431_s23 + $0x30] sm:$0xff]  ;;  %v3767_v3 = vld [vmem:[%s7431_s23 + $0x68] sm:$0xff] }
0x2741   :  { %v4836_v38 = vpop.f32.mrb[44].mxu0 }
0x2742   :  { %v3355_v53 = vpop.f32.mrb[45].mxu0  ;;  %v3361_v22 = vadd.f32 %v4836_v38, %v3210_v39  ;;  %v3762_v38 = vld [vmem:[%s7431_s23 + $0x40] sm:$0xff] }
0x2743   :  { %3437 = vperm.xlu0 %5716, %v3341_v5   ;;  %v3356_v26 = vadd.f32 %v3355_v53, %v3209_v36  ;;  %v3761_v5 = vld [vmem:[%s7431_s23 + $0x38] sm:$0xff]  ;;  %v7092_v53 = vpop.trf.xlu0  ;;  %v3768_v36 = vld [vmem:[%s7431_s23 + $0x70] sm:$0xff] }
0x2744   :  { %v3579_v45 = vadd.f32 1.0, %v3361_v22 }
0x2745   :  { %v4839_v8 = vpop.f32.mrb[46].mxu0  ;;  %v3578_v40 = vadd.f32 1.0, %v3356_v26 }
0x2746   :  { %v3365_v13 = vpop.f32.mrb[47].mxu0  ;;  %v3371_v51 = vadd.f32 %v4839_v8, %v3212_v47  ;;  %v3765_v8 = vld [vmem:[%s7431_s23 + $0x58] sm:$0xff] }
0x2747   :  { %3414 = vperm.xlu0 %5716, %v3400_v41   ;;  %v3366_v55 = vadd.f32 %v3365_v13, %v3211_v59 }
0x2748   :  { %v3581_v57 = vadd.f32 1.0, %v3371_v51 }
0x2749   :  { %v4842_v29 = vpop.f32.mrb[48].mxu0  ;;  %v3580_v14 = vadd.f32 1.0, %v3366_v55 }
0x274a   :  { %v3375_v32 = vpop.f32.mrb[49].mxu0  ;;  %v3381_v25 = vadd.f32 %v4842_v29, %v3214_v42 }
0x274b   :  { %3419 = vperm.xlu0 %5716, %v3401_v35   ;;  %v3376_v46 = vadd.f32 %v3375_v32, %v3213_v11  ;;  %v3766_v35 = vld [vmem:[%s7431_s23 + $0x60] sm:$0xff] }
0x274d   :  { %v4845_v20 = vpop.f32.mrb[50].mxu0 }
0x274e   :  { %v3391_v27 = vadd.f32 %v4845_v20, %v3216_v18  ;;  %v3385_v33 = vpop.f32.mrb[51].mxu0 }
0x274f   :  { %3442 = vperm.xlu0 %5716, %v3346_v17   ;;  %v3386_v44 = vadd.f32 %v3385_v33, %v3215_v43 }
0x2750   :  { %3627 = vperm.xlu1 %5717, %v3391_v27  }
0x2753   :  { %3447 = vperm.xlu0 %5716, %v3351_v34  }
0x2757   :  { %3584 = vperm.xlu0 %5716, %v3578_v40  }
0x275b   :  { %3589 = vperm.xlu0 %5716, %v3579_v45   ;;  %v3769_v45 = vld [vmem:[%s7431_s23 + $0x78] sm:$0xff] }
0x275f   :  { %3612 = vperm.xlu0 %5716, %v3376_v46  }
0x2763   :  { %3617 = vperm.xlu0 %5716, %v3381_v25  }
0x2767   :  { %3594 = vperm.xlu0 %5716, %v3580_v14  }
0x276b   :  { %3599 = vperm.xlu0 %5716, %v3581_v57  }
0x276f   :  { %3622 = vperm.xlu0 %5716, %v3386_v44  }
0x2779   :  { %3468 = vxpose.xlu1.b32.start [1/4] (short) (narrow) %v3394_v23, 8 }
0x277d   :  { %3469 = vxpose.xlu1.b32.cont [2/4] (short) (narrow) %v3395_v61, 8 }
0x2781   :  { %3470 = vxpose.xlu1.b32.cont [3/4] (short) (narrow) %v3396_v15, 8 }
0x2785   :  { %3471 = vxpose.xlu1.b32.end [4/4] (short) (narrow) %v3397_v12, 8 }
0x278d   :  { %3779 = vxpose.xlu0.b32.start [1/16] (narrow) %v3754_v10, 72 }
0x2791   :  { %3780 = vxpose.xlu0.b32.cont [2/16] (narrow) %v3755_v9, 72 }
0x2795   :  { %3781 = vxpose.xlu0.b32.cont [3/16] (narrow) %v3756_v63, 72 }
0x2799   :  { %3782 = vxpose.xlu0.b32.cont [4/16] (narrow) %v3757_v49, 72 }
0x279d   :  { %3783 = vxpose.xlu0.b32.cont [5/16] (narrow) %v3758_v48, 72 }
0x27a1   :  { %3784 = vxpose.xlu0.b32.cont [6/16] (narrow) %v3759_v56, 72 }
0x27a3   :  { %3461 = vperm.xlu1 %5717, %v3458_v50  }
0x27a5   :  { %3785 = vxpose.xlu0.b32.cont [7/16] (narrow) %v3760_v62, 72 }
0x27a7   :  { %3641 = vperm.xlu1 %5717, %v3638_v24  }
0x27a9   :  { %3786 = vxpose.xlu0.b32.cont [8/16] (narrow) %v3761_v5, 72 }
0x27ad   :  { %3787 = vxpose.xlu0.b32.cont [9/16] (narrow) %v3762_v38, 72 }
0x27b1   :  { %3788 = vxpose.xlu0.b32.cont [10/16] (narrow) %v3763_v1, 72 }
0x27b5   :  { %3789 = vxpose.xlu0.b32.cont [11/16] (narrow) %v3764_v6, 72 }
0x27b6   :  { %v3405_v41 = vpop.permute.xlu0 %3404 }
0x27b7   :  { %v3422_v32 = vmul.f32 %v3405_v41, %v7038_v58  ;;  %v3423_v18 = vmul.f32 %v3405_v41, %v7040_v0 }
0x27b9   :  { %3790 = vxpose.xlu0.b32.cont [12/16] (narrow) %v3765_v8, 72 }
0x27ba   :  { %v3410_v13 = vpop.permute.xlu0 %3409 }
0x27bb   :  { %v3424_v17 = vmul.f32 %v3410_v13, %v7044_v37  ;;  %v3425_v20 = vmul.f32 %v3410_v13, %v7046_v2 }
0x27bd   :  { %3791 = vxpose.xlu0.b32.cont [13/16] (narrow) %v3766_v35, 72 }
0x27be   :  { %v3433_v29 = vpop.permute.xlu0 %3432 }
0x27bf   :  { %v3450_v27 = vadd.f32 %v3433_v29, %v3422_v32  ;;  %v3451_v33 = vadd.f32 %v3433_v29, %v3423_v18 }
0x27c1   :  { %3792 = vxpose.xlu0.b32.cont [14/16] (narrow) %v3767_v3, 72 }
0x27c2   :  { %v3438_v21 = vpop.permute.xlu0 %3437 }
0x27c3   :  { %v3452_v34 = vadd.f32 %v3438_v21, %v3424_v17  ;;  %v3453_v26 = vadd.f32 %v3438_v21, %v3425_v20  ;;  %v7116_v17 = vpop.f32.mrb[26].mxu1 }
0x27c4   :  { %v7118_v20 = vpop.f32.mrb[27].mxu1 }
0x27c5   :  { %v5643_v39 = vpack.c.bf16 %v3453_v26, %v3451_v33  ;;  %v5645_v22 = vpack.c.bf16 %v3452_v34, %v3450_v27  ;;  %3793 = vxpose.xlu0.b32.cont [15/16] (narrow) %v3768_v36, 72 }
0x27c6   :  { %v3415_v40 = vpop.permute.xlu0 %3414 }
0x27c7   :  { %5644 = vmatprep.subr.bf16.mxu1 %v5643_v39  ;;  %v3426_v59 = vmul.f32 %v3415_v40, %v7050_v54  ;;  %v3427_v42 = vmul.f32 %v3415_v40, %v7052_v4 }
0x27c8   :  { %5646 = vmatpush1.bf16.msra.mxu1 %v5645_v22 }
0x27c9   :  { %3794 = vxpose.xlu0.b32.end [16/16] (narrow) %v3769_v45, 72 }
0x27ca   :  { %v3420_v11 = vpop.permute.xlu0 %3419 }
0x27cb   :  { %v3428_v55 = vmul.f32 %v3420_v11, %v7056_v7  ;;  %v3429_v25 = vmul.f32 %v3420_v11, %v7058_v31 }
0x27ce   :  { %v3443_v46 = vpop.permute.xlu0 %3442 }
0x27cf   :  { %v3454_v51 = vadd.f32 %v3443_v46, %v3426_v59  ;;  %v3455_v14 = vadd.f32 %v3443_v46, %v3427_v42  ;;  %v3628_v8 = vpop.permute.xlu1 %3627 }
0x27d2   :  { %v3448_v47 = vpop.permute.xlu0 %3447 }
0x27d3   :  { %v3456_v57 = vadd.f32 %v3448_v47, %v3428_v55  ;;  %v3457_v43 = vadd.f32 %v3448_v47, %v3429_v25  ;;  %v3770_v55 = vld [vmem:[%s7432_s27] sm:$0xff] }
0x27d5   :  { %v5647_v44 = vpack.c.bf16 %v3457_v43, %v3455_v14  ;;  %v5649_v23 = vpack.c.bf16 %v3456_v57, %v3454_v51  ;;  %v3771_v14 = vld [vmem:[%s7432_s27 + $0x8] sm:$0xff] }
0x27d6   :  { %v3585_v61 = vpop.permute.xlu0 %3584 }
0x27d7   :  { %5648 = vmatprep.subr.bf16.mxu1 %v5647_v44  ;;  %v3602_v10 = vmul.f32 %v3585_v61, %v7038_v58  ;;  %v3603_v9 = vmul.f32 %v3585_v61, %v7040_v0  ;;  %v3772_v61 = vld [vmem:[%s7432_s27 + $0x10] sm:$0xff] }
0x27d8   :  { %5650 = vmatpush1.bf16.msra.mxu1 %v5649_v23 }
0x27da   :  { %v3590_v15 = vpop.permute.xlu0 %3589 }
0x27db   :  { %v3604_v63 = vmul.f32 %v3590_v15, %v7044_v37  ;;  %v3605_v49 = vmul.f32 %v3590_v15, %v7046_v2 }
0x27de   :  { %v3613_v12 = vpop.permute.xlu0 %3612 }
0x27df   :  { %v3630_v56 = vadd.f32 %v3613_v12, %v3602_v10  ;;  %v3631_v50 = vadd.f32 %v3613_v12, %v3603_v9 }
0x27e2   :  { %v3618_v48 = vpop.permute.xlu0 %3617 }
0x27e3   :  { %v3632_v62 = vadd.f32 %v3618_v48, %v3604_v63  ;;  %v3633_v24 = vadd.f32 %v3618_v48, %v3605_v49  ;;  %v3773_v63 = vld [vmem:[%s7432_s27 + $0x18] sm:$0xff] }
0x27e5   :  { %v5651_v5 = vpack.c.bf16 %v3633_v24, %v3631_v50  ;;  %v5653_v38 = vpack.c.bf16 %v3632_v62, %v3630_v56  ;;  %v3774_v62 = vld [vmem:[%s7432_s27 + $0x20] sm:$0xff] }
0x27e6   :  { %v3595_v1 = vpop.permute.xlu0 %3594 }
0x27e7   :  { %5652 = vmatprep.subr.bf16.mxu1 %v5651_v5  ;;  %v3606_v0 = vmul.f32 %v3595_v1, %v7050_v54  ;;  %v3607_v37 = vmul.f32 %v3595_v1, %v7052_v4 }
0x27ea   :  { %v3600_v6 = vpop.permute.xlu0 %3599 }
0x27eb   :  { %v3608_v41 = vmul.f32 %v3600_v6, %v7056_v7  ;;  %v3609_v58 = vmul.f32 %v3600_v6, %v7058_v31  ;;  %v7120_v7 = vpop.f32.mrb[28].mxu1 }
0x27ec   :  { %v7123_v54 = vpop.f32.mrb[29].mxu1 }
0x27ed   :  { %v3636_v13 = vadd.f32 %v3628_v8, %v3608_v41  ;;  %v3637_v35 = vadd.f32 %v3628_v8, %v3609_v58  ;;  %v7126_v4 = vpop.f32.mrb[30].mxu1  ;;  %v3775_v58 = vld [vmem:[%s7432_s27 + $0x28] sm:$0xff] }
0x27ee   :  { %v3623_v2 = vpop.permute.xlu0 %3622  ;;  %v7128_v31 = vpop.f32.mrb[31].mxu1 }
0x27ef   :  { %v3634_v29 = vadd.f32 %v3623_v2, %v3606_v0  ;;  %v3635_v3 = vadd.f32 %v3623_v2, %v3607_v37  ;;  %v7131_v36 = vpop.f32.mrb[32].mxu1 }
0x27f0   :  { %v7135_v27 = vpop.f32.mrb[33].mxu1 }
0x27f1   :  { %v5655_v32 = vpack.c.bf16 %v3637_v35, %v3635_v3  ;;  %v5657_v18 = vpack.c.bf16 %v3636_v13, %v3634_v29  ;;  %v3776_v13 = vld [vmem:[%s7432_s27 + $0x30] sm:$0xff] }
0x27f9   :  { %v3484_v21 = vpop.trf.xlu1 }
0x27fa   :  { %4474 = vmatmul.mubr.msk.f32.vlgmr.msra.gmra.mrb[34].mxu1 %vm278_vm4, %v3484_v21  ;;  %v4013_v21 = vld [vmem:[%s6089_s20] sm:$0xff] }
0x27fb   :  { %5654 = vmatpush1.bf16.msra.mxu1 %v5653_v38  ;;  %3747 = vmatprep.mubr.f32.mxu1 %v7411_v28 }
0x27fc   :  { %5656 = vmatprep.subr.bf16.mxu1 %v5655_v32  ;;  %v3777_v32 = vld [vmem:[%s7432_s27 + $0x38] sm:$0xff] }
0x27ff   :  { %5658 = vmatpush1.bf16.msra.mxu1 %v5657_v18 }
0x2800   :  { %4846 = vmatprep.subr.mxu1 %v7411_v28 }
0x2802   :  { %4475 = vmatmul.mubr.msk.f32.vlgmr.msra.gmra.mrb[36].mxu1 %vm278_vm4, %v7092_v53 }
0x2803   :  { %4848 = vmatprep.mubr.msk.f32.mxu1 %vm5945_vm0, %v7411_v28 }
0x2808   :  { %4847 = vmatpush3.xpose.msra.mxu1 %v6828_v19 }
0x280d   :  { %v3795_v33 = vpop.trf.xlu0 }
0x280e   :  { %4849 = vmatmul.mubr.f32.vlgmr.msra.gmra.mrb[38].mxu1 %v3795_v33 }
0x280f   :  { %4851 = vmatprep.mubr.msk.f32.mxu1 %vm5945_vm0, %v7411_v28 }
0x2811   :  { %v3796_v34 = vpop.trf.xlu0 }
0x2812   :  { %4852 = vmatmul.mubr.f32.gmra.mrb[40].mxu1 %v3796_v34 }
0x2813   :  { %4854 = vmatprep.mubr.msk.f32.mxu1 %vm5945_vm0, %v7411_v28 }
0x2815   :  { %v3797_v26 = vpop.trf.xlu0 }
0x2816   :  { %4855 = vmatmul.mubr.f32.gmra.mrb[42].mxu1 %v3797_v26  ;;  %v3778_v26 = vld [vmem:[%s7432_s27 + $0x40] sm:$0xf] }
0x2817   :  { %4857 = vmatprep.mubr.msk.f32.mxu1 %vm5945_vm0, %v7411_v28 }
0x2819   :  { %v3798_v53 = vpop.trf.xlu0 }
0x281a   :  { %4858 = vmatmul.mubr.f32.gmra.mrb[44].mxu1 %v3798_v53  ;;  %v4014_v53 = vld [vmem:[%s6089_s20 + $0x8] sm:$0xff] }
0x281b   :  { %4860 = vmatprep.mubr.msk.f32.mxu1 %vm5945_vm0, %v7411_v28 }
0x281d   :  { %v3799_v19 = vpop.trf.xlu0 }
0x281e   :  { %4861 = vmatmul.mubr.f32.gmra.mrb[46].mxu1 %v3799_v19 }
0x281f   :  { %4863 = vmatprep.mubr.msk.f32.mxu1 %vm5945_vm0, %v7411_v28 }
0x2821   :  { %v3800_v39 = vpop.trf.xlu0 }
0x2822   :  { %4864 = vmatmul.mubr.f32.gmra.mrb[48].mxu1 %v3800_v39  ;;  %v4015_v39 = vld [vmem:[%s6089_s20 + $0x10] sm:$0xff] }
0x2823   :  { %4866 = vmatprep.mubr.msk.f32.mxu1 %vm5945_vm0, %v7411_v28 }
0x2825   :  { %v3801_v22 = vpop.trf.xlu0 }
0x2826   :  { %4867 = vmatmul.mubr.f32.gmra.mrb[50].mxu1 %v3801_v22  ;;  %v4016_v22 = vld [vmem:[%s6089_s20 + $0x18] sm:$0xff] }
0x2827   :  { %4869 = vmatprep.mubr.msk.f32.mxu1 %vm5945_vm0, %v7411_v28 }
0x2829   :  { %v3802_v40 = vpop.trf.xlu0 }
0x282a   :  { %4870 = vmatmul.mubr.f32.gmra.mrb[52].mxu1 %v3802_v40  ;;  %v4017_v40 = vld [vmem:[%s6089_s20 + $0x20] sm:$0x1] }
0x282b   :  { %4872 = vmatprep.mubr.msk.f32.mxu1 %vm5945_vm0, %v7411_v28  ;;  %vm4050_vm0 = vcmask 7168  }
0x282d   :  { %v3803_v45 = vpop.trf.xlu0 }
0x282e   :  { %4873 = vmatmul.mubr.f32.gmra.mrb[54].mxu1 %v3803_v45  ;;  %v4237_v45 = vld [vmem:[%s6089_s20 + $0x21] sm:$0x1] }
0x28cd   :  { %v7156_v11 = vpop.f32.mrb[34].mxu1 }
0x28ce   :  { %v7158_v46 = vpop.f32.mrb[35].mxu1 }
0x28d5   :  { %v7160_v59 = vpop.f32.mrb[36].mxu1 }
0x28d6   :  { %v7162_v42 = vpop.f32.mrb[37].mxu1 }
0x28e1   :  { %v3877_v25 = vpop.f32.mrb[38].mxu1 }
0x28e2   :  { %v3878_v47 = vadd.f32 %v3877_v25, %v3770_v55  ;;  %v4850_v51 = vpop.f32.mrb[39].mxu1  ;;  %v4352_v55 = vld [vmem:[%s6094_s30] sm:$0xff]  ;;  %v3462_v25 = vpop.permute.xlu1 %3461  ;;  %s5952_s30 = smov [#allocation10]  }
0x28e3   :  { %s4384_s20 = sshll.u32 %s5952_s30, 4  ;;  %s4385_s20 = int_to_ptr.vmem [resolvable:$true] %s4384_s20 }
0x28e4   :  { %v3921_v57 = vadd.f32 1.0, %v3878_v47  ;;  %s5880_s0 = scalar_lea.vmem %s4385_s20, 16  ;;  %s5884_s22 = scalar_lea.vmem %s4385_s20, 32 }
0x28e5   :  { %v3882_v43 = vpop.f32.mrb[40].mxu1  ;;  %p5881_p10 = scmp.ne.s32.totalorder %s4385_s20, %s5880_s0  ;;  %p5885_p11 = scmp.lt.s32.totalorder %s4385_s20, %s4385_s20 }
0x28e6   :  { %v3883_v44 = vadd.f32 %v3882_v43, %v3771_v14  ;;  %3927 = vperm.xlu0 %5716, %v3921_v57   ;;  %v4853_v23 = vpop.f32.mrb[41].mxu1  ;;  %v3642_v47 = vpop.permute.xlu1 %3641  ;;  %p5886_p12 = scmp.lt.s32.totalorder %s5884_s22, %s5880_s0 }
0x28e8   :  { %v3922_v15 = vadd.f32 1.0, %v3883_v44  ;;  %p5887_p13 = por %p5886_p12, %p5885_p11 }
0x28e9   :  { %v3887_v12 = vpop.f32.mrb[42].mxu1 }
0x28ea   :  { %v3888_v10 = vadd.f32 %v3887_v12, %v3772_v61  ;;  %3932 = vperm.xlu1 %5717, %v3922_v15   ;;  %v4856_v9 = vpop.f32.mrb[43].mxu1  ;;  %p5888_p0 = pnand %p5887_p13, %p5881_p10 }
0x28ec   :  { %v3923_v49 = vadd.f32 1.0, %v3888_v10 }
0x28ed   :  { %v3892_v48 = vpop.f32.mrb[44].mxu1 }
0x28ee   :  { %v3893_v56 = vadd.f32 %v3892_v48, %v3773_v63  ;;  %3937 = vperm.xlu1 %5717, %v3923_v49   ;;  %v4859_v50 = vpop.f32.mrb[45].mxu1 }
0x28f0   :  { %v3924_v24 = vadd.f32 1.0, %v3893_v56 }
0x28f1   :  { %v3897_v5 = vpop.f32.mrb[46].mxu1 }
0x28f2   :  { %3942 = vperm.xlu1 %5717, %v3924_v24   ;;  %v3898_v38 = vadd.f32 %v3897_v5, %v3774_v62  ;;  %v4862_v1 = vpop.f32.mrb[47].mxu1 }
0x28f4   :  { %v3994_v0 = vadd.f32 1.0, %v3898_v38 }
0x28f5   :  { %v3902_v6 = vpop.f32.mrb[48].mxu1 }
0x28f6   :  { %3955 = vperm.xlu1 %5717, %v3898_v38   ;;  %v4865_v41 = vpop.f32.mrb[49].mxu1  ;;  %v3903_v8 = vadd.f32 %v3902_v6, %v3775_v58  ;;  %v3467_v6 = vrot.slane %v3462_v25, %v6349_v16 }
0x28f9   :  { %v3907_v37 = vpop.f32.mrb[50].mxu1 }
0x28fa   :  { %3997 = vperm.xlu1 %5717, %v3994_v0   ;;  %v4868_v2 = vpop.f32.mrb[51].mxu1  ;;  %v3908_v29 = vadd.f32 %v3907_v37, %v3776_v13  ;;  %v3570_v37 = vadd.f32 %v7156_v11, %v3467_v6 }
0x28fd   :  { %v3912_v35 = vpop.f32.mrb[52].mxu1 }
0x28fe   :  { %3959 = vperm.xlu1 %5717, %v3903_v8   ;;  %v4871_v3 = vpop.f32.mrb[53].mxu1  ;;  %v3913_v33 = vadd.f32 %v3912_v35, %v3777_v32 }
0x2901   :  { %v3917_v18 = vpop.f32.mrb[54].mxu1 }
0x2902   :  { %3963 = vperm.xlu1 %5717, %v3908_v29   ;;  %v4874_v34 = vpop.f32.mrb[55].mxu1  ;;  %v3918_v19 = vadd.f32 %v3917_v18, %v3778_v26  ;;  %v3647_v26 = vrot.slane %v3642_v47, %v6349_v16 }
0x2904   :  { %4131 = vxpose.xlu0.b32.start [1/4] (short) (narrow) %v4013_v21, 8 }
0x2906   :  { %3967 = vperm.xlu1 %5717, %v3913_v33  }
0x2908   :  { %4132 = vxpose.xlu0.b32.cont [2/4] (short) (narrow) %v4014_v53, 8 }
0x290a   :  { %3971 = vperm.xlu1 %5717, %v3918_v19   ;;  %v3752_v19 = vadd.f32 %v7162_v42, %v3647_v26 }
0x290c   :  { %4133 = vxpose.xlu0.b32.cont [3/4] (short) (narrow) %v4015_v39, 8 }
0x2910   :  { %4134 = vxpose.xlu0.b32.end [4/4] (short) (narrow) %v4016_v22, 8 }
0x2933   :  { %4018 = vxpose.xlu1.b32.start.end [1/1] (short) (narrow) %v4017_v40, 8  ;;  %v3750_v40 = vadd.f32 %v7160_v59, %v3647_v26 }
0x2937   :  { %4238 = vxpose.xlu1.b32.start.end [1/1] (short) (narrow) %v4237_v45, 8 }
0x2955   :  { %4355 = vperm.xlu1 %5717, %v4352_v55  }
0x2965   :  { %v3928_v63 = vpop.permute.xlu0 %3927 }
0x2966   :  { %v3946_v62 = vmul.f32 %v3928_v63, %v7118_v20 }
0x2969   :  { %v3933_v51 = vpop.permute.xlu1 %3932 }
0x296a   :  { %v3947_v14 = vmul.f32 %v3933_v51, %v7120_v7  ;;  %v3945_v7 = vmul.f32 %v3928_v63, %v7116_v17  ;;  %v3572_v17 = vadd.f32 %v7158_v46, %v3467_v6 }
0x296d   :  { %v3938_v57 = vpop.permute.xlu1 %3937 }
0x296e   :  { %v3949_v43 = vmul.f32 %v3938_v57, %v7126_v4  ;;  %v3950_v44 = vmul.f32 %v3938_v57, %v7128_v31  ;;  %v3948_v4 = vmul.f32 %v3933_v51, %v7123_v54 }
0x2971   :  { %v3943_v23 = vpop.permute.xlu1 %3942 }
0x2972   :  { %v3951_v61 = vmul.f32 %v3943_v23, %v7131_v36  ;;  %v3952_v35 = vmul.f32 %v3943_v23, %v7135_v27 }
0x2975   :  { %v3956_v15 = vpop.permute.xlu1 %3955 }
0x2976   :  { %v3973_v49 = vrot.slane %v3956_v15, 2 }
0x2979   :  { %v3998_v12 = vpop.permute.xlu1 %3997 }
0x297a   :  { %v4000_v20 = vmul.f32 %v3998_v12, %v3570_v37  ;;  %v4001_v2 = vmul.f32 %v3998_v12, %v3572_v17  ;;  %v4005_v53 = vrot.slane %v3998_v12, 1 }
0x297c   :  { %v4008_v22 = vmul.f32 %v4005_v53, %v3752_v19  ;;  %v4007_v55 = vmul.f32 %v4005_v53, %v3750_v40 }
0x297d   :  { %v3960_v10 = vpop.permute.xlu1 %3959 }
0x297e   :  { %v3974_v9 = vrot.slane %v3960_v10, 2 }
0x2980   :  { %v3975_v56 = vsel %vm2706_vm10, %v3973_v49, %v3974_v9 }
0x2981   :  { %v3964_v48 = vpop.permute.xlu1 %3963  ;;  %v3986_v24 = vadd.f32 %v3975_v56, %v3945_v7  ;;  %v3987_v38 = vadd.f32 %v3975_v56, %v3946_v62 }
0x2982   :  { %v3976_v50 = vrot.slane %v3964_v48, 2 }
0x2984   :  { %v3977_v31 = vsel %vm2706_vm10, %v3974_v9, %v3976_v50  ;;  %v4147_v25 = vpop.trf.xlu0 }
0x2985   :  { %v3988_v36 = vadd.f32 %v3977_v31, %v3947_v14  ;;  %v3968_v5 = vpop.permute.xlu1 %3967  ;;  %v3989_v1 = vadd.f32 %v3977_v31, %v3948_v4 }
0x2986   :  { %v3978_v41 = vrot.slane %v3968_v5, 2 }
0x2987   :  { %v5659_v58 = vpack.c.bf16 %v3989_v1, %v3987_v38  ;;  %v5661_v0 = vpack.c.bf16 %v3988_v36, %v3986_v24 }
0x2988   :  { %v3979_v54 = vsel %vm2706_vm10, %v3976_v50, %v3978_v41 }
0x2989   :  { %v3972_v8 = vpop.permute.xlu1 %3971  ;;  %v3990_v18 = vadd.f32 %v3979_v54, %v3949_v43  ;;  %v3991_v33 = vadd.f32 %v3979_v54, %v3950_v44 }
0x298a   :  { %v3980_v13 = vrot.slane %v3972_v8, 2  ;;  %v4009_v39 = vrot.slane %v3972_v8, 3 }
0x298c   :  { %v3981_v29 = vsel %vm2706_vm10, %v3978_v41, %v3980_v13  ;;  %v4003_v3 = vadd.f32 %v4000_v20, %v3980_v13  ;;  %v4004_v32 = vadd.f32 %v4001_v2, %v3980_v13  ;;  %v4012_v45 = vadd.f32 %v4009_v39, %v4008_v22 }
0x298d   :  { %v3992_v21 = vadd.f32 %v3981_v29, %v3951_v61  ;;  %v3993_v34 = vadd.f32 %v3981_v29, %v3952_v35  ;;  %v4011_v16 = vadd.f32 %v4009_v39, %v4007_v55 }
0x298e   :  { %4476 = vmatprep.subr.msk.mxu0 %vm2697_vm6, %v4004_v32 }
0x298f   :  { %4477 = vmatpush1.msk.msra.mxu0 %vm2697_vm6, %v4003_v3  ;;  %v5663_v11 = vpack.c.bf16 %v3993_v34, %v3991_v33  ;;  %v5665_v46 = vpack.c.bf16 %v3992_v21, %v3990_v18 }
0x2990   :  { %5660 = vmatprep.subr.bf16.mxu0 %v5659_v58 }
0x29b3   :  { %v4034_v27 = vpop.trf.xlu1 }
0x29b4   :  { %4478 = vmatmul.mubr.msk.f32.vlgmr.msra.gmra.mrb[52].mxu0 %vm4050_vm0, %v4034_v27 }
0x29b5   :  { %5662 = vmatpush1.bf16.msra.mxu0 %v5661_v0  ;;  %4230 = vmatprep.mubr.f32.mxu0 %v7411_v28 }
0x29b6   :  { %5664 = vmatprep.subr.bf16.mxu0 %v5663_v11 }
0x29b7   :  { %v4254_v42 = vpop.trf.xlu1 }
0x29b9   :  { %5666 = vmatpush1.bf16.msra.mxu0 %v5665_v46 }
0x29ba   :  { %4480 = vmatprep.subr.msk.mxu0 %vm2697_vm6, %v4012_v45 }
0x29bc   :  { %4479 = vmatmul.mubr.msk.f32.vlgmr.msra.gmra.mrb[52].mxu0 %vm278_vm4, %v4147_v25 }
0x29bd   :  { %4481 = vmatpush1.msk.msra.mxu0 %vm2697_vm6, %v4011_v16  ;;  %4343 = vmatprep.mubr.f32.mxu0 %v7411_v28 }
0x29c4   :  { %4482 = vmatmul.mubr.msk.f32.vlgmr.msra.gmra.mrb[52].mxu0 %vm4050_vm0, %v4254_v42 }
0x29c5   :  { %5891 = shalt.err (!%p5888_p0)
}
0x29c6   :  { %s5892_s26 = scalar_lea.hbm %s6104_s4, 16 }
0x29c7   :  { %p5893_p1 = scmp.ne.s32.totalorder %s6104_s4, %s5892_s26  ;;  %p5896_p2 = scmp.lt.u32.totalorder %s5892_s26, %s6104_s4 }
0x29c9   :  { %p5898_p3 = pnand %p5896_p2, %p5893_p1 }
0x29cb   :  { %5901 = shalt.err (!%p5898_p3)
}
0x29cc   :  { %4387 = dma.vmem_to_hbm [thread:$0]  %s4385_s20, 16, %s6104_s4, [#allocation6]   ;;  %v4364_v43 = vsub.s32 7, %v7420_v52  ;;  %v4460_v44 = vsel %vm7016_vm3, 1.0, %v7411_v28  ;;  %v4461_v23 = vsel %vm7020_vm5, 1.0, %v7411_v28 }
0x29ce   :  { %v4365_v61 = vrot.slane %v4460_v44, %v4364_v43  ;;  %v4369_v12 = vrot.slane %v4461_v23, %v4364_v43 }
0x29d4   :  { %v4356_v59 = vpop.permute.xlu1 %4355 }
0x2a97   :  { %v4345_v47 = vpop.f32.mrb[52].mxu0 }
0x2a98   :  { %v4358_v51 = vadd.f32 %v4356_v59, %v4345_v47  ;;  %v4347_v14 = vpop.f32.mrb[53].mxu0 }
0x2a99   :  { %v4359_v57 = vadd.f32 %v4356_v59, %v4347_v14 }
0x2a9a   :  { %5810 = vtanh.f32 %v4358_v51 }
0x2a9b   :  { %5812 = vtanh.f32 %v4359_v57 }
0x2aa4   :  { %v5811_v15 = vpop.eup %5810 }
0x2aa5   :  { %v5813_v10 = vpop.eup %5812  ;;  %v4370_v9 = vmul.f32 %v5811_v15, %v4365_v61 }
0x2aa6   :  { %v4371_v63 = vmul.f32 %v5813_v10, %v4369_v12 }
0x2aa7   :  { %4372 = vst [vmem:[%s6099_s6] sm:$0xff] %v4370_v9 }
0x2aa8   :  { %4373 = vst.msk [vmem:[%s6099_s6 + $0x8] sm:$0xff] %vm2802_vm12, %v4371_v63 }
0x2aa9   :  { %5906 = dma.done.wait [#allocation6], 16  }
0x2aaa   :  { %5907 = vsyncadd [#allocation6], 4294967280 }
0x2aab   :  { %4393 = vsyncpa [#allocation5], 1 }
0x2aac   :  { %4394 = vsyncpa [#allocation8], 1 }
0x2aad   :  { %4395 = vsyncpa [#allocation6], 1 }

</bundles_post_ra>
